<compile_context>
chip_gen: v6e
topology: v6e:2x2x1
jax: 0.10.0
libtpu: 0.0.40
codegen_flags: <defaults>
</compile_context>

<pallas_src>
import functools
import math

import jax
import jax.numpy as jnp
import numpy as np
from jax.experimental import pallas as pl
from jax.experimental.pallas import tpu as pltpu

_SUB = 128  # fixed MXU sub-chunk width; W is always (_SUB, _SUB)


def pcen_kernel(params_ref, w_ref, decay_ref, x_ref, o_ref, carry_ref, *, eup_dtype):
    # params_ref : SMEM (5,)   f32  [alpha, delta, r, eps, delta**r]
    # w_ref      : VMEM (128,128) bf16, W[k,j] = s*(1-s)^(j-k) for j >= k else 0
    # decay_ref  : VMEM (1,128)   f32,  decay[j] = (1-s)^(j+1)
    # x_ref/o_ref: VMEM (tr, tc)        rows = flattened (batch*mel), lanes = time
    # carry_ref  : VMEM (tr, 1)   f32   M[:, last] of the previous time chunk
    alpha = params_ref[0]
    delta = params_ref[1]
    r = params_ref[2]
    eps = params_ref[3]
    delta_r = params_ref[4]

    # First time chunk of this row tile: reset the IIR carry (M[-1] = 0).
    @pl.when(pl.program_id(1) == 0)
    def _():
        carry_ref[...] = jnp.zeros_like(carry_ref)

    w = w_ref[...]                    # bf16, resident across the whole grid
    decay = decay_ref[...]            # f32
    r_e = r.astype(eup_dtype)

    n_sub = x_ref.shape[1] // _SUB    # static (tc is a multiple of 128)
    carry = carry_ref[...]            # (tr, 1) f32

    # Fixed 128-wide matmul sub-chunks inside a wide pipelined block: the DMA
    # chunk can grow without the triangular matmul growing quadratically.
    for j in range(n_sub):
        lo, hi = j * _SUB, (j + 1) * _SUB
        x = x_ref[:, lo:hi].astype(jnp.float32)

        # Chunked IIR smoother on the MXU (bf16 operands, f32 accumulate):
        #   M[:, t] = sum_{k<=t} s*(1-s)^(t-k) * x[:, k]  +  (1-s)^(t+1) * carry
        m = jnp.dot(x.astype(jnp.bfloat16), w, preferred_element_type=jnp.float32)
        m = m + carry * decay
        carry = m[:, _SUB - 1:_SUB]   # exact f32 carry into the next sub-chunk

        # Fused pointwise PCEN: (x*(M+eps)^(-alpha) + delta)^r - delta^r.
        # First pow in f32 (log(M+eps) has too much dynamic range for bf16);
        # second pow's argument is bounded below by delta, so it runs in
        # `eup_dtype` (bf16 on v6e/v7x where the single EUP slot saturates).
        ratio = x * jnp.exp(-alpha * jnp.log(m + eps))
        inner = (ratio + delta).astype(eup_dtype)
        out = jnp.exp(r_e * jnp.log(inner)).astype(jnp.float32) - delta_r
        o_ref[:, lo:hi] = out.astype(o_ref.dtype)

    carry_ref[...] = carry


def _pick_time_chunk(t, preferred):
    """Pad T to a multiple of 128; largest multiple-of-128 chunk <= preferred
    that divides the padded length."""
    t_pad = ((t + _SUB - 1) // _SUB) * _SUB
    c = max(_SUB, (min(preferred, t_pad) // _SUB) * _SUB)
    while t_pad % c:
        c -= _SUB
    return c, t_pad


def _pick_row_tile(rows):
    """Sublane (batch*mel) tile: large enough to amortize grid-step overhead,
    with an even tile count when possible so both v7x TensorCores get fed
    through the 'parallel' row axis (the time axis carries state)."""
    if rows % 512 == 0:
        return 256                      # >= 2 tiles of 256 rows
    if rows % 256 == 0:
        return 256 if rows > 256 else 128
    if rows % 128 == 0:
        return 128
    if rows % 16 == 0:
        return rows // 2                # 2 tiles, still a multiple of 8
    return rows                         # full-dim block (always legal)


def _default_eup_dtype():
    """bf16 transcendentals only where the EUP has a bf16 path (v6e / v7x)."""
    try:
        kind = jax.devices()[0].device_kind.lower()
    except Exception:
        return jnp.float32
    if ("v6" in kind) or ("v7" in kind) or ("tpu7" in kind):
        return jnp.bfloat16
    return jnp.float32


@functools.partial(jax.jit, static_argnames=("eps", "time_chunk", "eup_dtype"))
def pcen_transform(x_nchw, log_s, log_alpha, log_delta, log_r,
                   eps=1e-6, time_chunk=512, eup_dtype=None):
    """x_nchw: (B, 1, n_mels, T). Returns PCEN with the same shape/dtype."""
    if eup_dtype is None:
        eup_dtype = _default_eup_dtype()

    B, C, Fm, T = x_nchw.shape
    assert C == 1, "PCENTransform squeezes the channel dim; C must be 1"

    io_dtype = x_nchw.dtype
    if io_dtype not in (jnp.float32, jnp.bfloat16):
        io_dtype = jnp.float32

    # Native layout: drop the channel dim and fold batch into the sublane axis.
    # Every (batch, mel) pair is an independent IIR row -> (B*F, T); no
    # transposes, no batch grid axis, bigger per-step blocks.
    rows = B * Fm
    x = x_nchw.reshape(rows, T).astype(io_dtype)

    s = jnp.exp(log_s)[0].astype(jnp.float32)
    alpha = jnp.exp(log_alpha)[0].astype(jnp.float32)
    delta = jnp.exp(log_delta)[0].astype(jnp.float32)
    r = jnp.exp(log_r)[0].astype(jnp.float32)
    eps_f = jnp.asarray(eps, jnp.float32)
    delta_r = jnp.exp(r * jnp.log(delta))                 # scalar delta**r
    params = jnp.stack([alpha, delta, r, eps_f, delta_r]).astype(jnp.float32)

    tc, t_pad = _pick_time_chunk(T, time_chunk)
    if t_pad != T:
        # Zero-pad trailing timesteps; the IIR is causal so they cannot affect
        # any t < T (padded outputs are sliced off and never accumulated).
        x = jnp.pad(x, ((0, 0), (0, t_pad - T)))
    n_tc = t_pad // tc

    # Triangular IIR weights for a fixed 128-wide sub-chunk (bf16 MXU operands)
    # + carry-decay vector. Built once (they depend on traced s); VMEM-resident.
    log1ms = jnp.log1p(-s)                                # log(1 - s)
    idx = jnp.arange(_SUB, dtype=jnp.float32)
    diff = idx[None, :] - idx[:, None]                    # (k, j) -> j - k
    expo = jnp.where(diff >= 0.0, diff, 0.0)
    w = jnp.where(diff >= 0.0, s * jnp.exp(expo * log1ms), 0.0).astype(jnp.bfloat16)
    decay = jnp.exp((idx + 1.0) * log1ms)[None, :].astype(jnp.float32)

    tr = _pick_row_tile(rows)
    n_tr = rows // tr

    kernel = functools.partial(pcen_kernel, eup_dtype=eup_dtype)

    out = pl.pallas_call(
        kernel,
        out_shape=jax.ShapeDtypeStruct((rows, t_pad), io_dtype),
        grid=(n_tr, n_tc),
        in_specs=[
            pl.BlockSpec(memory_space=pltpu.MemorySpace.SMEM),      # params
            pl.BlockSpec((_SUB, _SUB), lambda i, t: (0, 0)),        # W (resident)
            pl.BlockSpec((1, _SUB), lambda i, t: (0, 0)),           # decay (resident)
            pl.BlockSpec((tr, tc), lambda i, t: (i, t)),            # x rows/time
        ],
        out_specs=pl.BlockSpec((tr, tc), lambda i, t: (i, t)),
        scratch_shapes=[pltpu.VMEM((tr, 1), jnp.float32)],          # IIR carry
        compiler_params=pltpu.CompilerParams(
            dimension_semantics=("parallel", "arbitrary")),
    )(params, w, decay, x)

    if t_pad != T:
        out = out[:, :T]
    return out.reshape(B, 1, Fm, T)


def pcen_reference(x_nchw, s, alpha, delta, r, eps):
    """Pure-numpy (f64) reference of the PyTorch forward."""
    x = np.transpose(np.asarray(x_nchw, dtype=np.float64)[:, 0, :, :], (0, 2, 1))
    M = np.zeros_like(x)
    M[:, 0] = s * x[:, 0]
    for t in range(1, x.shape[1]):
        M[:, t] = (1.0 - s) * M[:, t - 1] + s * x[:, t]
    pcen_ = (x / np.power(M + eps, alpha) + delta) ** r - delta ** r
    return np.transpose(pcen_, (0, 2, 1))[:, None, :, :]


if __name__ == "__main__":
    # Deterministic parameter init, matching PCENTransform.__init__(trainable=True)
    s0, alpha0, delta0, r0, eps0 = 0.025, 0.98, 2.0, 0.5, 1e-6
    log_s = jnp.array([math.log(s0)], dtype=jnp.float32)
    log_alpha = jnp.array([math.log(alpha0)], dtype=jnp.float32)
    log_delta = jnp.array([math.log(delta0)], dtype=jnp.float32)
    log_r = jnp.array([math.log(r0)], dtype=jnp.float32)

    # Small mel-spectrogram-like input: (B=2, C=1, n_mels=128, T=1000), non-negative
    # (PCEN assumes non-negative energies). T=1000 exercises the padded tail, the
    # cross-chunk carry and the in-kernel 128-wide sub-chunk loop; B*F=256 rows
    # fold into 2 parallel row tiles.
    key = jax.random.PRNGKey(0)
    x = jax.random.uniform(key, (2, 1, 128, 1000), dtype=jnp.float32) * 10.0

    ref = pcen_reference(x, s0, alpha0, delta0, r0, eps0)

    # 1) Strict check: f32 transcendentals (bf16 only for the MXU operands).
    out_strict = pcen_transform(x, log_s, log_alpha, log_delta, log_r,
                                eps=eps0, eup_dtype=jnp.float32)
    out_strict = jax.block_until_ready(out_strict)
    assert out_strict.shape == x.shape, out_strict.shape
    np.testing.assert_allclose(np.asarray(out_strict, np.float64), ref,
                               rtol=1e-2, atol=1e-3)

    # 2) Device-default fast path (bf16 EUP for the bounded-range outer pow on
    #    v6e/v7x). Looser tolerance reflects bf16 transcendental precision.
    out = pcen_transform(x, log_s, log_alpha, log_delta, log_r, eps=eps0)
    out = jax.block_until_ready(out)
    assert out.shape == x.shape, out.shape
    np.testing.assert_allclose(np.asarray(out, np.float64), ref,
                               rtol=5e-2, atol=2.5e-2)

    print("KERNEL_OK")
</pallas_src>

<mosaic_0001>
module attributes {stable_mosaic.version = 11 : i64} {
  func.func @pcen_kernel(%arg0: i32, %arg1: i32, %arg2: memref<5xf32, #tpu.memory_space<smem>>, %arg3: memref<128x128xbf16, #tpu.memory_space<vmem>>, %arg4: memref<1x128xf32, #tpu.memory_space<vmem>>, %arg5: memref<128x512xf32, #tpu.memory_space<vmem>>, %arg6: memref<128x512xf32, #tpu.memory_space<vmem>>, %arg7: memref<128x1xf32, #tpu.memory_space<vmem>>) attributes {dimension_semantics = [#tpu.dimension_semantics<parallel>, #tpu.dimension_semantics<arbitrary>], iteration_bounds = array<i64: 2, 2>, scalar_prefetch = 0 : i64, scratch_operands = 1 : i64, tpu.core_type = #tpu.core_type<tc>, window_params = [{transform_indices = @transform_0, window_bounds = array<i64: 5>}, {pipeline_mode = #tpu.pipeline_mode<synchronous>, transform_indices = @transform_1, window_bounds = array<i64: 128, 128>}, {pipeline_mode = #tpu.pipeline_mode<synchronous>, transform_indices = @transform_2, window_bounds = array<i64: 1, 128>}, {transform_indices = @transform_3, window_bounds = array<i64: 128, 512>}, {transform_indices = @transform_4, window_bounds = array<i64: 128, 512>}]} {
    %c0 = arith.constant 0 : index
    %0 = memref.load %arg2[%c0] : memref<5xf32, #tpu.memory_space<smem>>
    %c1 = arith.constant 1 : index
    %1 = memref.load %arg2[%c1] : memref<5xf32, #tpu.memory_space<smem>>
    %c2 = arith.constant 2 : index
    %2 = memref.load %arg2[%c2] : memref<5xf32, #tpu.memory_space<smem>>
    %c3 = arith.constant 3 : index
    %3 = memref.load %arg2[%c3] : memref<5xf32, #tpu.memory_space<smem>>
    %c4 = arith.constant 4 : index
    %4 = memref.load %arg2[%c4] : memref<5xf32, #tpu.memory_space<smem>>
    %c0_i32 = arith.constant 0 : i32
    %5 = arith.cmpi eq, %arg1, %c0_i32 : i32
    %6 = arith.extui %5 : i1 to i32
    %c0_i32_0 = arith.constant 0 : i32
    %7 = arith.cmpi ne, %6, %c0_i32_0 : i32
    scf.if %7 {
      %cst_29 = arith.constant 0.000000e+00 : f32
      %112 = vector.broadcast %cst_29 : f32 to vector<128x1xf32>
      %c0_30 = arith.constant 0 : index
      %c0_31 = arith.constant 0 : index
      %113 = vector.load %arg7[%c0_30, %c0_31] : memref<128x1xf32, #tpu.memory_space<vmem>>, vector<128x1xf32>
      tpu.vector_store %arg7[%c0_30, %c0_31], %112 {strides = array<i32>} : memref<128x1xf32, #tpu.memory_space<vmem>>, vector<128x1xf32>,
    } else {
    }
    %c0_1 = arith.constant 0 : index
    %c0_2 = arith.constant 0 : index
    %8 = vector.load %arg3[%c0_1, %c0_2] : memref<128x128xbf16, #tpu.memory_space<vmem>>, vector<128x128xbf16>
    %c0_3 = arith.constant 0 : index
    %c0_4 = arith.constant 0 : index
    %9 = vector.load %arg4[%c0_3, %c0_4] : memref<1x128xf32, #tpu.memory_space<vmem>>, vector<1x128xf32>
    %c0_5 = arith.constant 0 : index
    %c0_6 = arith.constant 0 : index
    %10 = vector.load %arg7[%c0_5, %c0_6] : memref<128x1xf32, #tpu.memory_space<vmem>>, vector<128x1xf32>
    %c0_7 = arith.constant 0 : index
    %c0_8 = arith.constant 0 : index
    %11 = vector.load %arg5[%c0_7, %c0_8] : memref<128x512xf32, #tpu.memory_space<vmem>>, vector<128x128xf32>
    %12 = arith.truncf %11 : vector<128x128xf32> to vector<128x128xbf16>
    %cst = arith.constant dense<0.000000e+00> : vector<128x128xf32>
    %13 = tpu.matmul %12, %8, %cst {dimension_numbers = #tpu.dot_dimension_numbers<[1], [0], [0], [1], [0, 0, 1, 1], [], []>} : vector<128x128xbf16>, vector<128x128xbf16>, vector<128x128xf32> -> vector<128x128xf32>
    %14 = vector.broadcast %10 : vector<128x1xf32> to vector<128x128xf32>
    %15 = vector.broadcast %9 : vector<1x128xf32> to vector<128x128xf32>
    %16 = arith.mulf %14, %15 : vector<128x128xf32>
    %17 = arith.addf %13, %16 : vector<128x128xf32>
    %18 = vector.extract_strided_slice %17 {offsets = [0, 127], sizes = [128, 1], strides = [1, 1]} : vector<128x128xf32> to vector<128x1xf32>
    %cst_9 = arith.constant 0.000000e+00 : f32
    %19 = arith.subf %cst_9, %0 : f32
    %20 = vector.broadcast %3 : f32 to vector<128x128xf32>
    %21 = arith.addf %17, %20 : vector<128x128xf32>
    %22 = math.log %21 : vector<128x128xf32>
    %23 = vector.broadcast %19 : f32 to vector<128x128xf32>
    %24 = arith.mulf %23, %22 : vector<128x128xf32>
    %25 = math.exp %24 : vector<128x128xf32>
    %26 = arith.mulf %11, %25 : vector<128x128xf32>
    %27 = vector.broadcast %1 : f32 to vector<128x128xf32>
    %28 = arith.addf %26, %27 : vector<128x128xf32>
    %29 = math.log %28 : vector<128x128xf32>
    %30 = vector.broadcast %2 : f32 to vector<128x128xf32>
    %31 = arith.mulf %30, %29 : vector<128x128xf32>
    %32 = math.exp %31 : vector<128x128xf32>
    %33 = vector.broadcast %4 : f32 to vector<128x128xf32>
    %34 = arith.subf %32, %33 : vector<128x128xf32>
    %c0_10 = arith.constant 0 : index
    %c0_11 = arith.constant 0 : index
    %35 = vector.load %arg6[%c0_10, %c0_11] : memref<128x512xf32, #tpu.memory_space<vmem>>, vector<128x128xf32>
    tpu.vector_store %arg6[%c0_10, %c0_11], %34 {strides = array<i32>} : memref<128x512xf32, #tpu.memory_space<vmem>>, vector<128x128xf32>,
    %c0_12 = arith.constant 0 : index
    %c128 = arith.constant 128 : index
    %36 = vector.load %arg5[%c0_12, %c128] : memref<128x512xf32, #tpu.memory_space<vmem>>, vector<128x128xf32>
    %37 = arith.truncf %36 : vector<128x128xf32> to vector<128x128xbf16>
    %cst_13 = arith.constant dense<0.000000e+00> : vector<128x128xf32>
    %38 = tpu.matmul %37, %8, %cst_13 {dimension_numbers = #tpu.dot_dimension_numbers<[1], [0], [0], [1], [0, 0, 1, 1], [], []>} : vector<128x128xbf16>, vector<128x128xbf16>, vector<128x128xf32> -> vector<128x128xf32>
    %39 = vector.broadcast %18 : vector<128x1xf32> to vector<128x128xf32>
    %40 = vector.broadcast %9 : vector<1x128xf32> to vector<128x128xf32>
    %41 = arith.mulf %39, %40 : vector<128x128xf32>
    %42 = arith.addf %38, %41 : vector<128x128xf32>
    %43 = vector.extract_strided_slice %42 {offsets = [0, 127], sizes = [128, 1], strides = [1, 1]} : vector<128x128xf32> to vector<128x1xf32>
    %cst_14 = arith.constant 0.000000e+00 : f32
    %44 = arith.subf %cst_14, %0 : f32
    %45 = vector.broadcast %3 : f32 to vector<128x128xf32>
    %46 = arith.addf %42, %45 : vector<128x128xf32>
    %47 = math.log %46 : vector<128x128xf32>
    %48 = vector.broadcast %44 : f32 to vector<128x128xf32>
    %49 = arith.mulf %48, %47 : vector<128x128xf32>
    %50 = math.exp %49 : vector<128x128xf32>
    %51 = arith.mulf %36, %50 : vector<128x128xf32>
    %52 = vector.broadcast %1 : f32 to vector<128x128xf32>
    %53 = arith.addf %51, %52 : vector<128x128xf32>
    %54 = math.log %53 : vector<128x128xf32>
    %55 = vector.broadcast %2 : f32 to vector<128x128xf32>
    %56 = arith.mulf %55, %54 : vector<128x128xf32>
    %57 = math.exp %56 : vector<128x128xf32>
    %58 = vector.broadcast %4 : f32 to vector<128x128xf32>
    %59 = arith.subf %57, %58 : vector<128x128xf32>
    %c0_15 = arith.constant 0 : index
    %c128_16 = arith.constant 128 : index
    %60 = vector.load %arg6[%c0_15, %c128_16] : memref<128x512xf32, #tpu.memory_space<vmem>>, vector<128x128xf32>
    tpu.vector_store %arg6[%c0_15, %c128_16], %59 {strides = array<i32>} : memref<128x512xf32, #tpu.memory_space<vmem>>, vector<128x128xf32>,
    %c0_17 = arith.constant 0 : index
    %c256 = arith.constant 256 : index
    %61 = vector.load %arg5[%c0_17, %c256] : memref<128x512xf32, #tpu.memory_space<vmem>>, vector<128x128xf32>
    %62 = arith.truncf %61 : vector<128x128xf32> to vector<128x128xbf16>
    %cst_18 = arith.constant dense<0.000000e+00> : vector<128x128xf32>
    %63 = tpu.matmul %62, %8, %cst_18 {dimension_numbers = #tpu.dot_dimension_numbers<[1], [0], [0], [1], [0, 0, 1, 1], [], []>} : vector<128x128xbf16>, vector<128x128xbf16>, vector<128x128xf32> -> vector<128x128xf32>
    %64 = vector.broadcast %43 : vector<128x1xf32> to vector<128x128xf32>
    %65 = vector.broadcast %9 : vector<1x128xf32> to vector<128x128xf32>
    %66 = arith.mulf %64, %65 : vector<128x128xf32>
    %67 = arith.addf %63, %66 : vector<128x128xf32>
    %68 = vector.extract_strided_slice %67 {offsets = [0, 127], sizes = [128, 1], strides = [1, 1]} : vector<128x128xf32> to vector<128x1xf32>
    %cst_19 = arith.constant 0.000000e+00 : f32
    %69 = arith.subf %cst_19, %0 : f32
    %70 = vector.broadcast %3 : f32 to vector<128x128xf32>
    %71 = arith.addf %67, %70 : vector<128x128xf32>
    %72 = math.log %71 : vector<128x128xf32>
    %73 = vector.broadcast %69 : f32 to vector<128x128xf32>
    %74 = arith.mulf %73, %72 : vector<128x128xf32>
    %75 = math.exp %74 : vector<128x128xf32>
    %76 = arith.mulf %61, %75 : vector<128x128xf32>
    %77 = vector.broadcast %1 : f32 to vector<128x128xf32>
    %78 = arith.addf %76, %77 : vector<128x128xf32>
    %79 = math.log %78 : vector<128x128xf32>
    %80 = vector.broadcast %2 : f32 to vector<128x128xf32>
    %81 = arith.mulf %80, %79 : vector<128x128xf32>
    %82 = math.exp %81 : vector<128x128xf32>
    %83 = vector.broadcast %4 : f32 to vector<128x128xf32>
    %84 = arith.subf %82, %83 : vector<128x128xf32>
    %c0_20 = arith.constant 0 : index
    %c256_21 = arith.constant 256 : index
    %85 = vector.load %arg6[%c0_20, %c256_21] : memref<128x512xf32, #tpu.memory_space<vmem>>, vector<128x128xf32>
    tpu.vector_store %arg6[%c0_20, %c256_21], %84 {strides = array<i32>} : memref<128x512xf32, #tpu.memory_space<vmem>>, vector<128x128xf32>,
    %c0_22 = arith.constant 0 : index
    %c384 = arith.constant 384 : index
    %86 = vector.load %arg5[%c0_22, %c384] : memref<128x512xf32, #tpu.memory_space<vmem>>, vector<128x128xf32>
    %87 = arith.truncf %86 : vector<128x128xf32> to vector<128x128xbf16>
    %cst_23 = arith.constant dense<0.000000e+00> : vector<128x128xf32>
    %88 = tpu.matmul %87, %8, %cst_23 {dimension_numbers = #tpu.dot_dimension_numbers<[1], [0], [0], [1], [0, 0, 1, 1], [], []>} : vector<128x128xbf16>, vector<128x128xbf16>, vector<128x128xf32> -> vector<128x128xf32>
    %89 = vector.broadcast %68 : vector<128x1xf32> to vector<128x128xf32>
    %90 = vector.broadcast %9 : vector<1x128xf32> to vector<128x128xf32>
    %91 = arith.mulf %89, %90 : vector<128x128xf32>
    %92 = arith.addf %88, %91 : vector<128x128xf32>
    %93 = vector.extract_strided_slice %92 {offsets = [0, 127], sizes = [128, 1], strides = [1, 1]} : vector<128x128xf32> to vector<128x1xf32>
    %cst_24 = arith.constant 0.000000e+00 : f32
    %94 = arith.subf %cst_24, %0 : f32
    %95 = vector.broadcast %3 : f32 to vector<128x128xf32>
    %96 = arith.addf %92, %95 : vector<128x128xf32>
    %97 = math.log %96 : vector<128x128xf32>
    %98 = vector.broadcast %94 : f32 to vector<128x128xf32>
    %99 = arith.mulf %98, %97 : vector<128x128xf32>
    %100 = math.exp %99 : vector<128x128xf32>
    %101 = arith.mulf %86, %100 : vector<128x128xf32>
    %102 = vector.broadcast %1 : f32 to vector<128x128xf32>
    %103 = arith.addf %101, %102 : vector<128x128xf32>
    %104 = math.log %103 : vector<128x128xf32>
    %105 = vector.broadcast %2 : f32 to vector<128x128xf32>
    %106 = arith.mulf %105, %104 : vector<128x128xf32>
    %107 = math.exp %106 : vector<128x128xf32>
    %108 = vector.broadcast %4 : f32 to vector<128x128xf32>
    %109 = arith.subf %107, %108 : vector<128x128xf32>
    %c0_25 = arith.constant 0 : index
    %c384_26 = arith.constant 384 : index
    %110 = vector.load %arg6[%c0_25, %c384_26] : memref<128x512xf32, #tpu.memory_space<vmem>>, vector<128x128xf32>
    tpu.vector_store %arg6[%c0_25, %c384_26], %109 {strides = array<i32>} : memref<128x512xf32, #tpu.memory_space<vmem>>, vector<128x128xf32>,
    %c0_27 = arith.constant 0 : index
    %c0_28 = arith.constant 0 : index
    %111 = vector.load %arg7[%c0_27, %c0_28] : memref<128x1xf32, #tpu.memory_space<vmem>>, vector<128x1xf32>
    tpu.vector_store %arg7[%c0_27, %c0_28], %93 {strides = array<i32>} : memref<128x1xf32, #tpu.memory_space<vmem>>, vector<128x1xf32>,
    return
  }
  func.func @transform_0(%arg0: i32, %arg1: i32) -> i32 {
    %c0_i32 = arith.constant 0 : i32
    %c0_i32_0 = arith.constant 0 : i32
    return %c0_i32 : i32
  }
  func.func @transform_1(%arg0: i32, %arg1: i32) -> (i32, i32) {
    %c0_i32 = arith.constant 0 : i32
    %c0_i32_0 = arith.constant 0 : i32
    %c0_i32_1 = arith.constant 0 : i32
    return %c0_i32, %c0_i32_0 : i32, i32
  }
  func.func @transform_2(%arg0: i32, %arg1: i32) -> (i32, i32) {
    %c0_i32 = arith.constant 0 : i32
    %c0_i32_0 = arith.constant 0 : i32
    %c0_i32_1 = arith.constant 0 : i32
    return %c0_i32, %c0_i32_0 : i32, i32
  }
  func.func @transform_3(%arg0: i32, %arg1: i32) -> (i32, i32) {
    %c0_i32 = arith.constant 0 : i32
    return %arg0, %arg1 : i32, i32
  }
  func.func @transform_4(%arg0: i32, %arg1: i32) -> (i32, i32) {
    %c0_i32 = arith.constant 0 : i32
    return %arg0, %arg1 : i32, i32
  }
}

</mosaic_0001>

<bundles_post_ra>
// kernel: pcen_transform.1
= control target key start
LH: loop header
LB: loop body
LE: loop exit
PB: predicated region body
PF: predicated region fallthrough
CT: control target
= control target key end

     0   :  { %9 = vsyncpa [#allocation4], 0  ;;  %s3625_s15 = smov 0   ;;  %s3627_s16 = smov 0   ;;  %s4837_s0 = inlined_call_operand.vmem [shape: f32[5], index: 0, kind: input, shape index: {}]   ;;  %s4838_s1 = inlined_call_operand.vmem [shape: bf16[128,128], index: 1, kind: input, shape index: {}]   ;;  %s4839_s2 = inlined_call_operand.vmem [shape: f32[1,128], index: 2, kind: input, shape index: {}]   ;;  %s4840_s3 = inlined_call_operand.vmem [shape: f32[256,1024], index: 3, kind: input, shape index: {}]   ;;  %s4841_s4 = inlined_call_operand.vmem [shape: f32[256,1024], index: 4, kind: output, shape index: {}]  }
   0x1   :  { %s3629_s17 = smov 0   ;;  %s3631_s18 = smov 0  }
   0x2   :  { %s3633_s19 = smov 0   ;;  %s3635_s20 = smov 0  }
   0x3   :  { %s3637_s21 = smov 0  }
   0x4 LB: > { %s2646_s22 = sadd.s32 4294967295, %s3593_s21   ;;  %s24_s23 = sadd.s32 1, %s3585_s19  ;;  %s3593_s21 = sphi %s3637_s21, %s15_s21   ;;  %s3589_s20 = sphi %s3635_s20, %s4854_s20   ;;  %s3585_s19 = sphi %s3633_s19, %s4853_s19   ;;  %s3581_s18 = sphi %s3631_s18, %s4852_s18   ;;  %s3577_s17 = sphi %s3629_s17, %s4851_s17   ;;  %s3573_s16 = sphi %s3627_s16, %s4850_s16   ;;  %s3569_s15 = sphi %s3625_s15, %s4849_s15  }
   0x5   : > { %p25_p0 = scmp.ge.s32.totalorder %s24_s23, 2  ;;  %s27_s24 = sadd.s32 1, %s3589_s20 }
   0x6   : > { %s99_s25 = sadd.s32 1, %s3573_s16  ;;  %p106_p1 = scmp.ne.s32.totalorder %s3573_s16, %s3569_s15 }
   0x7   : > { %s4856_s23 = smov (%p25_p0, %s24_s23), 0  ;;  %s4858_s24 = smov (!%p25_p0, %s27_s24), %s3589_s20 }
   0x8   : > { %s95_s26 = ssub.s32 %s3585_s19, %s4856_s23  ;;  %p107_p2 = scmp.eq.s32.totalorder %s3593_s21, 0 }
   0x9   : > { %p29_p3 = scmp.ge.s32.totalorder %s4858_s24, 2  ;;  %p138_p4 = scmp.eq.s32.totalorder %s2646_s22, 3 }
   0xa   : > { %p3672_p5 = por %p107_p2, %p106_p1  ;;  %p2648_p6 = scmp.ge.s32.totalorder %s3593_s21, 1 }
   0xb   : > { %s4860_s24 = smov (%p29_p3, %s4858_s24), 0  ;;  %p3679_p7 = por %p138_p4, %p106_p1 }
   0xc   : > { %p151_p8 = scmp.lt.s32.totalorder %s3593_s21, 5  ;;  %s94_s29 = ssub.s32 %s3589_s20, %s4860_s24 }
   0xd   : > { %s4844_s28 = scalar_select %p3679_p7, 1, 0 }
   0xe   : > { %s96_s30 = sor.u32 %s95_s26, %s94_s29  ;;  %p3686_p9 = pnand %p2648_p6, %p151_p8 }
   0xf   : > { %p97_p10 = scmp.eq.s32.totalorder %s96_s30, 0  ;;  %p3690_p11 = scmp.eq.s32.totalorder %s2646_s22, 0 }
  0x10   : > { %s4845_s5 = scalar_select %p3686_p9, 1, 0 }
  0x11   : > { %p2879_p12 = pneg %p3686_p9  ;;  %s164_s9 = sshll.u32 %s4837_s0, 4  ;;  %s165_s9 = int_to_ptr.vmem [resolvable:$true] %s164_s9 }
  0x12   : > { %s3700_s10 = scalar_select %p97_p10, %s3573_s16, %s99_s25  }
  0x13   : > { %p2880_p13 = pnand %p3690_p11, %p2879_p12  ;;  %s3520_s11 = scalar_lea.vmem %s165_s9, 16 }
  0x14   : > { %p3521_p0 = scmp.ne.s32.totalorder %s165_s9, %s3520_s11  ;;  %p3528_p4 = scmp.lt.s32.totalorder %s165_s9, %s165_s9 }
  0x15   : > { %p3522_p1 = pneg %p2880_p13  ;;  %p3529_p6 = scmp.lt.s32.totalorder %s3520_s11, %s3520_s11 }
  0x17   : > { %p3523_p2 = pnand %p3522_p1, %p3521_p0  ;;  %p3530_p8 = por %p3529_p6, %p3528_p4 }
  0x19   : > { %p3524_p3 = pneg %p3523_p2 }
  0x1b   : > { %p3531_p7 = pnand %p3530_p8, %p3524_p3 }
  0x1d   : > { %3534 = shalt.err (!%p3531_p7)
}
  0x1e   : > { %s3595_s12 = smov [#allocation3]   ;;  %p2650_p9 = scmp.ge.s32.totalorder %s3593_s21, 4 }
  0x1f   : > { %2882 = dma.vmem_to_smem (!%p2880_p13), %s165_s9, 16, %s3595_s12, [#allocation4]  }
  0x20   : > { %177 = sbr.rel (%p2650_p9) target bundleno = 76 (0x4c), region = 28 }
  0x25   : > { %180 = sbr.rel (!%p3672_p5) target bundleno = 76 (0x4c), region = 32  ;;  %s182_s13 = sand.u32 (%p3672_p5), 1, %s3573_s16  }
  0x26   : > { %s2653_s14 = sshll.u32 (%p3672_p5), %s3585_s19, 2  ;;  %s2651_s22 = sshll.u32 (%p3672_p5), %s182_s13, 9 }
  0x27   : > { %s2681_s25 = sshll.u32 (%p3672_p5), %s3589_s20, 7  ;;  %s3718_s27 = scalar_lea.vmem (%p3672_p5), [#allocation5], %s2651_s22 }
  0x28   : > { %s188_s26 = sadd.s32 (%p3672_p5), %s2681_s25, %s2653_s14 }
  0x29   : > { %s2655_s29 = sshll.u32 (%p3672_p5), %s188_s26, 3 }
  0x2a   : > { %s3713_s8 = scalar_lea.vmem %s4840_s3, %s2655_s29 }
  0x2b   : > { %v203_v0 = vld [vmem:[%s3713_s8] sm:$0xff]  ;;  %v205_v1 = vld [vmem:[%s3713_s8 + $0x8] sm:$0xff]  ;;  %v207_v2 = vld [vmem:[%s3713_s8 + $0x10] sm:$0xff] }
  0x2c   : > { %204 = vst [vmem:[%s3718_s27] sm:$0xff] %v203_v0  ;;  %206 = vst [vmem:[%s3718_s27 + $0x8] sm:$0xff] %v205_v1  ;;  %v209_v3 = vld [vmem:[%s3713_s8 + $0x18] sm:$0xff]  ;;  %v211_v4 = vld [vmem:[%s3713_s8 + $0x40] sm:$0xff] }
  0x2d   : > { %208 = vst [vmem:[%s3718_s27 + $0x10] sm:$0xff] %v207_v2  ;;  %v213_v5 = vld [vmem:[%s3713_s8 + $0x48] sm:$0xff]  ;;  %210 = vst [vmem:[%s3718_s27 + $0x18] sm:$0xff] %v209_v3  ;;  %v215_v6 = vld [vmem:[%s3713_s8 + $0x50] sm:$0xff] }
  0x2e   : > { %212 = vst [vmem:[%s3718_s27 + $0x20] sm:$0xff] %v211_v4  ;;  %214 = vst [vmem:[%s3718_s27 + $0x28] sm:$0xff] %v213_v5  ;;  %v217_v7 = vld [vmem:[%s3713_s8 + $0x58] sm:$0xff]  ;;  %v219_v8 = vld [vmem:[%s3713_s8 + $0x80] sm:$0xff] }
  0x2f   : > { %216 = vst [vmem:[%s3718_s27 + $0x30] sm:$0xff] %v215_v6  ;;  %218 = vst [vmem:[%s3718_s27 + $0x38] sm:$0xff] %v217_v7  ;;  %v221_v9 = vld [vmem:[%s3713_s8 + $0x88] sm:$0xff]  ;;  %v223_v10 = vld [vmem:[%s3713_s8 + $0x90] sm:$0xff] }
  0x30   : > { %220 = vst [vmem:[%s3718_s27 + $0x40] sm:$0xff] %v219_v8  ;;  %v225_v11 = vld [vmem:[%s3713_s8 + $0x98] sm:$0xff]  ;;  %222 = vst [vmem:[%s3718_s27 + $0x48] sm:$0xff] %v221_v9  ;;  %v227_v12 = vld [vmem:[%s3713_s8 + $0xc0] sm:$0xff] }
  0x31   : > { %224 = vst [vmem:[%s3718_s27 + $0x50] sm:$0xff] %v223_v10  ;;  %226 = vst [vmem:[%s3718_s27 + $0x58] sm:$0xff] %v225_v11  ;;  %v229_v13 = vld [vmem:[%s3713_s8 + $0xc8] sm:$0xff]  ;;  %v231_v14 = vld [vmem:[%s3713_s8 + $0xd0] sm:$0xff] }
  0x32   : > { %228 = vst [vmem:[%s3718_s27 + $0x60] sm:$0xff] %v227_v12  ;;  %230 = vst [vmem:[%s3718_s27 + $0x68] sm:$0xff] %v229_v13  ;;  %v233_v15 = vld [vmem:[%s3713_s8 + $0xd8] sm:$0xff]  ;;  %v235_v16 = vld [vmem:[%s3713_s8 + $0x100] sm:$0xff] }
  0x33   : > { %232 = vst [vmem:[%s3718_s27 + $0x70] sm:$0xff] %v231_v14  ;;  %v237_v17 = vld [vmem:[%s3713_s8 + $0x108] sm:$0xff]  ;;  %234 = vst [vmem:[%s3718_s27 + $0x78] sm:$0xff] %v233_v15  ;;  %v239_v18 = vld [vmem:[%s3713_s8 + $0x110] sm:$0xff] }
  0x34   : > { %236 = vst [vmem:[%s3718_s27 + $0x80] sm:$0xff] %v235_v16  ;;  %238 = vst [vmem:[%s3718_s27 + $0x88] sm:$0xff] %v237_v17  ;;  %v241_v19 = vld [vmem:[%s3713_s8 + $0x118] sm:$0xff]  ;;  %v243_v20 = vld [vmem:[%s3713_s8 + $0x140] sm:$0xff] }
  0x35   : > { %240 = vst [vmem:[%s3718_s27 + $0x90] sm:$0xff] %v239_v18  ;;  %242 = vst [vmem:[%s3718_s27 + $0x98] sm:$0xff] %v241_v19  ;;  %v245_v21 = vld [vmem:[%s3713_s8 + $0x148] sm:$0xff]  ;;  %v247_v22 = vld [vmem:[%s3713_s8 + $0x150] sm:$0xff] }
  0x36   : > { %244 = vst [vmem:[%s3718_s27 + $0xa0] sm:$0xff] %v243_v20  ;;  %v249_v23 = vld [vmem:[%s3713_s8 + $0x158] sm:$0xff]  ;;  %246 = vst [vmem:[%s3718_s27 + $0xa8] sm:$0xff] %v245_v21  ;;  %v251_v24 = vld [vmem:[%s3713_s8 + $0x180] sm:$0xff] }
  0x37   : > { %248 = vst [vmem:[%s3718_s27 + $0xb0] sm:$0xff] %v247_v22  ;;  %250 = vst [vmem:[%s3718_s27 + $0xb8] sm:$0xff] %v249_v23  ;;  %v253_v25 = vld [vmem:[%s3713_s8 + $0x188] sm:$0xff]  ;;  %v255_v26 = vld [vmem:[%s3713_s8 + $0x190] sm:$0xff] }
  0x38   : > { %252 = vst [vmem:[%s3718_s27 + $0xc0] sm:$0xff] %v251_v24  ;;  %254 = vst [vmem:[%s3718_s27 + $0xc8] sm:$0xff] %v253_v25  ;;  %v257_v27 = vld [vmem:[%s3713_s8 + $0x198] sm:$0xff]  ;;  %v259_v28 = vld [vmem:[%s3713_s8 + $0x1c0] sm:$0xff] }
  0x39   : > { %256 = vst [vmem:[%s3718_s27 + $0xd0] sm:$0xff] %v255_v26  ;;  %v261_v29 = vld [vmem:[%s3713_s8 + $0x1c8] sm:$0xff]  ;;  %258 = vst [vmem:[%s3718_s27 + $0xd8] sm:$0xff] %v257_v27  ;;  %v263_v30 = vld [vmem:[%s3713_s8 + $0x1d0] sm:$0xff] }
  0x3a   : > { %260 = vst [vmem:[%s3718_s27 + $0xe0] sm:$0xff] %v259_v28  ;;  %262 = vst [vmem:[%s3718_s27 + $0xe8] sm:$0xff] %v261_v29  ;;  %v265_v31 = vld [vmem:[%s3713_s8 + $0x1d8] sm:$0xff]  ;;  %v267_v32 = vld [vmem:[%s3713_s8 + $0x200] sm:$0xff] }
  0x3b   : > { %264 = vst [vmem:[%s3718_s27 + $0xf0] sm:$0xff] %v263_v30  ;;  %266 = vst [vmem:[%s3718_s27 + $0xf8] sm:$0xff] %v265_v31  ;;  %v269_v33 = vld [vmem:[%s3713_s8 + $0x208] sm:$0xff]  ;;  %v271_v34 = vld [vmem:[%s3713_s8 + $0x210] sm:$0xff] }
  0x3c   : > { %268 = vst [vmem:[%s3718_s27 + $0x100] sm:$0xff] %v267_v32  ;;  %v273_v35 = vld [vmem:[%s3713_s8 + $0x218] sm:$0xff]  ;;  %270 = vst [vmem:[%s3718_s27 + $0x108] sm:$0xff] %v269_v33  ;;  %v275_v36 = vld [vmem:[%s3713_s8 + $0x240] sm:$0xff] }
  0x3d   : > { %272 = vst [vmem:[%s3718_s27 + $0x110] sm:$0xff] %v271_v34  ;;  %274 = vst [vmem:[%s3718_s27 + $0x118] sm:$0xff] %v273_v35  ;;  %v277_v37 = vld [vmem:[%s3713_s8 + $0x248] sm:$0xff]  ;;  %v279_v38 = vld [vmem:[%s3713_s8 + $0x250] sm:$0xff] }
  0x3e   : > { %276 = vst [vmem:[%s3718_s27 + $0x120] sm:$0xff] %v275_v36  ;;  %278 = vst [vmem:[%s3718_s27 + $0x128] sm:$0xff] %v277_v37  ;;  %v281_v39 = vld [vmem:[%s3713_s8 + $0x258] sm:$0xff]  ;;  %v283_v40 = vld [vmem:[%s3713_s8 + $0x280] sm:$0xff] }
  0x3f   : > { %280 = vst [vmem:[%s3718_s27 + $0x130] sm:$0xff] %v279_v38  ;;  %v285_v41 = vld [vmem:[%s3713_s8 + $0x288] sm:$0xff]  ;;  %282 = vst [vmem:[%s3718_s27 + $0x138] sm:$0xff] %v281_v39  ;;  %v287_v42 = vld [vmem:[%s3713_s8 + $0x290] sm:$0xff] }
  0x40   : > { %284 = vst [vmem:[%s3718_s27 + $0x140] sm:$0xff] %v283_v40  ;;  %286 = vst [vmem:[%s3718_s27 + $0x148] sm:$0xff] %v285_v41  ;;  %v289_v43 = vld [vmem:[%s3713_s8 + $0x298] sm:$0xff]  ;;  %v291_v44 = vld [vmem:[%s3713_s8 + $0x2c0] sm:$0xff] }
  0x41   : > { %288 = vst [vmem:[%s3718_s27 + $0x150] sm:$0xff] %v287_v42  ;;  %290 = vst [vmem:[%s3718_s27 + $0x158] sm:$0xff] %v289_v43  ;;  %v293_v45 = vld [vmem:[%s3713_s8 + $0x2c8] sm:$0xff]  ;;  %v295_v46 = vld [vmem:[%s3713_s8 + $0x2d0] sm:$0xff] }
  0x42   : > { %292 = vst [vmem:[%s3718_s27 + $0x160] sm:$0xff] %v291_v44  ;;  %v297_v47 = vld [vmem:[%s3713_s8 + $0x2d8] sm:$0xff]  ;;  %294 = vst [vmem:[%s3718_s27 + $0x168] sm:$0xff] %v293_v45  ;;  %v299_v48 = vld [vmem:[%s3713_s8 + $0x300] sm:$0xff] }
  0x43   : > { %296 = vst [vmem:[%s3718_s27 + $0x170] sm:$0xff] %v295_v46  ;;  %298 = vst [vmem:[%s3718_s27 + $0x178] sm:$0xff] %v297_v47  ;;  %v301_v49 = vld [vmem:[%s3713_s8 + $0x308] sm:$0xff]  ;;  %v303_v50 = vld [vmem:[%s3713_s8 + $0x310] sm:$0xff] }
  0x44   : > { %300 = vst [vmem:[%s3718_s27 + $0x180] sm:$0xff] %v299_v48  ;;  %302 = vst [vmem:[%s3718_s27 + $0x188] sm:$0xff] %v301_v49  ;;  %v305_v51 = vld [vmem:[%s3713_s8 + $0x318] sm:$0xff]  ;;  %v307_v52 = vld [vmem:[%s3713_s8 + $0x340] sm:$0xff] }
  0x45   : > { %304 = vst [vmem:[%s3718_s27 + $0x190] sm:$0xff] %v303_v50  ;;  %v309_v53 = vld [vmem:[%s3713_s8 + $0x348] sm:$0xff]  ;;  %306 = vst [vmem:[%s3718_s27 + $0x198] sm:$0xff] %v305_v51  ;;  %v311_v54 = vld [vmem:[%s3713_s8 + $0x350] sm:$0xff] }
  0x46   : > { %308 = vst [vmem:[%s3718_s27 + $0x1a0] sm:$0xff] %v307_v52  ;;  %310 = vst [vmem:[%s3718_s27 + $0x1a8] sm:$0xff] %v309_v53  ;;  %v313_v55 = vld [vmem:[%s3713_s8 + $0x358] sm:$0xff]  ;;  %v315_v56 = vld [vmem:[%s3713_s8 + $0x380] sm:$0xff] }
  0x47   : > { %312 = vst [vmem:[%s3718_s27 + $0x1b0] sm:$0xff] %v311_v54  ;;  %314 = vst [vmem:[%s3718_s27 + $0x1b8] sm:$0xff] %v313_v55  ;;  %v317_v57 = vld [vmem:[%s3713_s8 + $0x388] sm:$0xff]  ;;  %v319_v58 = vld [vmem:[%s3713_s8 + $0x390] sm:$0xff] }
  0x48   : > { %316 = vst [vmem:[%s3718_s27 + $0x1c0] sm:$0xff] %v315_v56  ;;  %v321_v59 = vld [vmem:[%s3713_s8 + $0x398] sm:$0xff]  ;;  %318 = vst [vmem:[%s3718_s27 + $0x1c8] sm:$0xff] %v317_v57  ;;  %v323_v60 = vld [vmem:[%s3713_s8 + $0x3c0] sm:$0xff] }
  0x49   : > { %320 = vst [vmem:[%s3718_s27 + $0x1d0] sm:$0xff] %v319_v58  ;;  %322 = vst [vmem:[%s3718_s27 + $0x1d8] sm:$0xff] %v321_v59  ;;  %v325_v61 = vld [vmem:[%s3713_s8 + $0x3c8] sm:$0xff]  ;;  %v327_v62 = vld [vmem:[%s3713_s8 + $0x3d0] sm:$0xff] }
  0x4a   : > { %324 = vst [vmem:[%s3718_s27 + $0x1e0] sm:$0xff] %v323_v60  ;;  %326 = vst [vmem:[%s3718_s27 + $0x1e8] sm:$0xff] %v325_v61  ;;  %v329_v63 = vld [vmem:[%s3713_s8 + $0x3d8] sm:$0xff] }
  0x4b   : > { %328 = vst [vmem:[%s3718_s27 + $0x1f0] sm:$0xff] %v327_v62  ;;  %330 = vst [vmem:[%s3718_s27 + $0x1f8] sm:$0xff] %v329_v63 }
  0x4c PF: > { %p4847_p5 = scmp.ne.s32.totalorder %s4845_s5, 0 }
  0x4e   : > { %339 = sbr.rel (%p4847_p5) target bundleno = 870 (0x366), region = 55 }
  0x53   : > { %3564 = dma.done.wait (%p3690_p11), [#allocation4], 16  }
  0x54   : > { %3566 = vsyncadd (%p3690_p11), [#allocation4], 4294967280  ;;  %s346_s9 = sand.u32 1, %s3569_s15  }
  0x55   : > { %s2658_s11 = sshll.u32 %s346_s9, 9 }
  0x56   : > { %s3852_s12 = scalar_lea.vmem [#allocation5], %s2658_s11 }
  0x57   : > { %352 = sfence }
  0x58   : > { %s3854_s13 = sld [smem:[#allocation3]]  ;;  %s3864_s26 = scalar_lea.vmem [#allocation6], %s2658_s11 }
  0x59   : > { %s3856_s14 = sld [smem:[#allocation3 + $0x1]]  ;;  %p2664_p7 = scmp.ne.s32.totalorder %s3577_s17, 0 }
  0x5a   : > { %s3858_s22 = sld [smem:[#allocation3 + $0x2]] }
  0x5b   : > { %s3860_s5 = sld [smem:[#allocation3 + $0x3]]  ;;  %384 = sbr.rel (%p2664_p7) target bundleno = 105 (0x69), region = 67 }
  0x5c   : > { %s3862_s25 = sld [smem:[#allocation3 + $0x4]] }
  0x60   : > { %vm385_vm0 = vcmask 7168   ;;  %v3596_v0 = vmov 0.0  }
  0x61   : > { %386 = vst.msk [vmem:[#allocation2] sm:$0xff] %vm385_vm0, %v3596_v0  ;;  %387 = vst.msk [vmem:[#allocation2 + $0x8] sm:$0xff] %vm385_vm0, %v3596_v0 }
  0x62   : > { %388 = vst.msk [vmem:[#allocation2 + $0x10] sm:$0xff] %vm385_vm0, %v3596_v0  ;;  %389 = vst.msk [vmem:[#allocation2 + $0x18] sm:$0xff] %vm385_vm0, %v3596_v0 }
  0x63   : > { %390 = vst.msk [vmem:[#allocation2 + $0x20] sm:$0xff] %vm385_vm0, %v3596_v0  ;;  %391 = vst.msk [vmem:[#allocation2 + $0x28] sm:$0xff] %vm385_vm0, %v3596_v0 }
  0x64   : > { %392 = vst.msk [vmem:[#allocation2 + $0x30] sm:$0xff] %vm385_vm0, %v3596_v0  ;;  %393 = vst.msk [vmem:[#allocation2 + $0x38] sm:$0xff] %vm385_vm0, %v3596_v0 }
  0x65   : > { %394 = vst.msk [vmem:[#allocation2 + $0x40] sm:$0xff] %vm385_vm0, %v3596_v0  ;;  %395 = vst.msk [vmem:[#allocation2 + $0x48] sm:$0xff] %vm385_vm0, %v3596_v0 }
  0x66   : > { %396 = vst.msk [vmem:[#allocation2 + $0x50] sm:$0xff] %vm385_vm0, %v3596_v0  ;;  %397 = vst.msk [vmem:[#allocation2 + $0x58] sm:$0xff] %vm385_vm0, %v3596_v0 }
  0x67   : > { %398 = vst.msk [vmem:[#allocation2 + $0x60] sm:$0xff] %vm385_vm0, %v3596_v0  ;;  %399 = vst.msk [vmem:[#allocation2 + $0x68] sm:$0xff] %vm385_vm0, %v3596_v0 }
  0x68   : > { %400 = vst.msk [vmem:[#allocation2 + $0x70] sm:$0xff] %vm385_vm0, %v3596_v0  ;;  %401 = vst.msk [vmem:[#allocation2 + $0x78] sm:$0xff] %vm385_vm0, %v3596_v0 }
  0x69 PF: > { %v3886_v1 = vld [vmem:[%s4838_s1 + $0x38] sm:$0xff]   ;;  %v3891_v2 = vld [vmem:[%s4838_s1 + $0x30] sm:$0xff]   ;;  %v3597_v3 = vmov 0   ;;  %v3901_v4 = vld [vmem:[%s4838_s1 + $0x28] sm:$0xff]   ;;  %s3599_s15 = smov 1   ;;  %vm2387_vm1 = vcmask 7168  }
  0x6a   : > { %2947 = vset.pattern.permute.xlu1 %v3597_v3  ;;  %2946 = vset.pattern.permute.xlu0 %v3597_v3  ;;  %v3910_v5 = vld [vmem:[%s4838_s1 + $0x20] sm:$0xff]   ;;  %v3926_v9 = vld [vmem:[%s4838_s1 + $0x18] sm:$0xff]   ;;  %v421_v10 = vld [vmem:[#allocation2 + $0x10] sm:$0xff]  ;;  %p4848_p9 = scmp.ne.s32.totalorder %s4844_s28, 0 }
  0x6b   : > { %2747 = vmatprep.subr.bf16.mxu0 %v3886_v1  ;;  %2779 = vmatprep.subr.bf16.mxu1 %v3886_v1  ;;  %v3913_v6 = vld [vmem:[%s3852_s12] sm:$0xff]  ;;  %v422_v12 = vld [vmem:[#allocation2 + $0x18] sm:$0xff]  ;;  %v420_v13 = vld [vmem:[#allocation2 + $0x8] sm:$0xff]  ;;  %s2682_s6 = sshll.u32 (%p4848_p9), %s3581_s18, 7 }
  0x6c   : > { %2748 = vmatpush3.bf16.msra.mxu0 %v3886_v1  ;;  %2780 = vmatpush3.bf16.msra.mxu1 %v3886_v1  ;;  %v3916_v7 = vld [vmem:[%s3852_s12 + $0x20] sm:$0xff]  ;;  %v3935_v14 = vld [vmem:[%s4838_s1 + $0x10] sm:$0xff]   ;;  %v952_v15 = vld [vmem:[%s3852_s12 + $0x8] sm:$0xff] }
  0x6d   : > { %2749 = vmatprep.subr.bf16.mxu0 %v3891_v2  ;;  %2781 = vmatprep.subr.bf16.mxu1 %v3891_v2  ;;  %v451_v8 = vpack.c.bf16 %v3916_v7, %v3913_v6  ;;  %v419_v11 = vld [vmem:[#allocation2] sm:$0xff]  ;;  %v424_v16 = vld [vmem:[#allocation2 + $0x28] sm:$0xff]  ;;  %v426_v21 = vld [vmem:[#allocation2 + $0x38] sm:$0xff] }
  0x6e   : > { %471 = vperm.xlu1 %2947, %v421_v10   ;;  %461 = vperm.xlu0 %2946, %v419_v11   ;;  %v423_v17 = vld [vmem:[#allocation2 + $0x20] sm:$0xff]  ;;  %v953_v18 = vld [vmem:[%s3852_s12 + $0x28] sm:$0xff]  ;;  %v425_v22 = vld [vmem:[#allocation2 + $0x30] sm:$0xff] }
  0x6f   : > { %2763 = vmatprep.mubr.bf16.mxu0 %v451_v8  ;;  %v3946_v19 = vld [vmem:[%s4838_s1 + $0x8] sm:$0xff]   ;;  %v968_v20 = vpack.c.bf16 %v953_v18, %v952_v15  ;;  %v3955_v23 = vld [vmem:[%s4838_s1] sm:$0xff]   ;;  %v430_v36 = vld [vmem:[#allocation2 + $0x58] sm:$0xff] }
  0x70   : > { %2750 = vmatpush3.bf16.msra.mxu0 %v3891_v2  ;;  %2782 = vmatpush3.bf16.msra.mxu1 %v3891_v2  ;;  %v3960_v24 = vld [vmem:[%s3852_s12 + $0x40] sm:$0xff]  ;;  %v428_v26 = vld [vmem:[#allocation2 + $0x48] sm:$0xff]  ;;  %v429_v37 = vld [vmem:[#allocation2 + $0x50] sm:$0xff] }
  0x71   : > { %2751 = vmatprep.subr.bf16.mxu0 %v3901_v4  ;;  %2783 = vmatprep.subr.bf16.mxu1 %v3901_v4  ;;  %v3964_v25 = vld [vmem:[%s3852_s12 + $0x60] sm:$0xff]  ;;  %v954_v30 = vld [vmem:[%s3852_s12 + $0x48] sm:$0xff]  ;;  %v434_v52 = vld [vmem:[#allocation2 + $0x78] sm:$0xff] }
  0x72   : > { %476 = vperm.xlu1 %2947, %v422_v12   ;;  %466 = vperm.xlu0 %2946, %v420_v13   ;;  %v427_v27 = vld [vmem:[#allocation2 + $0x40] sm:$0xff]  ;;  %v955_v31 = vld [vmem:[%s3852_s12 + $0x68] sm:$0xff]  ;;  %v452_v32 = vpack.c.bf16 %v3964_v25, %v3960_v24  ;;  %v433_v53 = vld [vmem:[#allocation2 + $0x70] sm:$0xff] }
  0x73   : > { %2795 = vmatprep.mubr.bf16.mxu1 %v968_v20  ;;  %v3968_v28 = vld [vmem:[%s3852_s12 + $0x80] sm:$0xff]  ;;  %v956_v33 = vld [vmem:[%s3852_s12 + $0x88] sm:$0xff]  ;;  %v969_v38 = vpack.c.bf16 %v955_v31, %v954_v30  ;;  %v1414_v20 = vld [vmem:[%s3852_s12 + $0xb0] sm:$0xff] }
  0x74   : > { %2752 = vmatpush3.bf16.msra.mxu0 %v3901_v4  ;;  %2784 = vmatpush3.bf16.msra.mxu1 %v3901_v4  ;;  %v3971_v29 = vld [vmem:[%s3852_s12 + $0xa0] sm:$0xff]  ;;  %v957_v34 = vld [vmem:[%s3852_s12 + $0xa8] sm:$0xff]  ;;  %v1418_v30 = vld [vmem:[%s3852_s12 + $0x130] sm:$0xff] }
  0x75   : > { %2753 = vmatprep.subr.bf16.mxu0 %v3910_v5  ;;  %2785 = vmatprep.subr.bf16.mxu1 %v3910_v5  ;;  %v453_v35 = vpack.c.bf16 %v3971_v29, %v3968_v28  ;;  %v970_v39 = vpack.c.bf16 %v957_v34, %v956_v33  ;;  %v3988_v40 = vld [vmem:[%s3852_s12 + $0xc0] sm:$0xff]  ;;  %v432_v42 = vld [vmem:[#allocation2 + $0x68] sm:$0xff]  ;;  %v1420_v33 = vld [vmem:[%s3852_s12 + $0x170] sm:$0xff] }
  0x76   : > { %486 = vperm.xlu1 %2947, %v424_v16   ;;  %481 = vperm.xlu0 %2946, %v423_v17   ;;  %v3991_v41 = vld [vmem:[%s3852_s12 + $0xe0] sm:$0xff]  ;;  %v958_v46 = vld [vmem:[%s3852_s12 + $0xc8] sm:$0xff]  ;;  %v1411_v16 = vld [vmem:[%s3852_s12 + $0x50] sm:$0xff] }
  0x77   : > { %v3994_v43 = vld [vmem:[%s3852_s12 + $0x100] sm:$0xff]  ;;  %v959_v47 = vld [vmem:[%s3852_s12 + $0xe8] sm:$0xff]  ;;  %v454_v48 = vpack.c.bf16 %v3991_v41, %v3988_v40  ;;  %v1412_v17 = vld [vmem:[%s3852_s12 + $0x70] sm:$0xff] }
  0x78   : > { %2754 = vmatpush3.bf16.msra.mxu0 %v3910_v5  ;;  %2786 = vmatpush3.bf16.msra.mxu1 %v3910_v5  ;;  %v3997_v44 = vld [vmem:[%s3852_s12 + $0x120] sm:$0xff]  ;;  %v960_v49 = vld [vmem:[%s3852_s12 + $0x108] sm:$0xff]  ;;  %v971_v54 = vpack.c.bf16 %v959_v47, %v958_v46  ;;  %v1426_v18 = vpack.c.bf16 %v1412_v17, %v1411_v16 }
  0x79   : > { %2755 = vmatprep.subr.bf16.mxu0 %v3926_v9  ;;  %2787 = vmatprep.subr.bf16.mxu1 %v3926_v9  ;;  %v431_v45 = vld [vmem:[#allocation2 + $0x60] sm:$0xff]  ;;  %v961_v50 = vld [vmem:[%s3852_s12 + $0x128] sm:$0xff]  ;;  %v455_v51 = vpack.c.bf16 %v3997_v44, %v3994_v43 }
  0x7a   : > { %496 = vperm.xlu1 %2947, %v426_v21   ;;  %491 = vperm.xlu0 %2946, %v425_v22   ;;  %v972_v55 = vpack.c.bf16 %v961_v50, %v960_v49  ;;  %v4014_v56 = vld [vmem:[%s3852_s12 + $0x140] sm:$0xff]  ;;  %v962_v60 = vld [vmem:[%s3852_s12 + $0x148] sm:$0xff]  ;;  %v1415_v22 = vld [vmem:[%s3852_s12 + $0xd0] sm:$0xff] }
  0x7b   : > { %v4017_v57 = vld [vmem:[%s3852_s12 + $0x160] sm:$0xff]  ;;  %v963_v61 = vld [vmem:[%s3852_s12 + $0x168] sm:$0xff] }
  0x7c   : > { %2756 = vmatpush3.bf16.msra.mxu0 %v3926_v9  ;;  %2788 = vmatpush3.bf16.msra.mxu1 %v3926_v9  ;;  %v4020_v58 = vld [vmem:[%s3852_s12 + $0x180] sm:$0xff]  ;;  %v456_v62 = vpack.c.bf16 %v4017_v57, %v4014_v56  ;;  %v964_v63 = vld [vmem:[%s3852_s12 + $0x188] sm:$0xff]  ;;  %v973_v3 = vpack.c.bf16 %v963_v61, %v962_v60  ;;  %v4091_v60 = vstv %s3860_s5  ;;  %s706_s5 = ssub.f32 0.0, %s3854_s13 }
  0x7d   : > { %2757 = vmatprep.subr.bf16.mxu0 %v3935_v14  ;;  %2789 = vmatprep.subr.bf16.mxu1 %v3935_v14  ;;  %v4023_v59 = vld [vmem:[%s3852_s12 + $0x1a0] sm:$0xff]  ;;  %v965_v0 = vld [vmem:[%s3852_s12 + $0x1a8] sm:$0xff] }
  0x7e   : > { %506 = vperm.xlu1 %2947, %v428_v26   ;;  %501 = vperm.xlu0 %2946, %v427_v27   ;;  %v974_v8 = vpack.c.bf16 %v965_v0, %v964_v63  ;;  %v4041_v10 = vld [vmem:[%s3852_s12 + $0x1c0] sm:$0xff]  ;;  %v966_v11 = vld [vmem:[%s3852_s12 + $0x1c8] sm:$0xff]  ;;  %v1417_v27 = vld [vmem:[%s3852_s12 + $0x110] sm:$0xff] }
  0x7f   : > { %v967_v12 = vld [vmem:[%s3852_s12 + $0x1e8] sm:$0xff]  ;;  %v1429_v31 = vpack.c.bf16 %v1418_v30, %v1417_v27  ;;  %v4086_v50 = vld [vmem:[%s4839_s2] ss:$0 sm:$0xff] }
  0x80   : > { %2758 = vmatpush3.bf16.msra.mxu0 %v3935_v14  ;;  %2790 = vmatpush3.bf16.msra.mxu1 %v3935_v14 }
  0x81   : > { %2759 = vmatprep.subr.bf16.mxu0 %v3946_v19  ;;  %2791 = vmatprep.subr.bf16.mxu1 %v3946_v19 }
  0x82   : > { %516 = vperm.xlu1 %2947, %v430_v36   ;;  %511 = vperm.xlu0 %2946, %v429_v37   ;;  %v1422_v36 = vld [vmem:[%s3852_s12 + $0x1b0] sm:$0xff] }
  0x84   : > { %2760 = vmatpush3.bf16.msra.mxu0 %v3946_v19  ;;  %2792 = vmatpush3.bf16.msra.mxu1 %v3946_v19 }
  0x85   : > { %2761 = vmatprep.subr.bf16.mxu0 %v3955_v23  ;;  %2793 = vmatprep.subr.bf16.mxu1 %v3955_v23 }
  0x86   : > { %526 = vperm.xlu1 %2947, %v432_v42   ;;  %521 = vperm.xlu0 %2946, %v431_v45  }
  0x88   : > { %2762 = vmatpush3.bf16.msra.mxu0 %v3955_v23  ;;  %2794 = vmatpush3.bf16.msra.mxu1 %v3955_v23 }
  0x89   : > { %2811 = vmatprep.subr.bf16.mxu0 %v3886_v1  ;;  %2843 = vmatprep.subr.bf16.mxu1 %v3886_v1 }
  0x8a   : > { %536 = vperm.xlu1 %2947, %v434_v52   ;;  %531 = vperm.xlu0 %2946, %v433_v53  }
  0x8b   : > { %2764 = vmatmul.mubr.bf16.vlgmr.msra.gmra.mxu0 %v452_v32  ;;  %2796 = vmatmul.mubr.bf16.vlgmr.msra.gmra.mxu1 %v969_v38  ;;  %v1419_v32 = vld [vmem:[%s3852_s12 + $0x150] sm:$0xff] }
  0x8c   : > { %2767 = vmatprep.mubr.bf16.mxu0 %v453_v35  ;;  %2812 = vmatpush3.bf16.msra.mxu0 %v3886_v1  ;;  %v1430_v34 = vpack.c.bf16 %v1420_v33, %v1419_v32  ;;  %v1421_v35 = vld [vmem:[%s3852_s12 + $0x190] sm:$0xff] }
  0x8d   : > { %2799 = vmatprep.mubr.bf16.mxu1 %v970_v39  ;;  %2813 = vmatprep.subr.bf16.mxu0 %v3891_v2  ;;  %v1431_v37 = vpack.c.bf16 %v1422_v36, %v1421_v35  ;;  %v1423_v38 = vld [vmem:[%s3852_s12 + $0x1d0] sm:$0xff] }
  0x8e   : > { %2844 = vmatpush3.bf16.msra.mxu1 %v3886_v1  ;;  %v457_v1 = vpack.c.bf16 %v4023_v59, %v4020_v58  ;;  %v1424_v39 = vld [vmem:[%s3852_s12 + $0x1f0] sm:$0xff] }
  0x8f   : > { %2845 = vmatprep.subr.bf16.mxu1 %v3891_v2  ;;  %v1432_v42 = vpack.c.bf16 %v1424_v39, %v1423_v38 }
  0x90   : > { %2814 = vmatpush3.bf16.msra.mxu0 %v3891_v2 }
  0x91   : > { %2815 = vmatprep.subr.bf16.mxu0 %v3901_v4 }
  0x92   : > { %2846 = vmatpush3.bf16.msra.mxu1 %v3891_v2  ;;  %v4044_v2 = vld [vmem:[%s3852_s12 + $0x1e0] sm:$0xff] }
  0x93   : > { %2768 = vmatmul.mubr.bf16.gmra.mxu0 %v454_v48  ;;  %2800 = vmatmul.mubr.bf16.gmra.mxu1 %v971_v54  ;;  %v458_v13 = vpack.c.bf16 %v4044_v2, %v4041_v10 }
  0x94   : > { %2771 = vmatprep.mubr.bf16.mxu0 %v455_v51  ;;  %2816 = vmatpush3.bf16.msra.mxu0 %v3901_v4 }
  0x95   : > { %2803 = vmatprep.mubr.bf16.mxu1 %v972_v55  ;;  %2817 = vmatprep.subr.bf16.mxu0 %v3910_v5 }
  0x96   : > { %2847 = vmatprep.subr.bf16.mxu1 %v3901_v4 }
  0x97   : > { %2848 = vmatpush3.bf16.msra.mxu1 %v3901_v4  ;;  %v975_v4 = vpack.c.bf16 %v967_v12, %v966_v11 }
  0x98   : > { %2818 = vmatpush3.bf16.msra.mxu0 %v3910_v5  ;;  %2849 = vmatprep.subr.bf16.mxu1 %v3910_v5 }
  0x99   : > { %2819 = vmatprep.subr.bf16.mxu0 %v3926_v9 }
  0x9b   : > { %2772 = vmatmul.mubr.bf16.gmra.mxu0 %v456_v62  ;;  %2804 = vmatmul.mubr.bf16.gmra.mxu1 %v973_v3 }
  0x9c   : > { %2775 = vmatprep.mubr.bf16.mxu0 %v457_v1  ;;  %2820 = vmatpush3.bf16.msra.mxu0 %v3926_v9 }
  0x9d   : > { %2807 = vmatprep.mubr.bf16.mxu1 %v974_v8  ;;  %2821 = vmatprep.subr.bf16.mxu0 %v3935_v14 }
  0x9e   : > { %2850 = vmatpush3.bf16.msra.mxu1 %v3910_v5  ;;  %v3598_v5 = vmov 127  }
  0x9f   : > { %2851 = vmatprep.subr.bf16.mxu1 %v3926_v9  ;;  %2948 = vset.pattern.permute.xlu1 %v3598_v5 }
  0xa0   : > { %2822 = vmatpush3.bf16.msra.mxu0 %v3935_v14  ;;  %2949 = vset.pattern.permute.xlu0 %v3598_v5 }
  0xa1   : > { %2823 = vmatprep.subr.bf16.mxu0 %v3946_v19 }
  0xa2   : > { %2852 = vmatpush3.bf16.msra.mxu1 %v3926_v9  ;;  %v1409_v9 = vld [vmem:[%s3852_s12 + $0x10] sm:$0xff] }
  0xa3   : > { %2776 = vmatmul.mubr.bf16.gmra.mxu0 %v458_v13  ;;  %2853 = vmatprep.subr.bf16.mxu1 %v3935_v14 }
  0xa4   : > { %2808 = vmatmul.mubr.bf16.gmra.mxu1 %v975_v4  ;;  %2824 = vmatpush3.bf16.msra.mxu0 %v3946_v19 }
  0xa5   : > { %2825 = vmatprep.subr.bf16.mxu0 %v3955_v23 }
  0xa6   : > { %2854 = vmatpush3.bf16.msra.mxu1 %v3935_v14  ;;  %v1410_v14 = vld [vmem:[%s3852_s12 + $0x30] sm:$0xff] }
  0xa7   : > { %2855 = vmatprep.subr.bf16.mxu1 %v3946_v19  ;;  %v1425_v15 = vpack.c.bf16 %v1410_v14, %v1409_v9 }
  0xa8   : > { %2826 = vmatpush3.bf16.msra.mxu0 %v3955_v23 }
  0xa9   : > { %2827 = vmatprep.mubr.bf16.mxu0 %v1425_v15 }
  0xaa   : > { %2856 = vmatpush3.bf16.msra.mxu1 %v3946_v19  ;;  %v1413_v19 = vld [vmem:[%s3852_s12 + $0x90] sm:$0xff] }
  0xab   : > { %2857 = vmatprep.subr.bf16.mxu1 %v3955_v23  ;;  %2828 = vmatmul.mubr.bf16.vlgmr.msra.gmra.mxu0 %v1426_v18  ;;  %v1427_v21 = vpack.c.bf16 %v1414_v20, %v1413_v19 }
  0xad   : > { %2831 = vmatprep.mubr.bf16.mxu0 %v1427_v21 }
  0xae   : > { %2858 = vmatpush3.bf16.msra.mxu1 %v3955_v23  ;;  %v1416_v23 = vld [vmem:[%s3852_s12 + $0xf0] sm:$0xff] }
  0xaf   : > { %v1428_v26 = vpack.c.bf16 %v1416_v23, %v1415_v22 }
  0xb3   : > { %2832 = vmatmul.mubr.bf16.gmra.mxu0 %v1428_v26 }
  0xb4   : > { %2835 = vmatprep.mubr.bf16.mxu0 %v1429_v31 }
  0xbb   : > { %2836 = vmatmul.mubr.bf16.gmra.mxu0 %v1430_v34 }
  0xbc   : > { %2839 = vmatprep.mubr.bf16.mxu0 %v1431_v37 }
  0xc3   : > { %2840 = vmatmul.mubr.bf16.gmra.mxu0 %v1432_v42 }
  0xe9   : > { %v462_v45 = vpop.permute.xlu0 %461  ;;  %v472_v46 = vpop.permute.xlu1 %471 }
  0xea   : > { %v547_v52 = vmul.f32 %v4086_v50, %v472_v46  ;;  %v545_v54 = vmul.f32 %v4086_v50, %v462_v45 }
  0xed   : > { %v467_v47 = vpop.permute.xlu0 %466  ;;  %v477_v48 = vpop.permute.xlu1 %476 }
  0xee   : > { %v548_v0 = vmul.f32 %v4086_v50, %v477_v48  ;;  %v546_v12 = vmul.f32 %v4086_v50, %v467_v47 }
  0xf1   : > { %v482_v49 = vpop.permute.xlu0 %481  ;;  %v487_v51 = vpop.permute.xlu1 %486 }
  0xf2   : > { %v549_v18 = vmul.f32 %v4086_v50, %v482_v49  ;;  %v550_v31 = vmul.f32 %v4086_v50, %v487_v51  ;;  %v4110_v49 = vstv %s706_s5 }
  0xf5   : > { %v492_v53 = vpop.permute.xlu0 %491  ;;  %v497_v61 = vpop.permute.xlu1 %496 }
  0xf6   : > { %v551_v9 = vmul.f32 %v4086_v50, %v492_v53  ;;  %v552_v23 = vmul.f32 %v4086_v50, %v497_v61 }
  0xf9   : > { %v502_v1 = vpop.permute.xlu0 %501  ;;  %v507_v14 = vpop.permute.xlu1 %506 }
  0xfa   : > { %v553_v45 = vmul.f32 %v4086_v50, %v502_v1 }
  0xfd   : > { %v512_v19 = vpop.permute.xlu0 %511  ;;  %v517_v32 = vpop.permute.xlu1 %516 }
  0xfe   : > { %v555_v36 = vmul.f32 %v4086_v50, %v512_v19 }
 0x101   : > { %v522_v37 = vpop.permute.xlu0 %521 }
 0x14b   : > { %v2765_v55 = vpop.f32.mrf.mxu0 }
 0x14c   : > { %v652_v62 = vadd.f32 %v2765_v55, %v547_v52  ;;  %v527_v52 = vpop.permute.xlu1 %526 }
 0x14d   : > { %v643_v63 = vpop.f32.mrf.mxu0 }
 0x14e   : > { %v710_v3 = vadd.f32 %v4091_v60, %v652_v62  ;;  %v644_v8 = vadd.f32 %v643_v63, %v545_v54  ;;  %988 = vperm.xlu1 %2948, %v652_v62   ;;  %v556_v62 = vmul.f32 %v4086_v50, %v517_v32 }
 0x14f   : > { %v2766_v11 = vpop.f32.mrf.mxu0 }
 0x150   : > { %2958 = vlog2.f32 %v710_v3  ;;  %v708_v13 = vadd.f32 %v4091_v60, %v644_v8  ;;  %v655_v4 = vadd.f32 %v2766_v11, %v548_v0  ;;  %978 = vperm.xlu0 %2949, %v644_v8   ;;  %v532_v0 = vpop.permute.xlu0 %531 }
 0x151   : > { %v646_v5 = vpop.f32.mrf.mxu0 }
 0x152   : > { %2960 = vlog2.f32 %v708_v13  ;;  %v711_v15 = vadd.f32 %v4091_v60, %v655_v4  ;;  %v647_v16 = vadd.f32 %v646_v5, %v546_v12  ;;  %v554_v12 = vmul.f32 %v4086_v50, %v507_v14 }
 0x153   : > { %v2769_v17 = vpop.f32.mrf.mxu0 }
 0x154   : > { %2962 = vlog2.f32 %v711_v15  ;;  %v709_v20 = vadd.f32 %v4091_v60, %v647_v16  ;;  %v668_v21 = vadd.f32 %v2769_v17, %v551_v9  ;;  %983 = vperm.xlu1 %2948, %v647_v16   ;;  %993 = vperm.xlu0 %2949, %v655_v4   ;;  %v559_v17 = vmul.f32 %v4086_v50, %v532_v0 }
 0x155   : > { %v659_v22 = vpop.f32.mrf.mxu0 }
 0x156   : > { %2964 = vlog2.f32 %v709_v20  ;;  %v714_v26 = vadd.f32 %v4091_v60, %v668_v21  ;;  %v660_v27 = vadd.f32 %v659_v22, %v549_v18 }
 0x157   : > { %v2770_v30 = vpop.f32.mrf.mxu0 }
 0x158   : > { %2966 = vlog2.f32 %v714_v26  ;;  %v712_v33 = vadd.f32 %v4091_v60, %v660_v27  ;;  %v671_v34 = vadd.f32 %v2770_v30, %v552_v23  ;;  %1008 = vperm.xlu1 %2948, %v668_v21   ;;  %v537_v21 = vpop.permute.xlu1 %536 }
 0x159   : > { %v662_v35 = vpop.f32.mrf.mxu0 }
 0x15a   : > { %2968 = vlog2.f32 %v712_v33  ;;  %v715_v38 = vadd.f32 %v4091_v60, %v671_v34  ;;  %v663_v39 = vadd.f32 %v662_v35, %v550_v31  ;;  %1013 = vperm.xlu0 %2949, %v671_v34  }
 0x15b   : > { %v2773_v42 = vpop.f32.mrf.mxu0 }
 0x15c   : > { %2970 = vlog2.f32 %v715_v38  ;;  %v713_v46 = vadd.f32 %v4091_v60, %v663_v39  ;;  %v684_v47 = vadd.f32 %v2773_v42, %v555_v36  ;;  %998 = vperm.xlu1 %2948, %v660_v27   ;;  %v557_v27 = vmul.f32 %v4086_v50, %v522_v37 }
 0x15d   : > { %v2959_v48 = vpop.eup %2958  ;;  %v675_v51 = vpop.f32.mrf.mxu0  ;;  %v560_v38 = vmul.f32 %v4086_v50, %v537_v21 }
 0x15e   : > { %v729_v53 = vmul.f32 0.6931472, %v2959_v48  ;;  %2972 = vlog2.f32 %v713_v46  ;;  %v718_v54 = vadd.f32 %v4091_v60, %v684_v47  ;;  %v676_v55 = vadd.f32 %v675_v51, %v553_v45  ;;  %1003 = vperm.xlu0 %2949, %v663_v39  }
 0x15f   : > { %v2961_v61 = vpop.eup %2960  ;;  %v2774_v63 = vpop.f32.mrf.mxu0  ;;  %v558_v51 = vmul.f32 %v4086_v50, %v527_v52 }
 0x160   : > { %v759_v1 = vmul.f32 %v4110_v49, %v729_v53  ;;  %v725_v3 = vmul.f32 0.6931472, %v2961_v61  ;;  %2974 = vlog2.f32 %v718_v54  ;;  %v716_v8 = vadd.f32 %v4091_v60, %v676_v55  ;;  %1028 = vperm.xlu1 %2948, %v684_v47  }
 0x161   : > { %v2963_v11 = vpop.eup %2962  ;;  %v687_v13 = vadd.f32 %v2774_v63, %v556_v62  ;;  %v678_v4 = vpop.f32.mrf.mxu0 }
 0x162   : > { %v777_v5 = vmul.f32 1.442695, %v759_v1  ;;  %v757_v9 = vmul.f32 %v4110_v49, %v725_v3  ;;  %v731_v15 = vmul.f32 0.6931472, %v2963_v11  ;;  %2976 = vlog2.f32 %v716_v8 }
 0x163   : > { %v2965_v16 = vpop.eup %2964  ;;  %v719_v18 = vadd.f32 %v4091_v60, %v687_v13  ;;  %v679_v19 = vadd.f32 %v678_v4, %v554_v12  ;;  %1033 = vperm.xlu0 %2949, %v687_v13   ;;  %v2777_v20 = vpop.f32.mrf.mxu0 }
 0x164   : > { %2978 = vpow2.f32 %v777_v5  ;;  %v773_v22 = vmul.f32 1.442695, %v757_v9  ;;  %v760_v14 = vmul.f32 %v4110_v49, %v731_v15  ;;  %v727_v23 = vmul.f32 0.6931472, %v2965_v16  ;;  %1018 = vperm.xlu1 %2948, %v676_v55  }
 0x165   : > { %v2967_v26 = vpop.eup %2966  ;;  %2980 = vlog2.f32 %v719_v18  ;;  %v717_v30 = vadd.f32 %v4091_v60, %v679_v19  ;;  %v700_v31 = vadd.f32 %v2777_v20, %v559_v17  ;;  %v691_v32 = vpop.f32.mrf.mxu0  ;;  %v4136_v20 = vstv %s3856_s14 }
 0x166   : > { %2982 = vpow2.f32 %v773_v22  ;;  %v779_v33 = vmul.f32 1.442695, %v760_v14  ;;  %v758_v34 = vmul.f32 %v4110_v49, %v727_v23  ;;  %v737_v35 = vmul.f32 0.6931472, %v2967_v26 }
 0x167   : > { %v2969_v36 = vpop.eup %2968  ;;  %2984 = vlog2.f32 %v717_v30  ;;  %v722_v39 = vadd.f32 %v4091_v60, %v700_v31  ;;  %v692_v42 = vadd.f32 %v691_v32, %v557_v27  ;;  %1023 = vperm.xlu0 %2949, %v679_v19   ;;  %v2778_v45 = vpop.f32.mrf.mxu0 }
 0x168   : > { %2986 = vpow2.f32 %v779_v33  ;;  %v775_v37 = vmul.f32 1.442695, %v758_v34  ;;  %v763_v46 = vmul.f32 %v4110_v49, %v737_v35  ;;  %v733_v47 = vmul.f32 0.6931472, %v2969_v36 }
 0x169   : > { %v2971_v48 = vpop.eup %2970  ;;  %2988 = vlog2.f32 %v722_v39  ;;  %v720_v53 = vadd.f32 %v4091_v60, %v692_v42  ;;  %v703_v54 = vadd.f32 %v2778_v45, %v560_v38  ;;  %1038 = vperm.xlu1 %2948, %v692_v42   ;;  %v694_v55 = vpop.f32.mrf.mxu0 }
 0x16a   : > { %2990 = vpow2.f32 %v775_v37  ;;  %v785_v61 = vmul.f32 1.442695, %v763_v46  ;;  %v761_v62 = vmul.f32 %v4110_v49, %v733_v47  ;;  %v739_v63 = vmul.f32 0.6931472, %v2971_v48 }
 0x16b   : > { %v2973_v0 = vpop.eup %2972  ;;  %2992 = vlog2.f32 %v720_v53  ;;  %v723_v1 = vadd.f32 %v4091_v60, %v703_v54  ;;  %v695_v3 = vadd.f32 %v694_v55, %v558_v51 }
 0x16c   : > { %2994 = vpow2.f32 %v785_v61  ;;  %v781_v8 = vmul.f32 1.442695, %v761_v62  ;;  %v764_v52 = vmul.f32 %v4110_v49, %v739_v63  ;;  %v735_v11 = vmul.f32 0.6931472, %v2973_v0 }
 0x16d   : > { %v2975_v12 = vpop.eup %2974  ;;  %2996 = vlog2.f32 %v723_v1  ;;  %v721_v13 = vadd.f32 %v4091_v60, %v695_v3  ;;  %1048 = vperm.xlu1 %2948, %v700_v31   ;;  %1043 = vperm.xlu0 %2949, %v695_v3  }
 0x16e   : > { %2998 = vpow2.f32 %v781_v8  ;;  %v787_v4 = vmul.f32 1.442695, %v764_v52  ;;  %v762_v5 = vmul.f32 %v4110_v49, %v735_v11  ;;  %v745_v9 = vmul.f32 0.6931472, %v2975_v12 }
 0x16f   : > { %v2977_v15 = vpop.eup %2976  ;;  %3000 = vlog2.f32 %v721_v13 }
 0x170   : > { %3002 = vpow2.f32 %v787_v4  ;;  %v783_v16 = vmul.f32 1.442695, %v762_v5  ;;  %v767_v17 = vmul.f32 %v4110_v49, %v745_v9  ;;  %v741_v18 = vmul.f32 0.6931472, %v2977_v15 }
 0x171   : > { %v2979_v19 = vpop.eup %2978  ;;  %1053 = vperm.xlu0 %2949, %v703_v54  }
 0x172   : > { %v2981_v21 = vpop.eup %2980  ;;  %v807_v22 = vmul.f32 %v2979_v19, %v3960_v24  ;;  %3004 = vpow2.f32 %v783_v16  ;;  %v793_v14 = vmul.f32 1.442695, %v767_v17  ;;  %v765_v23 = vmul.f32 %v4110_v49, %v741_v18 }
 0x173   : > { %v2983_v26 = vpop.eup %2982  ;;  %v747_v27 = vmul.f32 0.6931472, %v2981_v21 }
 0x174   : > { %v2985_v30 = vpop.eup %2984  ;;  %v824_v31 = vadd.f32 %v4136_v20, %v807_v22  ;;  %v805_v32 = vmul.f32 %v2983_v26, %v3913_v6  ;;  %3006 = vpow2.f32 %v793_v14  ;;  %v789_v33 = vmul.f32 1.442695, %v765_v23 }
 0x175   : > { %v2987_v34 = vpop.eup %2986  ;;  %v768_v35 = vmul.f32 %v4110_v49, %v747_v27  ;;  %v743_v36 = vmul.f32 0.6931472, %v2985_v30  ;;  %v4163_v14 = vstv %s3858_s22 }
 0x176   : > { %v2989_v38 = vpop.eup %2988  ;;  %3008 = vlog2.f32 %v824_v31  ;;  %v822_v24 = vadd.f32 %v4136_v20, %v805_v32  ;;  %v808_v39 = vmul.f32 %v2987_v34, %v3964_v25  ;;  %v1866_v31 = vld [vmem:[%s3852_s12 + $0x18] sm:$0xff] }
 0x177   : > { %v2991_v42 = vpop.eup %2990  ;;  %3010 = vpow2.f32 %v789_v33  ;;  %v795_v45 = vmul.f32 1.442695, %v768_v35  ;;  %v766_v37 = vmul.f32 %v4110_v49, %v743_v36  ;;  %v753_v46 = vmul.f32 0.6931472, %v2989_v38  ;;  %v1867_v32 = vld [vmem:[%s3852_s12 + $0x38] sm:$0xff] }
 0x178   : > { %v2993_v47 = vpop.eup %2992  ;;  %3012 = vlog2.f32 %v822_v24  ;;  %v825_v6 = vadd.f32 %v4136_v20, %v808_v39  ;;  %v806_v48 = vmul.f32 %v2991_v42, %v3916_v7  ;;  %v1882_v35 = vpack.c.bf16 %v1867_v32, %v1866_v31  ;;  %v1868_v36 = vld [vmem:[%s3852_s12 + $0x58] sm:$0xff] }
 0x179   : > { %v2995_v51 = vpop.eup %2994  ;;  %3014 = vpow2.f32 %v795_v45  ;;  %v791_v53 = vmul.f32 1.442695, %v766_v37  ;;  %v771_v54 = vmul.f32 %v4110_v49, %v753_v46  ;;  %v749_v55 = vmul.f32 0.6931472, %v2993_v47  ;;  %v1869_v38 = vld [vmem:[%s3852_s12 + $0x78] sm:$0xff] }
 0x17a   : > { %v2997_v61 = vpop.eup %2996  ;;  %3016 = vlog2.f32 %v825_v6  ;;  %v823_v25 = vadd.f32 %v4136_v20, %v806_v48  ;;  %v811_v62 = vmul.f32 %v2995_v51, %v3988_v40  ;;  %v1883_v45 = vpack.c.bf16 %v1869_v38, %v1868_v36  ;;  %2859 = vmatprep.mubr.bf16.mxu1 %v1882_v35 }
 0x17b   : > { %v2999_v63 = vpop.eup %2998  ;;  %3018 = vpow2.f32 %v791_v53  ;;  %v801_v0 = vmul.f32 1.442695, %v771_v54  ;;  %v769_v1 = vmul.f32 %v4110_v49, %v749_v55  ;;  %v755_v3 = vmul.f32 0.6931472, %v2997_v61 }
 0x17c   : > { %v3001_v8 = vpop.eup %3000  ;;  %3020 = vlog2.f32 %v823_v25  ;;  %v828_v7 = vadd.f32 %v4136_v20, %v811_v62  ;;  %v809_v52 = vmul.f32 %v2999_v63, %v3968_v28  ;;  %2860 = vmatmul.mubr.bf16.vlgmr.msra.gmra.mxu1 %v1883_v45 }
 0x17d   : > { %v3003_v11 = vpop.eup %3002  ;;  %3022 = vpow2.f32 %v801_v0  ;;  %v797_v12 = vmul.f32 1.442695, %v769_v1  ;;  %v772_v13 = vmul.f32 %v4110_v49, %v755_v3  ;;  %v751_v4 = vmul.f32 0.6931472, %v3001_v8 }
 0x17e   : > { %3024 = vlog2.f32 %v828_v7  ;;  %v826_v40 = vadd.f32 %v4136_v20, %v809_v52  ;;  %v812_v5 = vmul.f32 %v3003_v11, %v3991_v41  ;;  %v1870_v52 = vld [vmem:[%s3852_s12 + $0x98] sm:$0xff] }
 0x17f   : > { %v3005_v9 = vpop.eup %3004  ;;  %3026 = vpow2.f32 %v797_v12  ;;  %v803_v15 = vmul.f32 1.442695, %v772_v13  ;;  %v770_v16 = vmul.f32 %v4110_v49, %v751_v4  ;;  %v1871_v11 = vld [vmem:[%s3852_s12 + $0xb8] sm:$0xff] }
 0x180   : > { %3028 = vlog2.f32 %v826_v40  ;;  %v829_v28 = vadd.f32 %v4136_v20, %v812_v5  ;;  %v810_v17 = vmul.f32 %v3005_v9, %v3971_v29  ;;  %v1872_v40 = vld [vmem:[%s3852_s12 + $0xd8] sm:$0xff] }
 0x181   : > { %v3007_v18 = vpop.eup %3006  ;;  %3030 = vpow2.f32 %v803_v15  ;;  %v799_v19 = vmul.f32 1.442695, %v770_v16  ;;  %v1873_v5 = vld [vmem:[%s3852_s12 + $0xf8] sm:$0xff] }
 0x182   : > { %3032 = vlog2.f32 %v829_v28  ;;  %v827_v21 = vadd.f32 %v4136_v20, %v810_v17  ;;  %v815_v41 = vmul.f32 %v3007_v18, %v4014_v56  ;;  %v1884_v28 = vpack.c.bf16 %v1871_v11, %v1870_v52  ;;  %v1879_v52 = vld [vmem:[%s3852_s12 + $0x1b8] sm:$0xff] }
 0x183   : > { %v3009_v22 = vpop.eup %3008  ;;  %3034 = vpow2.f32 %v799_v19 }
 0x184   : > { %v3011_v23 = vpop.eup %3010  ;;  %v843_v26 = vmul.f32 0.6931472, %v3009_v22  ;;  %3036 = vlog2.f32 %v827_v21  ;;  %v832_v29 = vadd.f32 %v4136_v20, %v815_v41  ;;  %2863 = vmatprep.mubr.bf16.mxu1 %v1884_v28 }
 0x185   : > { %v3013_v27 = vpop.eup %3012  ;;  %v813_v30 = vmul.f32 %v3011_v23, %v3994_v43  ;;  %v1885_v23 = vpack.c.bf16 %v1873_v5, %v1872_v40 }
 0x186   : > { %v3015_v33 = vpop.eup %3014  ;;  %v873_v34 = vmul.f32 %v4163_v14, %v843_v26  ;;  %v839_v56 = vmul.f32 0.6931472, %v3013_v27  ;;  %3038 = vlog2.f32 %v832_v29 }
 0x187   : > { %v3017_v24 = vpop.eup %3016  ;;  %v830_v39 = vadd.f32 %v4136_v20, %v813_v30  ;;  %v816_v42 = vmul.f32 %v3015_v33, %v4017_v57  ;;  %2864 = vmatmul.mubr.bf16.gmra.mxu1 %v1885_v23  ;;  %v4197_v33 = vstv %s3862_s25 }
 0x188   : > { %v3019_v37 = vpop.eup %3018  ;;  %v891_v46 = vmul.f32 1.442695, %v873_v34  ;;  %v871_v43 = vmul.f32 %v4163_v14, %v839_v56  ;;  %v845_v47 = vmul.f32 0.6931472, %v3017_v24  ;;  %v1874_v34 = vld [vmem:[%s3852_s12 + $0x118] sm:$0xff] }
 0x189   : > { %v3021_v6 = vpop.eup %3020  ;;  %3040 = vlog2.f32 %v830_v39  ;;  %v833_v48 = vadd.f32 %v4136_v20, %v816_v42  ;;  %v814_v51 = vmul.f32 %v3019_v37, %v3997_v44  ;;  %v1875_v56 = vld [vmem:[%s3852_s12 + $0x138] sm:$0xff] }
 0x18a   : > { %v3023_v53 = vpop.eup %3022  ;;  %3042 = vpow2.f32 %v891_v46  ;;  %v887_v54 = vmul.f32 1.442695, %v871_v43  ;;  %v874_v57 = vmul.f32 %v4163_v14, %v845_v47  ;;  %v841_v55 = vmul.f32 0.6931472, %v3021_v6  ;;  %v1876_v39 = vld [vmem:[%s3852_s12 + $0x158] sm:$0xff] }
 0x18b   : > { %v3025_v61 = vpop.eup %3024  ;;  %3044 = vlog2.f32 %v833_v48  ;;  %v831_v25 = vadd.f32 %v4136_v20, %v814_v51  ;;  %v819_v62 = vmul.f32 %v3023_v53, %v4041_v10  ;;  %v1886_v24 = vpack.c.bf16 %v1875_v56, %v1874_v34  ;;  %v1877_v42 = vld [vmem:[%s3852_s12 + $0x178] sm:$0xff] }
 0x18c   : > { %v3027_v63 = vpop.eup %3026  ;;  %3046 = vpow2.f32 %v887_v54  ;;  %v893_v44 = vmul.f32 1.442695, %v874_v57  ;;  %v872_v0 = vmul.f32 %v4163_v14, %v841_v55  ;;  %v851_v1 = vmul.f32 0.6931472, %v3025_v61 }
 0x18d   : > { %v3029_v3 = vpop.eup %3028  ;;  %3048 = vlog2.f32 %v831_v25  ;;  %v836_v8 = vadd.f32 %v4136_v20, %v819_v62  ;;  %v817_v7 = vmul.f32 %v3027_v63, %v4020_v58  ;;  %v1887_v46 = vpack.c.bf16 %v1877_v42, %v1876_v39  ;;  %2867 = vmatprep.mubr.bf16.mxu1 %v1886_v24 }
 0x18e   : > { %v3031_v12 = vpop.eup %3030  ;;  %3050 = vpow2.f32 %v893_v44  ;;  %v889_v13 = vmul.f32 1.442695, %v872_v0  ;;  %v877_v10 = vmul.f32 %v4163_v14, %v851_v1  ;;  %v847_v4 = vmul.f32 0.6931472, %v3029_v3 }
 0x18f   : > { %v3033_v9 = vpop.eup %3032  ;;  %3052 = vlog2.f32 %v836_v8  ;;  %v834_v15 = vadd.f32 %v4136_v20, %v817_v7  ;;  %v820_v16 = vmul.f32 %v3031_v12, %v4044_v2  ;;  %2868 = vmatmul.mubr.bf16.gmra.mxu1 %v1887_v46  ;;  %v1878_v7 = vld [vmem:[%s3852_s12 + $0x198] sm:$0xff] }
 0x190   : > { %v3035_v17 = vpop.eup %3034  ;;  %3054 = vpow2.f32 %v889_v13  ;;  %v899_v58 = vmul.f32 1.442695, %v877_v10  ;;  %v875_v18 = vmul.f32 %v4163_v14, %v847_v4  ;;  %v853_v19 = vmul.f32 0.6931472, %v3033_v9  ;;  %v1880_v10 = vld [vmem:[%s3852_s12 + $0x1d8] sm:$0xff] }
 0x191   : > { %v3037_v21 = vpop.eup %3036  ;;  %3056 = vlog2.f32 %v834_v15  ;;  %v837_v41 = vadd.f32 %v4136_v20, %v820_v16  ;;  %v818_v22 = vmul.f32 %v3035_v17, %v4023_v59  ;;  %v1888_v13 = vpack.c.bf16 %v1879_v52, %v1878_v7  ;;  %v1881_v4 = vld [vmem:[%s3852_s12 + $0x1f8] sm:$0xff] }
 0x192   : > { %3058 = vpow2.f32 %v899_v58  ;;  %v895_v2 = vmul.f32 1.442695, %v875_v18  ;;  %v878_v26 = vmul.f32 %v4163_v14, %v853_v19  ;;  %v849_v29 = vmul.f32 0.6931472, %v3037_v21 }
 0x193   : > { %v3039_v27 = vpop.eup %3038  ;;  %3060 = vlog2.f32 %v837_v41  ;;  %v835_v30 = vadd.f32 %v4136_v20, %v818_v22  ;;  %2871 = vmatprep.mubr.bf16.mxu1 %v1888_v13  ;;  %v1889_v17 = vpack.c.bf16 %v1881_v4, %v1880_v10 }
 0x194   : > { %3062 = vpow2.f32 %v895_v2  ;;  %v901_v31 = vmul.f32 1.442695, %v878_v26  ;;  %v876_v59 = vmul.f32 %v4163_v14, %v849_v29  ;;  %v859_v32 = vmul.f32 0.6931472, %v3039_v27 }
 0x195   : > { %3064 = vlog2.f32 %v835_v30 }
 0x196   : > { %v3041_v35 = vpop.eup %3040  ;;  %3066 = vpow2.f32 %v901_v31  ;;  %v897_v36 = vmul.f32 1.442695, %v876_v59  ;;  %v881_v38 = vmul.f32 %v4163_v14, %v859_v32 }
 0x197   : > { %v3043_v45 = vpop.eup %3042  ;;  %v855_v37 = vmul.f32 0.6931472, %v3041_v35  ;;  %2872 = vmatmul.mubr.bf16.gmra.mxu1 %v1889_v17 }
 0x198   : > { %v3045_v43 = vpop.eup %3044  ;;  %v922_v47 = vsub.f32 %v3043_v45, %v4197_v33  ;;  %3068 = vpow2.f32 %v897_v36  ;;  %v907_v6 = vmul.f32 1.442695, %v881_v38  ;;  %v2797_v45 = vpop.f32.mrf.mxu1 }
 0x199   : > { %v3047_v48 = vpop.eup %3046  ;;  %v879_v51 = vmul.f32 %v4163_v14, %v855_v37  ;;  %v861_v53 = vmul.f32 0.6931472, %v3045_v43 }
 0x19a   : > { %v3049_v54 = vpop.eup %3048  ;;  %938 = vst [vmem:[%s3864_s26 + $0x40] sm:$0xff] %v922_v47  ;;  %v920_v57 = vsub.f32 %v3047_v48, %v4197_v33  ;;  %3070 = vpow2.f32 %v907_v6  ;;  %v1106_v6 = vpop.f32.mrf.mxu1 }
 0x19b   : > { %v3051_v55 = vpop.eup %3050  ;;  %v903_v61 = vmul.f32 1.442695, %v879_v51  ;;  %v882_v25 = vmul.f32 %v4163_v14, %v861_v53  ;;  %v857_v62 = vmul.f32 0.6931472, %v3049_v54 }
 0x19c   : > { %v3053_v63 = vpop.eup %3052  ;;  %936 = vst [vmem:[%s3864_s26] sm:$0xff] %v920_v57  ;;  %v923_v44 = vsub.f32 %v3051_v55, %v4197_v33  ;;  %v2798_v57 = vpop.f32.mrf.mxu1 }
 0x19d   : > { %v3055_v0 = vpop.eup %3054  ;;  %3072 = vpow2.f32 %v903_v61  ;;  %v909_v1 = vmul.f32 1.442695, %v882_v25  ;;  %v880_v3 = vmul.f32 %v4163_v14, %v857_v62  ;;  %v867_v8 = vmul.f32 0.6931472, %v3053_v63 }
 0x19e   : > { %v3057_v11 = vpop.eup %3056  ;;  %939 = vst [vmem:[%s3864_s26 + $0x60] sm:$0xff] %v923_v44  ;;  %v921_v12 = vsub.f32 %v3055_v0, %v4197_v33  ;;  %v1109_v61 = vpop.f32.mrf.mxu1 }
 0x19f   : > { %v3059_v40 = vpop.eup %3058  ;;  %3074 = vpow2.f32 %v909_v1  ;;  %v905_v5 = vmul.f32 1.442695, %v880_v3  ;;  %v885_v9 = vmul.f32 %v4163_v14, %v867_v8  ;;  %v863_v15 = vmul.f32 0.6931472, %v3057_v11 }
 0x1a0   : > { %v3061_v16 = vpop.eup %3060  ;;  %937 = vst [vmem:[%s3864_s26 + $0x20] sm:$0xff] %v921_v12  ;;  %v926_v28 = vsub.f32 %v3059_v40, %v4197_v33  ;;  %v2801_v25 = vpop.f32.mrf.mxu1 }
 0x1a1   : > { %v3063_v58 = vpop.eup %3062  ;;  %3076 = vpow2.f32 %v905_v5  ;;  %v915_v18 = vmul.f32 1.442695, %v885_v9  ;;  %v883_v19 = vmul.f32 %v4163_v14, %v863_v15  ;;  %v869_v21 = vmul.f32 0.6931472, %v3061_v16 }
 0x1a2   : > { %v3065_v41 = vpop.eup %3064  ;;  %942 = vst [vmem:[%s3864_s26 + $0xc0] sm:$0xff] %v926_v28  ;;  %v924_v22 = vsub.f32 %v3063_v58, %v4197_v33  ;;  %v1122_v62 = vpop.f32.mrf.mxu1 }
 0x1a3   : > { %v3067_v23 = vpop.eup %3066  ;;  %3078 = vpow2.f32 %v915_v18  ;;  %v911_v2 = vmul.f32 1.442695, %v883_v19  ;;  %v886_v26 = vmul.f32 %v4163_v14, %v869_v21  ;;  %v865_v29 = vmul.f32 0.6931472, %v3065_v41 }
 0x1a4   : > { %940 = vst [vmem:[%s3864_s26 + $0x80] sm:$0xff] %v924_v22  ;;  %v927_v27 = vsub.f32 %v3067_v23, %v4197_v33  ;;  %v2802_v63 = vpop.f32.mrf.mxu1 }
 0x1a5   : > { %v3069_v30 = vpop.eup %3068  ;;  %3080 = vpow2.f32 %v911_v2  ;;  %v917_v31 = vmul.f32 1.442695, %v886_v26  ;;  %v884_v59 = vmul.f32 %v4163_v14, %v865_v29 }
 0x1a6   : > { %943 = vst [vmem:[%s3864_s26 + $0xe0] sm:$0xff] %v927_v27  ;;  %v925_v32 = vsub.f32 %v3069_v30, %v4197_v33  ;;  %v1125_v1 = vpop.f32.mrf.mxu1 }
 0x1a7   : > { %v3071_v34 = vpop.eup %3070  ;;  %3082 = vpow2.f32 %v917_v31  ;;  %v913_v56 = vmul.f32 1.442695, %v884_v59 }
 0x1a8   : > { %941 = vst [vmem:[%s3864_s26 + $0xa0] sm:$0xff] %v925_v32  ;;  %v930_v35 = vsub.f32 %v3071_v34, %v4197_v33  ;;  %v2805_v12 = vpop.f32.mrf.mxu1 }
 0x1a9   : > { %3084 = vpow2.f32 %v913_v56 }
 0x1aa   : > { %v3073_v36 = vpop.eup %3072  ;;  %946 = vst [vmem:[%s3864_s26 + $0x140] sm:$0xff] %v930_v35  ;;  %v1138_v16 = vpop.f32.mrf.mxu1 }
 0x1ab   : > { %v928_v38 = vsub.f32 %v3073_v36, %v4197_v33 }
 0x1ac   : > { %v3075_v24 = vpop.eup %3074  ;;  %v2806_v22 = vpop.f32.mrf.mxu1 }
 0x1ad   : > { %944 = vst [vmem:[%s3864_s26 + $0x100] sm:$0xff] %v928_v38  ;;  %v931_v39 = vsub.f32 %v3075_v24, %v4197_v33 }
 0x1ae   : > { %v3077_v42 = vpop.eup %3076  ;;  %v1141_v32 = vpop.f32.mrf.mxu1 }
 0x1af   : > { %947 = vst [vmem:[%s3864_s26 + $0x160] sm:$0xff] %v931_v39  ;;  %v929_v37 = vsub.f32 %v3077_v42, %v4197_v33 }
 0x1b0   : > { %v3079_v46 = vpop.eup %3078 }
 0x1b1   : > { %945 = vst [vmem:[%s3864_s26 + $0x120] sm:$0xff] %v929_v37  ;;  %v934_v43 = vsub.f32 %v3079_v46, %v4197_v33 }
 0x1b2   : > { %v3081_v47 = vpop.eup %3080 }
 0x1b3   : > { %950 = vst [vmem:[%s3864_s26 + $0x1c0] sm:$0xff] %v934_v43  ;;  %v932_v48 = vsub.f32 %v3081_v47, %v4197_v33 }
 0x1b4   : > { %v3083_v51 = vpop.eup %3082 }
 0x1b5   : > { %948 = vst [vmem:[%s3864_s26 + $0x180] sm:$0xff] %v932_v48  ;;  %v935_v53 = vsub.f32 %v3083_v51, %v4197_v33 }
 0x1b6   : > { %v3085_v54 = vpop.eup %3084 }
 0x1b7   : > { %951 = vst [vmem:[%s3864_s26 + $0x1e0] sm:$0xff] %v935_v53  ;;  %v933_v55 = vsub.f32 %v3085_v54, %v4197_v33 }
 0x1b9   : > { %949 = vst [vmem:[%s3864_s26 + $0x1a0] sm:$0xff] %v933_v55 }
 0x1c9   : > { %v989_v44 = vpop.permute.xlu1 %988 }
 0x1ca   : > { %v1058_v0 = vmul.f32 %v4086_v50, %v989_v44 }
 0x1cb   : > { %v979_v3 = vpop.permute.xlu0 %978 }
 0x1cc   : > { %v1115_v8 = vadd.f32 %v2797_v45, %v1058_v0  ;;  %v1056_v7 = vmul.f32 %v4086_v50, %v979_v3  ;;  %v2809_v45 = vpop.f32.mrf.mxu1 }
 0x1ce   : > { %v1171_v52 = vadd.f32 %v1115_v8, %v4091_v60  ;;  %v1107_v11 = vadd.f32 %v1106_v6, %v1056_v7  ;;  %1445 = vperm.xlu1 %2948, %v1115_v8  }
 0x1cf   : > { %v984_v13 = vpop.permute.xlu1 %983  ;;  %v994_v10 = vpop.permute.xlu0 %993 }
 0x1d0   : > { %3086 = vlog2.f32 %v1171_v52  ;;  %v1169_v4 = vadd.f32 %v1107_v11, %v4091_v60  ;;  %v1057_v40 = vmul.f32 %v4086_v50, %v984_v13  ;;  %v1059_v5 = vmul.f32 %v4086_v50, %v994_v10 }
 0x1d2   : > { %3088 = vlog2.f32 %v1169_v4  ;;  %v1110_v9 = vadd.f32 %v1109_v61, %v1057_v40  ;;  %v1118_v15 = vadd.f32 %v2798_v57, %v1059_v5  ;;  %1435 = vperm.xlu1 %2948, %v1107_v11   ;;  %v1154_v61 = vpop.f32.mrf.mxu1 }
 0x1d3   : > { %v1009_v28 = vpop.permute.xlu1 %1008 }
 0x1d4   : > { %v1170_v17 = vadd.f32 %v1110_v9, %v4091_v60  ;;  %v1172_v58 = vadd.f32 %v1118_v15, %v4091_v60  ;;  %v1062_v18 = vmul.f32 %v4086_v50, %v1009_v28  ;;  %1450 = vperm.xlu0 %2949, %v1118_v15   ;;  %v2810_v10 = vpop.f32.mrf.mxu1 }
 0x1d5   : > { %v1014_v19 = vpop.permute.xlu0 %1013 }
 0x1d6   : > { %3090 = vlog2.f32 %v1170_v17  ;;  %v1131_v21 = vadd.f32 %v2801_v25, %v1062_v18  ;;  %v1063_v41 = vmul.f32 %v4086_v50, %v1014_v19 }
 0x1d7   : > { %3092 = vlog2.f32 %v1172_v58  ;;  %v999_v23 = vpop.permute.xlu1 %998 }
 0x1d8   : > { %v1175_v2 = vadd.f32 %v1131_v21, %v4091_v60  ;;  %v1134_v26 = vadd.f32 %v2802_v63, %v1063_v41  ;;  %v1060_v29 = vmul.f32 %v4086_v50, %v999_v23  ;;  %1465 = vperm.xlu1 %2948, %v1131_v21   ;;  %1440 = vperm.xlu0 %2949, %v1110_v9  }
 0x1d9   : > { %v1004_v27 = vpop.permute.xlu0 %1003 }
 0x1da   : > { %3094 = vlog2.f32 %v1175_v2  ;;  %v1176_v30 = vadd.f32 %v1134_v26, %v4091_v60  ;;  %v1123_v31 = vadd.f32 %v1122_v62, %v1060_v29  ;;  %v1061_v59 = vmul.f32 %v4086_v50, %v1004_v27  ;;  %v1157_v2 = vpop.f32.mrf.mxu1 }
 0x1db   : > { %v1029_v34 = vpop.permute.xlu1 %1028 }
 0x1dc   : > { %3096 = vlog2.f32 %v1176_v30  ;;  %v1173_v56 = vadd.f32 %v1123_v31, %v4091_v60  ;;  %v1126_v35 = vadd.f32 %v1125_v1, %v1061_v59  ;;  %v1066_v36 = vmul.f32 %v4086_v50, %v1029_v34  ;;  %1455 = vperm.xlu1 %2948, %v1123_v31   ;;  %1470 = vperm.xlu0 %2949, %v1134_v26  }
 0x1dd   : > { %v3087_v38 = vpop.eup %3086 }
 0x1de   : > { %v1190_v24 = vmul.f32 0.6931472, %v3087_v38  ;;  %3098 = vlog2.f32 %v1173_v56  ;;  %v1174_v39 = vadd.f32 %v1126_v35, %v4091_v60  ;;  %v1147_v42 = vadd.f32 %v2805_v12, %v1066_v36  ;;  %v1034_v37 = vpop.permute.xlu0 %1033 }
 0x1df   : > { %v3089_v46 = vpop.eup %3088  ;;  %v1067_v43 = vmul.f32 %v4086_v50, %v1034_v37  ;;  %v1019_v47 = vpop.permute.xlu1 %1018 }
 0x1e0   : > { %v1219_v6 = vmul.f32 %v1190_v24, %v4110_v49  ;;  %v1186_v48 = vmul.f32 0.6931472, %v3089_v46  ;;  %3100 = vlog2.f32 %v1174_v39  ;;  %v1179_v51 = vadd.f32 %v1147_v42, %v4091_v60  ;;  %1485 = vperm.xlu1 %2948, %v1147_v42   ;;  %1460 = vperm.xlu0 %2949, %v1126_v35  }
 0x1e1   : > { %v1150_v53 = vadd.f32 %v2806_v22, %v1067_v43  ;;  %v1064_v54 = vmul.f32 %v4086_v50, %v1019_v47 }
 0x1e2   : > { %v1237_v57 = vmul.f32 1.442695, %v1219_v6  ;;  %v1217_v55 = vmul.f32 %v1186_v48, %v4110_v49  ;;  %3102 = vlog2.f32 %v1179_v51  ;;  %v1024_v25 = vpop.permute.xlu0 %1023 }
 0x1e3   : > { %v3091_v62 = vpop.eup %3090  ;;  %v1180_v63 = vadd.f32 %v1150_v53, %v4091_v60  ;;  %v1139_v44 = vadd.f32 %v1138_v16, %v1064_v54  ;;  %v1065_v0 = vmul.f32 %v4086_v50, %v1024_v25  ;;  %v4276_v50 = vld [vmem:[%s4839_s2] ss:$0 sm:$0xff] }
 0x1e4   : > { %v3093_v1 = vpop.eup %3092  ;;  %3104 = vpow2.f32 %v1237_v57  ;;  %v1233_v3 = vmul.f32 1.442695, %v1217_v55  ;;  %v1188_v8 = vmul.f32 0.6931472, %v3091_v62  ;;  %v1039_v7 = vpop.permute.xlu1 %1038  ;;  %1490 = vperm.xlu0 %2949, %v1150_v53   ;;  %v3471_v53 = vld [vmem:[%s3852_s12 + $0x48] sm:$0xff] }
 0x1e5   : > { %v1192_v52 = vmul.f32 0.6931472, %v3093_v1  ;;  %3106 = vlog2.f32 %v1180_v63  ;;  %v1177_v11 = vadd.f32 %v1139_v44, %v4091_v60  ;;  %v1142_v12 = vadd.f32 %v1141_v32, %v1065_v0  ;;  %1475 = vperm.xlu1 %2948, %v1139_v44   ;;  %v3472_v44 = vld [vmem:[%s3852_s12 + $0x8] sm:$0xff] }
 0x1e6   : > { %3108 = vpow2.f32 %v1233_v3  ;;  %v1218_v13 = vmul.f32 %v1188_v8, %v4110_v49  ;;  %v1068_v4 = vmul.f32 %v4276_v50, %v1039_v7 }
 0x1e7   : > { %v3095_v40 = vpop.eup %3094  ;;  %v1220_v5 = vmul.f32 %v1192_v52, %v4110_v49  ;;  %3110 = vlog2.f32 %v1177_v11  ;;  %v1178_v9 = vadd.f32 %v1142_v12, %v4091_v60 }
 0x1e8   : > { %v1235_v15 = vmul.f32 1.442695, %v1218_v13  ;;  %v1198_v16 = vmul.f32 0.6931472, %v3095_v40  ;;  %v1155_v28 = vadd.f32 %v1154_v61, %v1068_v4  ;;  %v1049_v17 = vpop.permute.xlu1 %1048  ;;  %v1044_v58 = vpop.permute.xlu0 %1043  ;;  %1480 = vperm.xlu0 %2949, %v1142_v12   ;;  %v3473_v40 = vld [vmem:[%s3852_s12 + $0x28] sm:$0xff] }
 0x1e9   : > { %v3097_v18 = vpop.eup %3096  ;;  %v1239_v19 = vmul.f32 1.442695, %v1220_v5  ;;  %3112 = vlog2.f32 %v1178_v9  ;;  %v1070_v21 = vmul.f32 %v4276_v50, %v1049_v17  ;;  %v1069_v41 = vmul.f32 %v4276_v50, %v1044_v58 }
 0x1ea   : > { %3114 = vpow2.f32 %v1235_v15  ;;  %v1223_v22 = vmul.f32 %v1198_v16, %v4110_v49  ;;  %v1200_v23 = vmul.f32 0.6931472, %v3097_v18  ;;  %v1181_v26 = vadd.f32 %v1155_v28, %v4091_v60  ;;  %1495 = vperm.xlu1 %2948, %v1155_v28   ;;  %v3474_v15 = vld [vmem:[%s3852_s12 + $0x68] sm:$0xff] }
 0x1eb   : > { %v3099_v29 = vpop.eup %3098  ;;  %3116 = vpow2.f32 %v1239_v19  ;;  %v1163_v27 = vadd.f32 %v2809_v45, %v1070_v21  ;;  %v1158_v30 = vadd.f32 %v1157_v2, %v1069_v41 }
 0x1ec   : > { %v1245_v31 = vmul.f32 1.442695, %v1223_v22  ;;  %v1224_v59 = vmul.f32 %v1200_v23, %v4110_v49  ;;  %v1194_v32 = vmul.f32 0.6931472, %v3099_v29  ;;  %3118 = vlog2.f32 %v1181_v26  ;;  %v1054_v34 = vpop.permute.xlu0 %1053  ;;  %v3475_v23 = vld [vmem:[%s3852_s12 + $0xc8] sm:$0xff] }
 0x1ed   : > { %v3101_v56 = vpop.eup %3100  ;;  %v1183_v35 = vadd.f32 %v1163_v27, %v4091_v60  ;;  %v1182_v36 = vadd.f32 %v1158_v30, %v4091_v60  ;;  %v1071_v38 = vmul.f32 %v4276_v50, %v1054_v34  ;;  %1500 = vperm.xlu0 %2949, %v1158_v30  }
 0x1ee   : > { %3120 = vpow2.f32 %v1245_v31  ;;  %v1247_v24 = vmul.f32 1.442695, %v1224_v59  ;;  %v1221_v39 = vmul.f32 %v1194_v32, %v4110_v49  ;;  %v1196_v42 = vmul.f32 0.6931472, %v3101_v56  ;;  %1505 = vperm.xlu1 %2948, %v1163_v27   ;;  %v3476_v59 = vld [vmem:[%s3852_s12 + $0xe8] sm:$0xff] }
 0x1ef   : > { %v3103_v45 = vpop.eup %3102  ;;  %3122 = vlog2.f32 %v1183_v35  ;;  %v1166_v37 = vadd.f32 %v2810_v10, %v1071_v38 }
 0x1f0   : > { %3124 = vpow2.f32 %v1247_v24  ;;  %v1241_v46 = vmul.f32 1.442695, %v1221_v39  ;;  %v1222_v43 = vmul.f32 %v1196_v42, %v4110_v49  ;;  %v1206_v47 = vmul.f32 0.6931472, %v3103_v45  ;;  %v3477_v39 = vld [vmem:[%s3852_s12 + $0x88] sm:$0xff] }
 0x1f1   : > { %v3105_v6 = vpop.eup %3104  ;;  %3126 = vlog2.f32 %v1182_v36  ;;  %v1184_v48 = vadd.f32 %v1166_v37, %v4091_v60  ;;  %1510 = vperm.xlu0 %2949, %v1166_v37  }
 0x1f2   : > { %v3107_v51 = vpop.eup %3106  ;;  %v1267_v54 = vmul.f32 %v3471_v53, %v3105_v6  ;;  %3128 = vpow2.f32 %v1241_v46  ;;  %v1243_v57 = vmul.f32 1.442695, %v1222_v43  ;;  %v1227_v55 = vmul.f32 %v1206_v47, %v4110_v49  ;;  %v3478_v6 = vld [vmem:[%s3852_s12 + $0xa8] sm:$0xff] }
 0x1f3   : > { %v3109_v61 = vpop.eup %3108  ;;  %v1208_v25 = vmul.f32 0.6931472, %v3107_v51  ;;  %3130 = vlog2.f32 %v1184_v48 }
 0x1f4   : > { %v3111_v62 = vpop.eup %3110  ;;  %v1283_v63 = vadd.f32 %v1267_v54, %v4136_v20  ;;  %v1265_v0 = vmul.f32 %v3472_v44, %v3109_v61  ;;  %3132 = vpow2.f32 %v1243_v57  ;;  %v1253_v1 = vmul.f32 1.442695, %v1227_v55 }
 0x1f5   : > { %v1228_v3 = vmul.f32 %v1208_v25, %v4110_v49  ;;  %v1202_v8 = vmul.f32 0.6931472, %v3111_v62  ;;  %v3479_v62 = vld [vmem:[%s3852_s12 + $0x148] sm:$0xff] }
 0x1f6   : > { %v3113_v7 = vpop.eup %3112  ;;  %3134 = vlog2.f32 %v1283_v63  ;;  %v1281_v52 = vadd.f32 %v1265_v0, %v4136_v20 }
 0x1f7   : > { %v3115_v11 = vpop.eup %3114  ;;  %3136 = vpow2.f32 %v1253_v1  ;;  %v1255_v12 = vmul.f32 1.442695, %v1228_v3  ;;  %v1225_v13 = vmul.f32 %v1202_v8, %v4110_v49  ;;  %v1204_v10 = vmul.f32 0.6931472, %v3113_v7  ;;  %v3480_v7 = vld [vmem:[%s3852_s12 + $0x168] sm:$0xff] }
 0x1f8   : > { %v3117_v4 = vpop.eup %3116  ;;  %3138 = vlog2.f32 %v1281_v52  ;;  %v1266_v5 = vmul.f32 %v3473_v40, %v3115_v11  ;;  %v3481_v40 = vld [vmem:[%s3852_s12 + $0x108] sm:$0xff] }
 0x1f9   : > { %v3119_v9 = vpop.eup %3118  ;;  %v1268_v16 = vmul.f32 %v3474_v15, %v3117_v4  ;;  %3140 = vpow2.f32 %v1255_v12  ;;  %v1249_v28 = vmul.f32 1.442695, %v1225_v13  ;;  %v1226_v17 = vmul.f32 %v1204_v10, %v4110_v49 }
 0x1fa   : > { %v1282_v58 = vadd.f32 %v1266_v5, %v4136_v20  ;;  %v1210_v18 = vmul.f32 0.6931472, %v3119_v9 }
 0x1fb   : > { %v3121_v19 = vpop.eup %3120  ;;  %v1284_v21 = vadd.f32 %v1268_v16, %v4136_v20  ;;  %3142 = vpow2.f32 %v1249_v28  ;;  %v1251_v41 = vmul.f32 1.442695, %v1226_v17 }
 0x1fc   : > { %v3123_v22 = vpop.eup %3122  ;;  %3144 = vlog2.f32 %v1282_v58  ;;  %v1271_v2 = vmul.f32 %v3475_v23, %v3121_v19  ;;  %v1229_v26 = vmul.f32 %v1210_v18, %v4110_v49  ;;  %v3482_v19 = vld [vmem:[%s3852_s12 + $0x128] sm:$0xff] }
 0x1fd   : > { %v3125_v29 = vpop.eup %3124  ;;  %3146 = vlog2.f32 %v1284_v21  ;;  %v1214_v27 = vmul.f32 0.6931472, %v3123_v22 }
 0x1fe   : > { %v3127_v30 = vpop.eup %3126  ;;  %v1287_v31 = vadd.f32 %v1271_v2, %v4136_v20  ;;  %v1272_v32 = vmul.f32 %v3476_v59, %v3125_v29  ;;  %3148 = vpow2.f32 %v1251_v41  ;;  %v1257_v34 = vmul.f32 1.442695, %v1229_v26 }
 0x1ff   : > { %v3129_v56 = vpop.eup %3128  ;;  %v1231_v35 = vmul.f32 %v1214_v27, %v4110_v49  ;;  %v1212_v36 = vmul.f32 0.6931472, %v3127_v30 }
 0x200   : > { %v3131_v38 = vpop.eup %3130  ;;  %3150 = vlog2.f32 %v1287_v31  ;;  %v1288_v24 = vadd.f32 %v1272_v32, %v4136_v20  ;;  %v1269_v42 = vmul.f32 %v3477_v39, %v3129_v56  ;;  %v3483_v31 = vld [vmem:[%s3852_s12 + $0x188] sm:$0xff] }
 0x201   : > { %v3133_v45 = vpop.eup %3132  ;;  %3152 = vpow2.f32 %v1257_v34  ;;  %v1261_v37 = vmul.f32 1.442695, %v1231_v35  ;;  %v1230_v46 = vmul.f32 %v1212_v36, %v4110_v49  ;;  %v1216_v43 = vmul.f32 0.6931472, %v3131_v38  ;;  %v3484_v38 = vld [vmem:[%s3852_s12 + $0x1c8] sm:$0xff] }
 0x202   : > { %3154 = vlog2.f32 %v1288_v24  ;;  %v1285_v47 = vadd.f32 %v1269_v42, %v4136_v20  ;;  %v1270_v48 = vmul.f32 %v3478_v6, %v3133_v45 }
 0x203   : > { %v3135_v51 = vpop.eup %3134  ;;  %3156 = vpow2.f32 %v1261_v37  ;;  %v1259_v53 = vmul.f32 1.442695, %v1230_v46  ;;  %v1232_v54 = vmul.f32 %v1216_v43, %v4110_v49 }
 0x204   : > { %v3137_v57 = vpop.eup %3136  ;;  %v1302_v55 = vmul.f32 0.6931472, %v3135_v51  ;;  %3158 = vlog2.f32 %v1285_v47  ;;  %v1286_v61 = vadd.f32 %v1270_v48, %v4136_v20  ;;  %v3485_v47 = vld [vmem:[%s3852_s12 + $0x1a8] sm:$0xff] }
 0x205   : > { %v3139_v25 = vpop.eup %3138  ;;  %v1275_v63 = vmul.f32 %v3479_v62, %v3137_v57  ;;  %3160 = vpow2.f32 %v1259_v53  ;;  %v1263_v44 = vmul.f32 1.442695, %v1232_v54 }
 0x206   : > { %v3141_v0 = vpop.eup %3140  ;;  %v1331_v1 = vmul.f32 %v1302_v55, %v4163_v14  ;;  %v1298_v3 = vmul.f32 0.6931472, %v3139_v25  ;;  %3162 = vlog2.f32 %v1286_v61  ;;  %v3486_v55 = vld [vmem:[%s3852_s12 + $0x1e8] sm:$0xff] }
 0x207   : > { %v1291_v8 = vadd.f32 %v1275_v63, %v4136_v20  ;;  %v1276_v52 = vmul.f32 %v3480_v7, %v3141_v0  ;;  %3164 = vpow2.f32 %v1263_v44 }
 0x208   : > { %v3143_v11 = vpop.eup %3142  ;;  %v1349_v12 = vmul.f32 1.442695, %v1331_v1  ;;  %v1329_v13 = vmul.f32 %v1298_v3, %v4163_v14 }
 0x209   : > { %v3145_v10 = vpop.eup %3144  ;;  %3166 = vlog2.f32 %v1291_v8  ;;  %v1292_v4 = vadd.f32 %v1276_v52, %v4136_v20  ;;  %v1273_v5 = vmul.f32 %v3481_v40, %v3143_v11 }
 0x20a   : > { %v3147_v9 = vpop.eup %3146  ;;  %3168 = vpow2.f32 %v1349_v12  ;;  %v1345_v15 = vmul.f32 1.442695, %v1329_v13  ;;  %v1300_v16 = vmul.f32 0.6931472, %v3145_v10 }
 0x20b   : > { %v3149_v28 = vpop.eup %3148  ;;  %v1304_v17 = vmul.f32 0.6931472, %v3147_v9  ;;  %3170 = vlog2.f32 %v1292_v4  ;;  %v1289_v58 = vadd.f32 %v1273_v5, %v4136_v20 }
 0x20c   : > { %3172 = vpow2.f32 %v1345_v15  ;;  %v1330_v18 = vmul.f32 %v1300_v16, %v4163_v14  ;;  %v1274_v21 = vmul.f32 %v3482_v19, %v3149_v28 }
 0x20d   : > { %v3151_v41 = vpop.eup %3150  ;;  %v1332_v22 = vmul.f32 %v1304_v17, %v4163_v14  ;;  %3174 = vlog2.f32 %v1289_v58 }
 0x20e   : > { %v3153_v23 = vpop.eup %3152  ;;  %v1347_v2 = vmul.f32 1.442695, %v1330_v18  ;;  %v1310_v26 = vmul.f32 0.6931472, %v3151_v41  ;;  %v1290_v29 = vadd.f32 %v1274_v21, %v4136_v20 }
 0x20f   : > { %v3155_v27 = vpop.eup %3154  ;;  %v1351_v30 = vmul.f32 1.442695, %v1332_v22  ;;  %v1277_v59 = vmul.f32 %v3483_v31, %v3153_v23 }
 0x210   : > { %v3157_v32 = vpop.eup %3156  ;;  %3176 = vpow2.f32 %v1347_v2  ;;  %v1335_v34 = vmul.f32 %v1310_v26, %v4163_v14  ;;  %v1312_v56 = vmul.f32 0.6931472, %v3155_v27 }
 0x211   : > { %v3159_v35 = vpop.eup %3158  ;;  %3178 = vpow2.f32 %v1351_v30  ;;  %v1293_v36 = vadd.f32 %v1277_v59, %v4136_v20  ;;  %v1279_v24 = vmul.f32 %v3484_v38, %v3157_v32 }
 0x212   : > { %v3161_v39 = vpop.eup %3160  ;;  %v1357_v42 = vmul.f32 1.442695, %v1335_v34  ;;  %v1336_v45 = vmul.f32 %v1312_v56, %v4163_v14  ;;  %v1306_v37 = vmul.f32 0.6931472, %v3159_v35  ;;  %3180 = vlog2.f32 %v1290_v29 }
 0x213   : > { %v3163_v46 = vpop.eup %3162  ;;  %3182 = vlog2.f32 %v1293_v36  ;;  %v1295_v43 = vadd.f32 %v1279_v24, %v4136_v20  ;;  %v1278_v6 = vmul.f32 %v3485_v47, %v3161_v39 }
 0x214   : > { %v3165_v48 = vpop.eup %3164  ;;  %3184 = vpow2.f32 %v1357_v42  ;;  %v1359_v51 = vmul.f32 1.442695, %v1336_v45  ;;  %v1333_v53 = vmul.f32 %v1306_v37, %v4163_v14  ;;  %v1308_v54 = vmul.f32 0.6931472, %v3163_v46 }
 0x215   : > { %3186 = vlog2.f32 %v1295_v43  ;;  %v1294_v57 = vadd.f32 %v1278_v6, %v4136_v20  ;;  %v1280_v61 = vmul.f32 %v3486_v55, %v3165_v48 }
 0x216   : > { %v3167_v25 = vpop.eup %3166  ;;  %3188 = vpow2.f32 %v1359_v51  ;;  %v1353_v62 = vmul.f32 1.442695, %v1333_v53  ;;  %v1334_v63 = vmul.f32 %v1308_v54, %v4163_v14 }
 0x217   : > { %v3169_v44 = vpop.eup %3168  ;;  %v1318_v0 = vmul.f32 0.6931472, %v3167_v25  ;;  %3190 = vlog2.f32 %v1294_v57  ;;  %v1296_v1 = vadd.f32 %v1280_v61, %v4136_v20  ;;  %v2829_v61 = vpop.f32.mrf.mxu0 }
 0x218   : > { %v3171_v3 = vpop.eup %3170  ;;  %v1379_v8 = vsub.f32 %v3169_v44, %v4197_v33  ;;  %3192 = vpow2.f32 %v1353_v62  ;;  %v1355_v7 = vmul.f32 1.442695, %v1334_v63 }
 0x219   : > { %v3173_v52 = vpop.eup %3172  ;;  %v1339_v11 = vmul.f32 %v1318_v0, %v4163_v14  ;;  %v1320_v12 = vmul.f32 0.6931472, %v3171_v3  ;;  %3194 = vlog2.f32 %v1296_v1  ;;  %v1563_v62 = vpop.f32.mrf.mxu0 }
 0x21a   : > { %v3175_v13 = vpop.eup %3174  ;;  %1395 = vst [vmem:[%s3864_s26 + $0x48] sm:$0xff] %v1379_v8  ;;  %v1377_v10 = vsub.f32 %v3173_v52, %v4197_v33  ;;  %3196 = vpow2.f32 %v1355_v7 }
 0x21b   : > { %v1365_v4 = vmul.f32 1.442695, %v1339_v11  ;;  %v1340_v40 = vmul.f32 %v1320_v12, %v4163_v14  ;;  %v1314_v5 = vmul.f32 0.6931472, %v3175_v13  ;;  %v2830_v8 = vpop.f32.mrf.mxu0 }
 0x21c   : > { %1393 = vst [vmem:[%s3864_s26 + $0x8] sm:$0xff] %v1377_v10 }
 0x21d   : > { %v3177_v9 = vpop.eup %3176  ;;  %3198 = vpow2.f32 %v1365_v4  ;;  %v1367_v15 = vmul.f32 1.442695, %v1340_v40  ;;  %v1337_v16 = vmul.f32 %v1314_v5, %v4163_v14  ;;  %v1566_v13 = vpop.f32.mrf.mxu0 }
 0x21e   : > { %v3179_v28 = vpop.eup %3178  ;;  %v1378_v17 = vsub.f32 %v3177_v9, %v4197_v33 }
 0x21f   : > { %v3181_v58 = vpop.eup %3180  ;;  %v1380_v18 = vsub.f32 %v3179_v28, %v4197_v33  ;;  %3200 = vpow2.f32 %v1367_v15  ;;  %v1361_v19 = vmul.f32 1.442695, %v1337_v16  ;;  %v2833_v4 = vpop.f32.mrf.mxu0 }
 0x220   : > { %v3183_v21 = vpop.eup %3182  ;;  %1394 = vst [vmem:[%s3864_s26 + $0x28] sm:$0xff] %v1378_v17  ;;  %v1316_v41 = vmul.f32 0.6931472, %v3181_v58 }
 0x221   : > { %v3185_v22 = vpop.eup %3184  ;;  %1396 = vst [vmem:[%s3864_s26 + $0x68] sm:$0xff] %v1380_v18  ;;  %3202 = vpow2.f32 %v1361_v19  ;;  %v1322_v23 = vmul.f32 0.6931472, %v3183_v21  ;;  %v1579_v40 = vpop.f32.mrf.mxu0 }
 0x222   : > { %v3187_v2 = vpop.eup %3186  ;;  %v1383_v26 = vsub.f32 %v3185_v22, %v4197_v33  ;;  %v1338_v29 = vmul.f32 %v1316_v41, %v4163_v14 }
 0x223   : > { %v3189_v27 = vpop.eup %3188  ;;  %v1341_v30 = vmul.f32 %v1322_v23, %v4163_v14  ;;  %v1326_v31 = vmul.f32 0.6931472, %v3187_v2  ;;  %v2834_v5 = vpop.f32.mrf.mxu0 }
 0x224   : > { %v3191_v59 = vpop.eup %3190  ;;  %1399 = vst [vmem:[%s3864_s26 + $0xc8] sm:$0xff] %v1383_v26  ;;  %v1384_v32 = vsub.f32 %v3189_v27, %v4197_v33  ;;  %v1363_v34 = vmul.f32 1.442695, %v1338_v29 }
 0x225   : > { %v3193_v56 = vpop.eup %3192  ;;  %v1369_v35 = vmul.f32 1.442695, %v1341_v30  ;;  %v1343_v36 = vmul.f32 %v1326_v31, %v4163_v14  ;;  %v1324_v38 = vmul.f32 0.6931472, %v3191_v59  ;;  %v1582_v16 = vpop.f32.mrf.mxu0 }
 0x226   : > { %v3195_v24 = vpop.eup %3194  ;;  %1400 = vst [vmem:[%s3864_s26 + $0xe8] sm:$0xff] %v1384_v32  ;;  %v1381_v39 = vsub.f32 %v3193_v56, %v4197_v33  ;;  %3204 = vpow2.f32 %v1363_v34 }
 0x227   : > { %v3197_v42 = vpop.eup %3196  ;;  %3206 = vpow2.f32 %v1369_v35  ;;  %v1373_v45 = vmul.f32 1.442695, %v1343_v36  ;;  %v1342_v37 = vmul.f32 %v1324_v38, %v4163_v14  ;;  %v1328_v46 = vmul.f32 0.6931472, %v3195_v24  ;;  %v2837_v19 = vpop.f32.mrf.mxu0 }
 0x228   : > { %1397 = vst [vmem:[%s3864_s26 + $0x88] sm:$0xff] %v1381_v39  ;;  %v1382_v43 = vsub.f32 %v3197_v42, %v4197_v33 }
 0x229   : > { %3208 = vpow2.f32 %v1373_v45  ;;  %v1371_v47 = vmul.f32 1.442695, %v1342_v37  ;;  %v1344_v6 = vmul.f32 %v1328_v46, %v4163_v14  ;;  %v1595_v26 = vpop.f32.mrf.mxu0 }
 0x22a   : > { %v3199_v48 = vpop.eup %3198  ;;  %1398 = vst [vmem:[%s3864_s26 + $0xa8] sm:$0xff] %v1382_v43 }
 0x22b   : > { %v1387_v51 = vsub.f32 %v3199_v48, %v4197_v33  ;;  %3210 = vpow2.f32 %v1371_v47  ;;  %v1375_v53 = vmul.f32 1.442695, %v1344_v6  ;;  %v2838_v56 = vpop.f32.mrf.mxu0 }
 0x22c   : > { %v3201_v54 = vpop.eup %3200 }
 0x22d   : > { %1403 = vst [vmem:[%s3864_s26 + $0x148] sm:$0xff] %v1387_v51  ;;  %v1388_v57 = vsub.f32 %v3201_v54, %v4197_v33  ;;  %3212 = vpow2.f32 %v1375_v53  ;;  %v1598_v46 = vpop.f32.mrf.mxu0 }
 0x22e   : > { %v3203_v55 = vpop.eup %3202 }
 0x22f   : > { %1404 = vst [vmem:[%s3864_s26 + $0x168] sm:$0xff] %v1388_v57  ;;  %v1385_v25 = vsub.f32 %v3203_v55, %v4197_v33 }
 0x231   : > { %1401 = vst [vmem:[%s3864_s26 + $0x108] sm:$0xff] %v1385_v25  ;;  %v4396_v25 = vpop.f32.mrf.mxu0 }
 0x233   : > { %v3205_v63 = vpop.eup %3204 }
 0x234   : > { %v3207_v44 = vpop.eup %3206  ;;  %v1386_v0 = vsub.f32 %v3205_v63, %v4197_v33 }
 0x235   : > { %v1389_v1 = vsub.f32 %v3207_v44, %v4197_v33 }
 0x236   : > { %v3209_v3 = vpop.eup %3208  ;;  %1402 = vst [vmem:[%s3864_s26 + $0x128] sm:$0xff] %v1386_v0 }
 0x237   : > { %1405 = vst [vmem:[%s3864_s26 + $0x188] sm:$0xff] %v1389_v1  ;;  %v1391_v7 = vsub.f32 %v3209_v3, %v4197_v33 }
 0x238   : > { %v3211_v52 = vpop.eup %3210 }
 0x239   : > { %1407 = vst [vmem:[%s3864_s26 + $0x1c8] sm:$0xff] %v1391_v7  ;;  %v1390_v11 = vsub.f32 %v3211_v52, %v4197_v33 }
 0x23a   : > { %v3213_v12 = vpop.eup %3212 }
 0x23b   : > { %1406 = vst [vmem:[%s3864_s26 + $0x1a8] sm:$0xff] %v1390_v11  ;;  %v1392_v10 = vsub.f32 %v3213_v12, %v4197_v33  ;;  %v1611_v12 = vpop.f32.mrf.mxu0 }
 0x23d   : > { %1408 = vst [vmem:[%s3864_s26 + $0x1e8] sm:$0xff] %v1392_v10 }
 0x249   : > { %v1446_v9 = vpop.permute.xlu1 %1445 }
 0x24a   : > { %v1515_v15 = vmul.f32 %v4276_v50, %v1446_v9 }
 0x24c   : > { %v1572_v28 = vadd.f32 %v2829_v61, %v1515_v15 }
 0x24d   : > { %v1436_v17 = vpop.permute.xlu1 %1435 }
 0x24e   : > { %v1628_v58 = vadd.f32 %v1572_v28, %v4091_v60  ;;  %v1513_v18 = vmul.f32 %v4276_v50, %v1436_v17  ;;  %1902 = vperm.xlu1 %2948, %v1572_v28  }
 0x24f   : > { %v1451_v21 = vpop.permute.xlu0 %1450 }
 0x250   : > { %3214 = vlog2.f32 %v1628_v58  ;;  %v1564_v41 = vadd.f32 %v1563_v62, %v1513_v18  ;;  %v1516_v22 = vmul.f32 %v4276_v50, %v1451_v21 }
 0x252   : > { %v1626_v23 = vadd.f32 %v1564_v41, %v4091_v60  ;;  %v1575_v2 = vadd.f32 %v2830_v8, %v1516_v22  ;;  %1892 = vperm.xlu1 %2948, %v1564_v41  }
 0x253   : > { %v1466_v29 = vpop.permute.xlu1 %1465  ;;  %v1441_v27 = vpop.permute.xlu0 %1440 }
 0x254   : > { %3216 = vlog2.f32 %v1626_v23  ;;  %v1629_v30 = vadd.f32 %v1575_v2, %v4091_v60  ;;  %v1519_v31 = vmul.f32 %v4276_v50, %v1466_v29  ;;  %v1514_v59 = vmul.f32 %v4276_v50, %v1441_v27  ;;  %1907 = vperm.xlu0 %2949, %v1575_v2  }
 0x256   : > { %3218 = vlog2.f32 %v1629_v30  ;;  %v1588_v32 = vadd.f32 %v2833_v4, %v1519_v31  ;;  %v1567_v34 = vadd.f32 %v1566_v13, %v1514_v59 }
 0x257   : > { %v1456_v35 = vpop.permute.xlu1 %1455  ;;  %v1471_v36 = vpop.permute.xlu0 %1470 }
 0x258   : > { %v1632_v38 = vadd.f32 %v1588_v32, %v4091_v60  ;;  %v1627_v24 = vadd.f32 %v1567_v34, %v4091_v60  ;;  %v1517_v39 = vmul.f32 %v4276_v50, %v1456_v35  ;;  %v1520_v42 = vmul.f32 %v4276_v50, %v1471_v36  ;;  %1922 = vperm.xlu1 %2948, %v1588_v32  }
 0x259   : > { %1897 = vperm.xlu0 %2949, %v1567_v34  }
 0x25a   : > { %3220 = vlog2.f32 %v1632_v38  ;;  %v1580_v45 = vadd.f32 %v1579_v40, %v1517_v39  ;;  %v1591_v37 = vadd.f32 %v2834_v5, %v1520_v42 }
 0x25b   : > { %3222 = vlog2.f32 %v1627_v24  ;;  %v1486_v43 = vpop.permute.xlu1 %1485  ;;  %v1461_v47 = vpop.permute.xlu0 %1460 }
 0x25c   : > { %v1630_v6 = vadd.f32 %v1580_v45, %v4091_v60  ;;  %v1633_v48 = vadd.f32 %v1591_v37, %v4091_v60  ;;  %v1523_v51 = vmul.f32 %v4276_v50, %v1486_v43  ;;  %v1518_v53 = vmul.f32 %v4276_v50, %v1461_v47  ;;  %1912 = vperm.xlu1 %2948, %v1580_v45  }
 0x25d   : > { %v3215_v54 = vpop.eup %3214  ;;  %1927 = vperm.xlu0 %2949, %v1591_v37  }
 0x25e   : > { %v1647_v57 = vmul.f32 0.6931472, %v3215_v54  ;;  %3224 = vlog2.f32 %v1630_v6  ;;  %v1604_v55 = vadd.f32 %v2837_v19, %v1523_v51  ;;  %v1583_v61 = vadd.f32 %v1582_v16, %v1518_v53  ;;  %v2842_v19 = vpop.f32.mrf.mxu0 }
 0x25f   : > { %3226 = vlog2.f32 %v1633_v48  ;;  %v1491_v62 = vpop.permute.xlu0 %1490 }
 0x260   : > { %v1676_v63 = vmul.f32 %v1647_v57, %v4110_v49  ;;  %v1636_v44 = vadd.f32 %v1604_v55, %v4091_v60  ;;  %v1631_v0 = vadd.f32 %v1583_v61, %v4091_v60  ;;  %v1476_v1 = vpop.permute.xlu1 %1475  ;;  %v1524_v3 = vmul.f32 %v4276_v50, %v1491_v62  ;;  %1942 = vperm.xlu1 %2948, %v1604_v55  }
 0x261   : > { %v3217_v8 = vpop.eup %3216  ;;  %v1521_v7 = vmul.f32 %v4276_v50, %v1476_v1  ;;  %1917 = vperm.xlu0 %2949, %v1583_v61  }
 0x262   : > { %v1694_v52 = vmul.f32 1.442695, %v1676_v63  ;;  %v1643_v11 = vmul.f32 0.6931472, %v3217_v8  ;;  %3228 = vlog2.f32 %v1636_v44  ;;  %v1607_v13 = vadd.f32 %v2838_v56, %v1524_v3  ;;  %v1614_v56 = vpop.f32.mrf.mxu0  ;;  %v3487_v3 = vld [vmem:[%s3852_s12 + $0x50] sm:$0xff] }
 0x263   : > { %v3219_v10 = vpop.eup %3218  ;;  %3230 = vlog2.f32 %v1631_v0  ;;  %v1596_v4 = vadd.f32 %v1595_v26, %v1521_v7  ;;  %v1481_v40 = vpop.permute.xlu0 %1480 }
 0x264   : > { %3232 = vpow2.f32 %v1694_v52  ;;  %v1674_v5 = vmul.f32 %v1643_v11, %v4110_v49  ;;  %v1649_v9 = vmul.f32 0.6931472, %v3219_v10  ;;  %v1637_v15 = vadd.f32 %v1607_v13, %v4091_v60 }
 0x265   : > { %v1634_v16 = vadd.f32 %v1596_v4, %v4091_v60  ;;  %v1496_v28 = vpop.permute.xlu1 %1495  ;;  %v1522_v17 = vmul.f32 %v4276_v50, %v1481_v40  ;;  %1932 = vperm.xlu1 %2948, %v1596_v4   ;;  %1947 = vperm.xlu0 %2949, %v1607_v13  }
 0x266   : > { %v1690_v58 = vmul.f32 1.442695, %v1674_v5  ;;  %v1677_v18 = vmul.f32 %v1649_v9, %v4110_v49  ;;  %3234 = vlog2.f32 %v1637_v15  ;;  %v1525_v21 = vmul.f32 %v4276_v50, %v1496_v28  ;;  %v3488_v15 = vld [vmem:[%s3852_s12 + $0x10] sm:$0xff] }
 0x267   : > { %v3221_v41 = vpop.eup %3220  ;;  %3236 = vlog2.f32 %v1634_v16  ;;  %v1599_v22 = vadd.f32 %v1598_v46, %v1522_v17 }
 0x268   : > { %v3223_v23 = vpop.eup %3222  ;;  %3238 = vpow2.f32 %v1690_v58  ;;  %v1696_v2 = vmul.f32 1.442695, %v1677_v18  ;;  %v1655_v26 = vmul.f32 0.6931472, %v3221_v41  ;;  %v1612_v29 = vadd.f32 %v1611_v12, %v1525_v21  ;;  %v1501_v27 = vpop.permute.xlu0 %1500  ;;  %v3489_v21 = vld [vmem:[%s3852_s12 + $0x70] sm:$0xff] }
 0x269   : > { %v1645_v30 = vmul.f32 0.6931472, %v3223_v23  ;;  %v1635_v31 = vadd.f32 %v1599_v22, %v4091_v60  ;;  %v1506_v59 = vpop.permute.xlu1 %1505  ;;  %v1526_v32 = vmul.f32 %v4276_v50, %v1501_v27  ;;  %1937 = vperm.xlu0 %2949, %v1599_v22  }
 0x26a   : > { %3240 = vpow2.f32 %v1696_v2  ;;  %v1680_v34 = vmul.f32 %v1655_v26, %v4110_v49  ;;  %v1638_v35 = vadd.f32 %v1612_v29, %v4091_v60  ;;  %v1527_v36 = vmul.f32 %v4276_v50, %v1506_v59  ;;  %1952 = vperm.xlu1 %2948, %v1612_v29  }
 0x26b   : > { %v3225_v38 = vpop.eup %3224  ;;  %v1675_v24 = vmul.f32 %v1645_v30, %v4110_v49  ;;  %3242 = vlog2.f32 %v1635_v31  ;;  %v1615_v39 = vadd.f32 %v1614_v56, %v1526_v32  ;;  %v3490_v32 = vld [vmem:[%s3852_s12 + $0xd0] sm:$0xff] }
 0x26c   : > { %v3227_v42 = vpop.eup %3226  ;;  %v1702_v45 = vmul.f32 1.442695, %v1680_v34  ;;  %v1651_v37 = vmul.f32 0.6931472, %v3225_v38  ;;  %3244 = vlog2.f32 %v1638_v35  ;;  %v1620_v46 = vadd.f32 %v4396_v25, %v1527_v36  ;;  %v1511_v43 = vpop.permute.xlu0 %1510  ;;  %v3491_v36 = vld [vmem:[%s3852_s12 + $0x30] sm:$0xff] }
 0x26d   : > { %v1692_v47 = vmul.f32 1.442695, %v1675_v24  ;;  %v1657_v6 = vmul.f32 0.6931472, %v3227_v42  ;;  %v1639_v48 = vadd.f32 %v1615_v39, %v4091_v60  ;;  %v1528_v51 = vmul.f32 %v4276_v50, %v1511_v43  ;;  %1957 = vperm.xlu0 %2949, %v1615_v39  }
 0x26e   : > { %3246 = vpow2.f32 %v1702_v45  ;;  %v1678_v53 = vmul.f32 %v1651_v37, %v4110_v49  ;;  %v1640_v54 = vadd.f32 %v1620_v46, %v4091_v60  ;;  %1962 = vperm.xlu1 %2948, %v1620_v46  }
 0x26f   : > { %v3229_v57 = vpop.eup %3228  ;;  %3248 = vpow2.f32 %v1692_v47  ;;  %v1681_v55 = vmul.f32 %v1657_v6, %v4110_v49  ;;  %v1623_v61 = vadd.f32 %v2842_v19, %v1528_v51 }
 0x270   : > { %v3231_v25 = vpop.eup %3230  ;;  %v1698_v62 = vmul.f32 1.442695, %v1678_v53  ;;  %v1663_v63 = vmul.f32 0.6931472, %v3229_v57  ;;  %3250 = vlog2.f32 %v1640_v54  ;;  %v3493_v57 = vld [vmem:[%s3852_s12 + $0xf0] sm:$0xff] }
 0x271   : > { %v3233_v44 = vpop.eup %3232  ;;  %v1704_v0 = vmul.f32 1.442695, %v1681_v55  ;;  %v1653_v50 = vmul.f32 0.6931472, %v3231_v25  ;;  %3252 = vlog2.f32 %v1639_v48  ;;  %v1641_v1 = vadd.f32 %v1623_v61, %v4091_v60  ;;  %1967 = vperm.xlu0 %2949, %v1623_v61   ;;  %v3492_v48 = vld [vmem:[%s3852_s12 + $0x90] sm:$0xff] }
 0x272   : > { %v1724_v8 = vmul.f32 %v3487_v3, %v3233_v44  ;;  %3254 = vpow2.f32 %v1698_v62  ;;  %v1684_v7 = vmul.f32 %v1663_v63, %v4110_v49 }
 0x273   : > { %v3235_v52 = vpop.eup %3234  ;;  %3256 = vpow2.f32 %v1704_v0  ;;  %v1679_v11 = vmul.f32 %v1653_v50, %v4110_v49 }
 0x274   : > { %v3237_v12 = vpop.eup %3236  ;;  %v1740_v13 = vadd.f32 %v1724_v8, %v4136_v20  ;;  %v1710_v10 = vmul.f32 1.442695, %v1684_v7  ;;  %v1665_v4 = vmul.f32 0.6931472, %v3235_v52  ;;  %3258 = vlog2.f32 %v1641_v1  ;;  %v3494_v52 = vld [vmem:[%s3852_s12 + $0x150] sm:$0xff] }
 0x275   : > { %v3239_v40 = vpop.eup %3238  ;;  %v1700_v5 = vmul.f32 1.442695, %v1679_v11  ;;  %v1659_v9 = vmul.f32 0.6931472, %v3237_v12 }
 0x276   : > { %3260 = vlog2.f32 %v1740_v13  ;;  %v1722_v16 = vmul.f32 %v3488_v15, %v3239_v40  ;;  %v1685_v28 = vmul.f32 %v1665_v4, %v4110_v49  ;;  %v3495_v13 = vld [vmem:[%s3852_s12 + $0xb0] sm:$0xff] }
 0x277   : > { %v3241_v17 = vpop.eup %3240  ;;  %3262 = vpow2.f32 %v1710_v10  ;;  %v1682_v58 = vmul.f32 %v1659_v9, %v4110_v49 }
 0x278   : > { %v3243_v18 = vpop.eup %3242  ;;  %v1738_v19 = vadd.f32 %v1722_v16, %v4136_v20  ;;  %v1725_v41 = vmul.f32 %v3489_v21, %v3241_v17  ;;  %3264 = vpow2.f32 %v1700_v5  ;;  %v1712_v2 = vmul.f32 1.442695, %v1685_v28 }
 0x279   : > { %v3245_v22 = vpop.eup %3244  ;;  %v1706_v23 = vmul.f32 1.442695, %v1682_v58  ;;  %v1661_v26 = vmul.f32 0.6931472, %v3243_v18  ;;  %v3496_v58 = vld [vmem:[%s3852_s12 + $0x110] sm:$0xff] }
 0x27a   : > { %3266 = vlog2.f32 %v1738_v19  ;;  %v1741_v29 = vadd.f32 %v1725_v41, %v4136_v20  ;;  %v1667_v27 = vmul.f32 0.6931472, %v3245_v22 }
 0x27b   : > { %v3247_v30 = vpop.eup %3246  ;;  %3268 = vpow2.f32 %v1706_v23  ;;  %v1683_v31 = vmul.f32 %v1661_v26, %v4110_v49  ;;  %v3497_v23 = vld [vmem:[%s3852_s12 + $0x170] sm:$0xff] }
 0x27c   : > { %v3249_v59 = vpop.eup %3248  ;;  %3270 = vlog2.f32 %v1741_v29  ;;  %v1728_v34 = vmul.f32 %v3490_v32, %v3247_v30  ;;  %v1686_v56 = vmul.f32 %v1667_v27, %v4110_v49 }
 0x27d   : > { %v3251_v35 = vpop.eup %3250  ;;  %v1723_v38 = vmul.f32 %v3491_v36, %v3249_v59  ;;  %3272 = vpow2.f32 %v1712_v2  ;;  %v1708_v24 = vmul.f32 1.442695, %v1683_v31  ;;  %v3498_v59 = vld [vmem:[%s3852_s12 + $0x130] sm:$0xff] }
 0x27e   : > { %v3253_v39 = vpop.eup %3252  ;;  %v1744_v42 = vadd.f32 %v1728_v34, %v4136_v20  ;;  %v1714_v45 = vmul.f32 1.442695, %v1686_v56  ;;  %v1671_v37 = vmul.f32 0.6931472, %v3251_v35 }
 0x27f   : > { %v3255_v46 = vpop.eup %3254  ;;  %v1739_v43 = vadd.f32 %v1723_v38, %v4136_v20  ;;  %3274 = vpow2.f32 %v1708_v24  ;;  %v1669_v47 = vmul.f32 0.6931472, %v3253_v39 }
 0x280   : > { %v3257_v6 = vpop.eup %3256  ;;  %3276 = vlog2.f32 %v1744_v42  ;;  %v1726_v51 = vmul.f32 %v3492_v48, %v3255_v46  ;;  %v1688_v53 = vmul.f32 %v1671_v37, %v4110_v49  ;;  %v3499_v42 = vld [vmem:[%s3852_s12 + $0x190] sm:$0xff] }
 0x281   : > { %v3259_v54 = vpop.eup %3258  ;;  %3278 = vlog2.f32 %v1739_v43  ;;  %v1729_v55 = vmul.f32 %v3493_v57, %v3257_v6  ;;  %v1687_v61 = vmul.f32 %v1669_v47, %v4110_v49 }
 0x282   : > { %v1742_v25 = vadd.f32 %v1726_v51, %v4136_v20  ;;  %3280 = vpow2.f32 %v1714_v45  ;;  %v1718_v62 = vmul.f32 1.442695, %v1688_v53  ;;  %v1673_v63 = vmul.f32 0.6931472, %v3259_v54 }
 0x283   : > { %v3261_v44 = vpop.eup %3260  ;;  %v1745_v0 = vadd.f32 %v1729_v55, %v4136_v20  ;;  %v1716_v50 = vmul.f32 1.442695, %v1687_v61  ;;  %v3500_v61 = vld [vmem:[%s3852_s12 + $0x1d0] sm:$0xff] }
 0x284   : > { %v3263_v1 = vpop.eup %3262  ;;  %v1759_v3 = vmul.f32 0.6931472, %v3261_v44  ;;  %3282 = vlog2.f32 %v1742_v25  ;;  %v1689_v8 = vmul.f32 %v1673_v63, %v4110_v49  ;;  %v3501_v44 = vld [vmem:[%s3852_s12 + $0x1b0] sm:$0xff] }
 0x285   : > { %v3265_v7 = vpop.eup %3264  ;;  %3284 = vlog2.f32 %v1745_v0  ;;  %v1732_v11 = vmul.f32 %v3494_v52, %v3263_v1 }
 0x286   : > { %v1788_v12 = vmul.f32 %v1759_v3, %v4163_v14  ;;  %v1727_v10 = vmul.f32 %v3495_v13, %v3265_v7  ;;  %3286 = vpow2.f32 %v1718_v62  ;;  %v1720_v4 = vmul.f32 1.442695, %v1689_v8  ;;  %v3502_v8 = vld [vmem:[%s3852_s12 + $0x1f0] sm:$0xff] }
 0x287   : > { %v3267_v40 = vpop.eup %3266  ;;  %v1748_v5 = vadd.f32 %v1732_v11, %v4136_v20  ;;  %3288 = vpow2.f32 %v1716_v50 }
 0x288   : > { %v3269_v9 = vpop.eup %3268  ;;  %v1806_v15 = vmul.f32 1.442695, %v1788_v12  ;;  %v1755_v16 = vmul.f32 0.6931472, %v3267_v40  ;;  %v1743_v28 = vadd.f32 %v1727_v10, %v4136_v20  ;;  %3290 = vpow2.f32 %v1720_v4 }
 0x289   : > { %v3271_v17 = vpop.eup %3270  ;;  %3292 = vlog2.f32 %v1748_v5  ;;  %v1730_v18 = vmul.f32 %v3496_v58, %v3269_v9 }
 0x28a   : > { %v3273_v19 = vpop.eup %3272  ;;  %3294 = vpow2.f32 %v1806_v15  ;;  %v1786_v21 = vmul.f32 %v1755_v16, %v4163_v14  ;;  %v1761_v41 = vmul.f32 0.6931472, %v3271_v17 }
 0x28b   : > { %3296 = vlog2.f32 %v1743_v28  ;;  %v1746_v22 = vadd.f32 %v1730_v18, %v4136_v20  ;;  %v1733_v2 = vmul.f32 %v3497_v23, %v3273_v19 }
 0x28c   : > { %v3275_v26 = vpop.eup %3274  ;;  %v1802_v29 = vmul.f32 1.442695, %v1786_v21  ;;  %v1789_v27 = vmul.f32 %v1761_v41, %v4163_v14 }
 0x28d   : > { %v3277_v30 = vpop.eup %3276  ;;  %3298 = vlog2.f32 %v1746_v22  ;;  %v1749_v31 = vadd.f32 %v1733_v2, %v4136_v20  ;;  %v1731_v32 = vmul.f32 %v3498_v59, %v3275_v26 }
 0x28e   : > { %v3279_v34 = vpop.eup %3278  ;;  %3300 = vpow2.f32 %v1802_v29  ;;  %v1808_v56 = vmul.f32 1.442695, %v1789_v27  ;;  %v1767_v35 = vmul.f32 0.6931472, %v3277_v30 }
 0x28f   : > { %v3281_v36 = vpop.eup %3280  ;;  %v1757_v38 = vmul.f32 0.6931472, %v3279_v34  ;;  %3302 = vlog2.f32 %v1749_v31  ;;  %v1747_v24 = vadd.f32 %v1731_v32, %v4136_v20 }
 0x290   : > { %3304 = vpow2.f32 %v1808_v56  ;;  %v1792_v39 = vmul.f32 %v1767_v35, %v4163_v14  ;;  %v1734_v45 = vmul.f32 %v3499_v42, %v3281_v36 }
 0x291   : > { %v3283_v37 = vpop.eup %3282  ;;  %v1787_v46 = vmul.f32 %v1757_v38, %v4163_v14  ;;  %3306 = vlog2.f32 %v1747_v24 }
 0x292   : > { %v3285_v43 = vpop.eup %3284  ;;  %v1814_v47 = vmul.f32 1.442695, %v1792_v39  ;;  %v1763_v6 = vmul.f32 0.6931472, %v3283_v37  ;;  %v1750_v48 = vadd.f32 %v1734_v45, %v4136_v20 }
 0x293   : > { %v3287_v51 = vpop.eup %3286  ;;  %v1804_v53 = vmul.f32 1.442695, %v1787_v46  ;;  %v1769_v54 = vmul.f32 0.6931472, %v3285_v43 }
 0x294   : > { %v3289_v57 = vpop.eup %3288  ;;  %3308 = vpow2.f32 %v1814_v47  ;;  %v1790_v55 = vmul.f32 %v1763_v6, %v4163_v14  ;;  %v1736_v25 = vmul.f32 %v3500_v61, %v3287_v51 }
 0x295   : > { %v3291_v62 = vpop.eup %3290  ;;  %3310 = vpow2.f32 %v1804_v53  ;;  %v1793_v63 = vmul.f32 %v1769_v54, %v4163_v14  ;;  %v1735_v0 = vmul.f32 %v3501_v44, %v3289_v57 }
 0x296   : > { %v3293_v50 = vpop.eup %3292  ;;  %v1810_v1 = vmul.f32 1.442695, %v1790_v55  ;;  %3312 = vlog2.f32 %v1750_v48  ;;  %v1752_v3 = vadd.f32 %v1736_v25, %v4136_v20  ;;  %v1737_v7 = vmul.f32 %v3502_v8, %v3291_v62  ;;  %v2861_v8 = vpop.f32.mrf.mxu1 }
 0x297   : > { %v3295_v52 = vpop.eup %3294  ;;  %v1816_v11 = vmul.f32 1.442695, %v1793_v63  ;;  %v1775_v12 = vmul.f32 0.6931472, %v3293_v50  ;;  %v1751_v13 = vadd.f32 %v1735_v0, %v4136_v20 }
 0x298   : > { %v3297_v10 = vpop.eup %3296  ;;  %v1836_v4 = vsub.f32 %v3295_v52, %v4197_v33  ;;  %3314 = vpow2.f32 %v1810_v1  ;;  %v1753_v40 = vadd.f32 %v1737_v7, %v4136_v20 }
 0x299   : > { %3316 = vpow2.f32 %v1816_v11  ;;  %v1796_v5 = vmul.f32 %v1775_v12, %v4163_v14  ;;  %v1765_v9 = vmul.f32 0.6931472, %v3297_v10 }
 0x29a   : > { %v3299_v15 = vpop.eup %3298  ;;  %1852 = vst [vmem:[%s3864_s26 + $0x50] sm:$0xff] %v1836_v4  ;;  %3318 = vlog2.f32 %v1752_v3 }
 0x29b   : > { %v3301_v16 = vpop.eup %3300  ;;  %v1822_v28 = vmul.f32 1.442695, %v1796_v5  ;;  %v1791_v17 = vmul.f32 %v1765_v9, %v4163_v14  ;;  %v1771_v58 = vmul.f32 0.6931472, %v3299_v15  ;;  %3320 = vlog2.f32 %v1751_v13  ;;  %v2020_v13 = vpop.f32.mrf.mxu1 }
 0x29c   : > { %v3303_v18 = vpop.eup %3302  ;;  %v1834_v19 = vsub.f32 %v3301_v16, %v4197_v33  ;;  %3322 = vlog2.f32 %v1753_v40 }
 0x29d   : > { %v3305_v21 = vpop.eup %3304  ;;  %3324 = vpow2.f32 %v1822_v28  ;;  %v1812_v41 = vmul.f32 1.442695, %v1791_v17  ;;  %v1794_v22 = vmul.f32 %v1771_v58, %v4163_v14  ;;  %v1777_v23 = vmul.f32 0.6931472, %v3303_v18  ;;  %v2862_v4 = vpop.f32.mrf.mxu1 }
 0x29e   : > { %v3307_v2 = vpop.eup %3306  ;;  %1850 = vst [vmem:[%s3864_s26 + $0x10] sm:$0xff] %v1834_v19  ;;  %v1837_v26 = vsub.f32 %v3305_v21, %v4197_v33 }
 0x29f   : > { %3326 = vpow2.f32 %v1812_v41  ;;  %v1818_v29 = vmul.f32 1.442695, %v1794_v22  ;;  %v1797_v27 = vmul.f32 %v1777_v23, %v4163_v14  ;;  %v1773_v30 = vmul.f32 0.6931472, %v3307_v2  ;;  %v2023_v9 = vpop.f32.mrf.mxu1  ;;  %v4514_v23 = vld [vmem:[%s4839_s2] ss:$0 sm:$0xff] }
 0x2a0   : > { %1853 = vst [vmem:[%s3864_s26 + $0x70] sm:$0xff] %v1837_v26 }
 0x2a1   : > { %v3309_v31 = vpop.eup %3308  ;;  %3328 = vpow2.f32 %v1818_v29  ;;  %v1824_v59 = vmul.f32 1.442695, %v1797_v27  ;;  %v1795_v32 = vmul.f32 %v1773_v30, %v4163_v14  ;;  %v2865_v19 = vpop.f32.mrf.mxu1 }
 0x2a2   : > { %v3311_v34 = vpop.eup %3310  ;;  %v1840_v56 = vsub.f32 %v3309_v31, %v4197_v33 }
 0x2a3   : > { %v3313_v35 = vpop.eup %3312  ;;  %v1835_v36 = vsub.f32 %v3311_v34, %v4197_v33  ;;  %3330 = vpow2.f32 %v1824_v59  ;;  %v1820_v38 = vmul.f32 1.442695, %v1795_v32  ;;  %v2036_v21 = vpop.f32.mrf.mxu1 }
 0x2a4   : > { %1856 = vst [vmem:[%s3864_s26 + $0xd0] sm:$0xff] %v1840_v56  ;;  %v1779_v24 = vmul.f32 0.6931472, %v3313_v35 }
 0x2a5   : > { %v3315_v39 = vpop.eup %3314  ;;  %1851 = vst [vmem:[%s3864_s26 + $0x30] sm:$0xff] %v1835_v36  ;;  %3332 = vpow2.f32 %v1820_v38  ;;  %v2866_v41 = vpop.f32.mrf.mxu1 }
 0x2a6   : > { %v3317_v42 = vpop.eup %3316  ;;  %v1838_v45 = vsub.f32 %v3315_v39, %v4197_v33  ;;  %v1798_v37 = vmul.f32 %v1779_v24, %v4163_v14 }
 0x2a7   : > { %v3319_v46 = vpop.eup %3318  ;;  %v1841_v43 = vsub.f32 %v3317_v42, %v4197_v33  ;;  %v2039_v26 = vpop.f32.mrf.mxu1 }
 0x2a8   : > { %v3321_v47 = vpop.eup %3320  ;;  %1854 = vst [vmem:[%s3864_s26 + $0x90] sm:$0xff] %v1838_v45  ;;  %v1826_v6 = vmul.f32 1.442695, %v1798_v37  ;;  %v1783_v48 = vmul.f32 0.6931472, %v3319_v46 }
 0x2a9   : > { %v3323_v51 = vpop.eup %3322  ;;  %1857 = vst [vmem:[%s3864_s26 + $0xf0] sm:$0xff] %v1841_v43  ;;  %v1781_v53 = vmul.f32 0.6931472, %v3321_v47  ;;  %v2869_v59 = vpop.f32.mrf.mxu1 }
 0x2aa   : > { %v3325_v54 = vpop.eup %3324  ;;  %3334 = vpow2.f32 %v1826_v6  ;;  %v1800_v57 = vmul.f32 %v1783_v48, %v4163_v14  ;;  %v1785_v55 = vmul.f32 0.6931472, %v3323_v51 }
 0x2ab   : > { %v1844_v61 = vsub.f32 %v3325_v54, %v4197_v33  ;;  %v1799_v25 = vmul.f32 %v1781_v53, %v4163_v14  ;;  %v2052_v38 = vpop.f32.mrf.mxu1 }
 0x2ac   : > { %v3327_v62 = vpop.eup %3326  ;;  %v1830_v63 = vmul.f32 1.442695, %v1800_v57  ;;  %v1801_v44 = vmul.f32 %v1785_v55, %v4163_v14 }
 0x2ad   : > { %1860 = vst [vmem:[%s3864_s26 + $0x150] sm:$0xff] %v1844_v61  ;;  %v1839_v0 = vsub.f32 %v3327_v62, %v4197_v33  ;;  %v1828_v50 = vmul.f32 1.442695, %v1799_v25  ;;  %v2870_v43 = vpop.f32.mrf.mxu1 }
 0x2ae   : > { %v3329_v1 = vpop.eup %3328  ;;  %3336 = vpow2.f32 %v1830_v63  ;;  %v1832_v3 = vmul.f32 1.442695, %v1801_v44 }
 0x2af   : > { %1855 = vst [vmem:[%s3864_s26 + $0xb0] sm:$0xff] %v1839_v0  ;;  %v1842_v7 = vsub.f32 %v3329_v1, %v4197_v33  ;;  %3338 = vpow2.f32 %v1828_v50  ;;  %v2055_v61 = vpop.f32.mrf.mxu1 }
 0x2b0   : > { %v3331_v52 = vpop.eup %3330  ;;  %3340 = vpow2.f32 %v1832_v3 }
 0x2b1   : > { %1858 = vst [vmem:[%s3864_s26 + $0x110] sm:$0xff] %v1842_v7  ;;  %v1845_v11 = vsub.f32 %v3331_v52, %v4197_v33  ;;  %v4539_v52 = vpop.f32.mrf.mxu1 }
 0x2b2   : > { %v3333_v12 = vpop.eup %3332 }
 0x2b3   : > { %1861 = vst [vmem:[%s3864_s26 + $0x170] sm:$0xff] %v1845_v11  ;;  %v1843_v10 = vsub.f32 %v3333_v12, %v4197_v33 }
 0x2b5   : > { %1859 = vst [vmem:[%s3864_s26 + $0x130] sm:$0xff] %v1843_v10 }
 0x2b7   : > { %v3335_v40 = vpop.eup %3334 }
 0x2b8   : > { %v1846_v5 = vsub.f32 %v3335_v40, %v4197_v33 }
 0x2ba   : > { %1862 = vst [vmem:[%s3864_s26 + $0x190] sm:$0xff] %v1846_v5 }
 0x2bb   : > { %v3337_v15 = vpop.eup %3336 }
 0x2bc   : > { %v3339_v16 = vpop.eup %3338  ;;  %v1848_v28 = vsub.f32 %v3337_v15, %v4197_v33 }
 0x2bd   : > { %v3341_v17 = vpop.eup %3340  ;;  %v1847_v58 = vsub.f32 %v3339_v16, %v4197_v33 }
 0x2be   : > { %1864 = vst [vmem:[%s3864_s26 + $0x1d0] sm:$0xff] %v1848_v28  ;;  %v1849_v18 = vsub.f32 %v3341_v17, %v4197_v33  ;;  %v2068_v17 = vpop.f32.mrf.mxu1 }
 0x2bf   : > { %1863 = vst [vmem:[%s3864_s26 + $0x1b0] sm:$0xff] %v1847_v58 }
 0x2c0   : > { %1865 = vst [vmem:[%s3864_s26 + $0x1f0] sm:$0xff] %v1849_v18 }
 0x2c9   : > { %v1903_v22 = vpop.permute.xlu1 %1902 }
 0x2ca   : > { %v1972_v2 = vmul.f32 %v4514_v23, %v1903_v22 }
 0x2cc   : > { %v2029_v29 = vadd.f32 %v2861_v8, %v1972_v2 }
 0x2cd   : > { %v1893_v27 = vpop.permute.xlu1 %1892 }
 0x2ce   : > { %v2085_v30 = vadd.f32 %v2029_v29, %v4091_v60  ;;  %v1970_v31 = vmul.f32 %v4514_v23, %v1893_v27  ;;  %2343 = vrot.lane.b32.xlu1 %v2029_v29, %s3599_s15 }
 0x2cf   : > { %v1908_v32 = vpop.permute.xlu0 %1907 }
 0x2d0   : > { %3342 = vlog2.f32 %v2085_v30  ;;  %v2021_v34 = vadd.f32 %v2020_v13, %v1970_v31  ;;  %v1973_v56 = vmul.f32 %v4514_v23, %v1908_v32 }
 0x2d2   : > { %v2083_v35 = vadd.f32 %v2021_v34, %v4091_v60  ;;  %v2032_v36 = vadd.f32 %v2862_v4, %v1973_v56  ;;  %2339 = vrot.lane.b32.xlu1 %v2021_v34, %s3599_s15 }
 0x2d3   : > { %v1923_v24 = vpop.permute.xlu1 %1922 }
 0x2d4   : > { %3344 = vlog2.f32 %v2083_v35  ;;  %v2086_v39 = vadd.f32 %v2032_v36, %v4091_v60  ;;  %v1976_v42 = vmul.f32 %v4514_v23, %v1923_v24  ;;  %v1898_v45 = vpop.permute.xlu0 %1897  ;;  %2345 = vrot.lane.b32.xlu0 %v2032_v36, %s3599_s15 }
 0x2d5   : > { %v1971_v37 = vmul.f32 %v4514_v23, %v1898_v45 }
 0x2d6   : > { %3346 = vlog2.f32 %v2086_v39  ;;  %v2045_v46 = vadd.f32 %v2865_v19, %v1976_v42 }
 0x2d7   : > { %v2024_v47 = vadd.f32 %v2023_v9, %v1971_v37  ;;  %v1913_v6 = vpop.permute.xlu1 %1912 }
 0x2d8   : > { %v2089_v48 = vadd.f32 %v2045_v46, %v4091_v60  ;;  %v1974_v51 = vmul.f32 %v4514_v23, %v1913_v6  ;;  %v1928_v53 = vpop.permute.xlu0 %1927  ;;  %2351 = vrot.lane.b32.xlu1 %v2045_v46, %s3599_s15 }
 0x2d9   : > { %v2084_v54 = vadd.f32 %v2024_v47, %v4091_v60  ;;  %v1977_v57 = vmul.f32 %v4514_v23, %v1928_v53  ;;  %2341 = vrot.lane.b32.xlu0 %v2024_v47, %s3599_s15 }
 0x2da   : > { %3348 = vlog2.f32 %v2089_v48  ;;  %v2037_v55 = vadd.f32 %v2036_v21, %v1974_v51 }
 0x2db   : > { %3350 = vlog2.f32 %v2084_v54  ;;  %v2048_v25 = vadd.f32 %v2866_v41, %v1977_v57  ;;  %v1943_v62 = vpop.permute.xlu1 %1942 }
 0x2dc   : > { %v2087_v63 = vadd.f32 %v2037_v55, %v4091_v60  ;;  %v1980_v44 = vmul.f32 %v4514_v23, %v1943_v62  ;;  %v1918_v0 = vpop.permute.xlu0 %1917  ;;  %2347 = vrot.lane.b32.xlu1 %v2037_v55, %s3599_s15 }
 0x2dd   : > { %v3343_v50 = vpop.eup %3342  ;;  %v2090_v1 = vadd.f32 %v2048_v25, %v4091_v60  ;;  %v1975_v3 = vmul.f32 %v4514_v23, %v1918_v0  ;;  %2353 = vrot.lane.b32.xlu0 %v2048_v25, %s3599_s15 }
 0x2de   : > { %v2104_v8 = vmul.f32 0.6931472, %v3343_v50  ;;  %3352 = vlog2.f32 %v2087_v63  ;;  %v2061_v7 = vadd.f32 %v2869_v59, %v1980_v44  ;;  %v2874_v59 = vpop.f32.mrf.mxu1 }
 0x2df   : > { %3354 = vlog2.f32 %v2090_v1  ;;  %v2040_v11 = vadd.f32 %v2039_v26, %v1975_v3 }
 0x2e0   : > { %v2133_v12 = vmul.f32 %v2104_v8, %v4110_v49  ;;  %v2093_v13 = vadd.f32 %v2061_v7, %v4091_v60  ;;  %v1933_v10 = vpop.permute.xlu1 %1932  ;;  %v1948_v4 = vpop.permute.xlu0 %1947  ;;  %2359 = vrot.lane.b32.xlu1 %v2061_v7, %s3599_s15 }
 0x2e1   : > { %v3345_v40 = vpop.eup %3344  ;;  %v2088_v5 = vadd.f32 %v2040_v11, %v4091_v60  ;;  %v1978_v9 = vmul.f32 %v4514_v23, %v1933_v10  ;;  %v1981_v15 = vmul.f32 %v4514_v23, %v1948_v4  ;;  %2349 = vrot.lane.b32.xlu0 %v2040_v11, %s3599_s15  ;;  %v2071_v47 = vpop.f32.mrf.mxu1 }
 0x2e2   : > { %v2151_v16 = vmul.f32 1.442695, %v2133_v12  ;;  %v2100_v28 = vmul.f32 0.6931472, %v3345_v40  ;;  %3356 = vlog2.f32 %v2093_v13 }
 0x2e3   : > { %v3347_v58 = vpop.eup %3346  ;;  %3358 = vlog2.f32 %v2088_v5  ;;  %v2053_v18 = vadd.f32 %v2052_v38, %v1978_v9  ;;  %v2064_v19 = vadd.f32 %v2870_v43, %v1981_v15  ;;  %v3504_v5 = vld [vmem:[%s3852_s12 + $0x58] sm:$0xff] }
 0x2e4   : > { %3360 = vpow2.f32 %v2151_v16  ;;  %v2131_v21 = vmul.f32 %v2100_v28, %v4110_v49  ;;  %v2106_v41 = vmul.f32 0.6931472, %v3347_v58  ;;  %v1938_v22 = vpop.permute.xlu0 %1937 }
 0x2e5   : > { %v2091_v2 = vadd.f32 %v2053_v18, %v4091_v60  ;;  %v2094_v26 = vadd.f32 %v2064_v19, %v4091_v60  ;;  %v1953_v29 = vpop.permute.xlu1 %1952  ;;  %v1979_v27 = vmul.f32 %v4514_v23, %v1938_v22  ;;  %2355 = vrot.lane.b32.xlu1 %v2053_v18, %s3599_s15  ;;  %2361 = vrot.lane.b32.xlu0 %v2064_v19, %s3599_s15 }
 0x2e6   : > { %v2147_v30 = vmul.f32 1.442695, %v2131_v21  ;;  %v2134_v31 = vmul.f32 %v2106_v41, %v4110_v49  ;;  %v1982_v32 = vmul.f32 %v4514_v23, %v1953_v29  ;;  %v3505_v41 = vld [vmem:[%s3852_s12 + $0x18] sm:$0xff] }
 0x2e7   : > { %v3349_v34 = vpop.eup %3348  ;;  %3362 = vlog2.f32 %v2091_v2  ;;  %v2056_v56 = vadd.f32 %v2055_v61, %v1979_v27 }
 0x2e8   : > { %v3351_v35 = vpop.eup %3350  ;;  %3364 = vpow2.f32 %v2147_v30  ;;  %v2153_v36 = vmul.f32 1.442695, %v2134_v31  ;;  %v2112_v38 = vmul.f32 0.6931472, %v3349_v34  ;;  %v2069_v24 = vadd.f32 %v2068_v17, %v1982_v32  ;;  %v1958_v39 = vpop.permute.xlu0 %1957  ;;  %v3506_v31 = vld [vmem:[%s3852_s12 + $0x78] sm:$0xff] }
 0x2e9   : > { %v2102_v42 = vmul.f32 0.6931472, %v3351_v35  ;;  %3366 = vlog2.f32 %v2094_v26  ;;  %v2092_v45 = vadd.f32 %v2056_v56, %v4091_v60  ;;  %v1963_v37 = vpop.permute.xlu1 %1962  ;;  %v1983_v46 = vmul.f32 %v4514_v23, %v1958_v39  ;;  %2357 = vrot.lane.b32.xlu0 %v2056_v56, %s3599_s15 }
 0x2ea   : > { %3368 = vpow2.f32 %v2153_v36  ;;  %v2137_v43 = vmul.f32 %v2112_v38, %v4110_v49  ;;  %v2095_v6 = vadd.f32 %v2069_v24, %v4091_v60  ;;  %v1984_v48 = vmul.f32 %v4514_v23, %v1963_v37  ;;  %2363 = vrot.lane.b32.xlu1 %v2069_v24, %s3599_s15  ;;  %v3507_v37 = vld [vmem:[%s3852_s12 + $0xd8] sm:$0xff] }
 0x2eb   : > { %v3353_v51 = vpop.eup %3352  ;;  %v2132_v53 = vmul.f32 %v2102_v42, %v4110_v49  ;;  %3370 = vlog2.f32 %v2092_v45  ;;  %v2072_v54 = vadd.f32 %v2071_v47, %v1983_v46 }
 0x2ec   : > { %v3355_v57 = vpop.eup %3354  ;;  %v2159_v55 = vmul.f32 1.442695, %v2137_v43  ;;  %v2108_v61 = vmul.f32 0.6931472, %v3353_v51  ;;  %3372 = vlog2.f32 %v2095_v6  ;;  %v2077_v25 = vadd.f32 %v4539_v52, %v1984_v48  ;;  %v1968_v62 = vpop.permute.xlu0 %1967  ;;  %v3508_v6 = vld [vmem:[%s3852_s12 + $0x38] sm:$0xff] }
 0x2ed   : > { %v2149_v63 = vmul.f32 1.442695, %v2132_v53  ;;  %v2114_v44 = vmul.f32 0.6931472, %v3355_v57  ;;  %v2096_v0 = vadd.f32 %v2072_v54, %v4091_v60  ;;  %v1985_v50 = vmul.f32 %v4514_v23, %v1968_v62  ;;  %2365 = vrot.lane.b32.xlu0 %v2072_v54, %s3599_s15 }
 0x2ee   : > { %3374 = vpow2.f32 %v2159_v55  ;;  %v2135_v1 = vmul.f32 %v2108_v61, %v4110_v49  ;;  %v2097_v3 = vadd.f32 %v2077_v25, %v4091_v60  ;;  %2367 = vrot.lane.b32.xlu1 %v2077_v25, %s3599_s15 }
 0x2ef   : > { %v3357_v8 = vpop.eup %3356  ;;  %3376 = vpow2.f32 %v2149_v63  ;;  %v2138_v7 = vmul.f32 %v2114_v44, %v4110_v49  ;;  %v2080_v52 = vadd.f32 %v2874_v59, %v1985_v50  ;;  %v3509_v44 = vld [vmem:[%s3852_s12 + $0x98] sm:$0xff] }
 0x2f0   : > { %v3359_v11 = vpop.eup %3358  ;;  %v2155_v12 = vmul.f32 1.442695, %v2135_v1  ;;  %v2120_v13 = vmul.f32 0.6931472, %v3357_v8  ;;  %3378 = vlog2.f32 %v2097_v3  ;;  %v3510_v3 = vld [vmem:[%s3852_s12 + $0xf8] sm:$0xff] }
 0x2f1   : > { %v3361_v23 = vpop.eup %3360  ;;  %v2161_v10 = vmul.f32 1.442695, %v2138_v7  ;;  %v2110_v4 = vmul.f32 0.6931472, %v3359_v11  ;;  %3380 = vlog2.f32 %v2096_v0  ;;  %v2098_v40 = vadd.f32 %v2080_v52, %v4091_v60  ;;  %2369 = vrot.lane.b32.xlu0 %v2080_v52, %s3599_s15 }
 0x2f2   : > { %v2181_v9 = vmul.f32 %v3504_v5, %v3361_v23  ;;  %3382 = vpow2.f32 %v2155_v12  ;;  %v2141_v15 = vmul.f32 %v2120_v13, %v4110_v49 }
 0x2f3   : > { %3384 = vpow2.f32 %v2161_v10  ;;  %v2136_v16 = vmul.f32 %v2110_v4, %v4110_v49 }
 0x2f4   : > { %v3363_v28 = vpop.eup %3362  ;;  %v2197_v17 = vadd.f32 %v2181_v9, %v4136_v20  ;;  %v2167_v58 = vmul.f32 1.442695, %v2141_v15  ;;  %3386 = vlog2.f32 %v2098_v40  ;;  %v3511_v15 = vld [vmem:[%s3852_s12 + $0x158] sm:$0xff] }
 0x2f5   : > { %v3365_v18 = vpop.eup %3364  ;;  %v2157_v19 = vmul.f32 1.442695, %v2136_v16  ;;  %v2116_v60 = vmul.f32 0.6931472, %v3363_v28 }
 0x2f6   : > { %v3367_v21 = vpop.eup %3366  ;;  %3388 = vlog2.f32 %v2197_v17  ;;  %v2179_v22 = vmul.f32 %v3505_v41, %v3365_v18  ;;  %v3512_v17 = vld [vmem:[%s3852_s12 + $0xb8] sm:$0xff] }
 0x2f7   : > { %v3369_v2 = vpop.eup %3368  ;;  %3390 = vpow2.f32 %v2167_v58  ;;  %v2139_v26 = vmul.f32 %v2116_v60, %v4110_v49  ;;  %v2122_v29 = vmul.f32 0.6931472, %v3367_v21 }
 0x2f8   : > { %v3371_v27 = vpop.eup %3370  ;;  %v2195_v30 = vadd.f32 %v2179_v22, %v4136_v20  ;;  %v2182_v59 = vmul.f32 %v3506_v31, %v3369_v2  ;;  %3392 = vpow2.f32 %v2157_v19 }
 0x2f9   : > { %v3373_v32 = vpop.eup %3372  ;;  %v2163_v34 = vmul.f32 1.442695, %v2139_v26  ;;  %v2142_v56 = vmul.f32 %v2122_v29, %v4110_v49  ;;  %v2118_v35 = vmul.f32 0.6931472, %v3371_v27  ;;  %v3513_v26 = vld [vmem:[%s3852_s12 + $0x118] sm:$0xff] }
 0x2fa   : > { %3394 = vlog2.f32 %v2195_v30  ;;  %v2198_v36 = vadd.f32 %v2182_v59, %v4136_v20  ;;  %v2124_v38 = vmul.f32 0.6931472, %v3373_v32  ;;  %v3514_v32 = vld [vmem:[%s3852_s12 + $0x178] sm:$0xff] }
 0x2fb   : > { %v3375_v24 = vpop.eup %3374  ;;  %3396 = vpow2.f32 %v2163_v34  ;;  %v2169_v39 = vmul.f32 1.442695, %v2142_v56  ;;  %v2140_v42 = vmul.f32 %v2118_v35, %v4110_v49 }
 0x2fc   : > { %v3377_v45 = vpop.eup %3376  ;;  %3398 = vlog2.f32 %v2198_v36  ;;  %v2185_v46 = vmul.f32 %v3507_v37, %v3375_v24  ;;  %v2143_v43 = vmul.f32 %v2124_v38, %v4110_v49 }
 0x2fd   : > { %v3379_v47 = vpop.eup %3378  ;;  %v2180_v48 = vmul.f32 %v3508_v6, %v3377_v45  ;;  %3400 = vpow2.f32 %v2169_v39  ;;  %v2165_v51 = vmul.f32 1.442695, %v2140_v42  ;;  %v3515_v39 = vld [vmem:[%s3852_s12 + $0x138] sm:$0xff] }
 0x2fe   : > { %v3381_v53 = vpop.eup %3380  ;;  %v2201_v54 = vadd.f32 %v2185_v46, %v4136_v20  ;;  %v2171_v57 = vmul.f32 1.442695, %v2143_v43  ;;  %v2128_v55 = vmul.f32 0.6931472, %v3379_v47 }
 0x2ff   : > { %v3383_v61 = vpop.eup %3382  ;;  %v2196_v25 = vadd.f32 %v2180_v48, %v4136_v20  ;;  %3402 = vpow2.f32 %v2165_v51  ;;  %v2126_v62 = vmul.f32 0.6931472, %v3381_v53  ;;  %v3516_v51 = vld [vmem:[%s3852_s12 + $0x198] sm:$0xff] }
 0x300   : > { %v3385_v63 = vpop.eup %3384  ;;  %3404 = vlog2.f32 %v2201_v54  ;;  %v2183_v0 = vmul.f32 %v3509_v44, %v3383_v61  ;;  %v2145_v50 = vmul.f32 %v2128_v55, %v4110_v49 }
 0x301   : > { %v3387_v1 = vpop.eup %3386  ;;  %3406 = vlog2.f32 %v2196_v25  ;;  %v2186_v8 = vmul.f32 %v3510_v3, %v3385_v63  ;;  %v2144_v7 = vmul.f32 %v2126_v62, %v4110_v49  ;;  %v3517_v3 = vld [vmem:[%s3852_s12 + $0x1d8] sm:$0xff] }
 0x302   : > { %v2199_v52 = vadd.f32 %v2183_v0, %v4136_v20  ;;  %3408 = vpow2.f32 %v2171_v57  ;;  %v2175_v11 = vmul.f32 1.442695, %v2145_v50  ;;  %v2130_v12 = vmul.f32 0.6931472, %v3387_v1 }
 0x303   : > { %v3389_v13 = vpop.eup %3388  ;;  %v2202_v23 = vadd.f32 %v2186_v8, %v4136_v20  ;;  %v2173_v10 = vmul.f32 1.442695, %v2144_v7 }
 0x304   : > { %v3391_v4 = vpop.eup %3390  ;;  %v2216_v40 = vmul.f32 0.6931472, %v3389_v13  ;;  %3410 = vlog2.f32 %v2199_v52  ;;  %v2146_v5 = vmul.f32 %v2130_v12, %v4110_v49 }
 0x305   : > { %v3393_v9 = vpop.eup %3392  ;;  %3412 = vlog2.f32 %v2202_v23  ;;  %v2189_v16 = vmul.f32 %v3511_v15, %v3391_v4  ;;  %v3519_v4 = vld [vmem:[%s3852_s12 + $0x1f8] sm:$0xff] }
 0x306   : > { %v2245_v28 = vmul.f32 %v2216_v40, %v4163_v14  ;;  %v2184_v58 = vmul.f32 %v3512_v17, %v3393_v9  ;;  %3414 = vpow2.f32 %v2175_v11  ;;  %v2177_v18 = vmul.f32 1.442695, %v2146_v5  ;;  %v3518_v11 = vld [vmem:[%s3852_s12 + $0x1b8] sm:$0xff]  ;;  %s2676_s12 = sshll.u32 (%p4848_p9), %s3577_s17, 2 }
 0x307   : > { %v3395_v19 = vpop.eup %3394  ;;  %v2205_v60 = vadd.f32 %v2189_v16, %v4136_v20  ;;  %3416 = vpow2.f32 %v2173_v10  ;;  %s2414_s28 = sadd.s32 (%p4848_p9), %s2682_s6, %s2676_s12 }
 0x308   : > { %v3397_v21 = vpop.eup %3396  ;;  %v2263_v41 = vmul.f32 1.442695, %v2245_v28  ;;  %v2212_v22 = vmul.f32 0.6931472, %v3395_v19  ;;  %v2200_v49 = vadd.f32 %v2184_v58, %v4136_v20  ;;  %3418 = vpow2.f32 %v2177_v18  ;;  %s2678_s29 = sshll.u32 (%p4848_p9), %s2414_s28, 3 }
 0x309   : > { %v3399_v2 = vpop.eup %3398  ;;  %3420 = vlog2.f32 %v2205_v60  ;;  %v2187_v29 = vmul.f32 %v3513_v26, %v3397_v21  ;;  %s4695_s8 = scalar_lea.vmem (%p4848_p9), %s4841_s4, %s2678_s29 }
 0x30a   : > { %v3401_v27 = vpop.eup %3400  ;;  %3422 = vpow2.f32 %v2263_v41  ;;  %v2243_v30 = vmul.f32 %v2212_v22, %v4163_v14  ;;  %v2218_v31 = vmul.f32 0.6931472, %v3399_v2 }
 0x30b   : > { %3424 = vlog2.f32 %v2200_v49  ;;  %v2203_v59 = vadd.f32 %v2187_v29, %v4136_v20  ;;  %v2190_v34 = vmul.f32 %v3514_v32, %v3401_v27 }
 0x30c   : > { %v3403_v56 = vpop.eup %3402  ;;  %v2259_v35 = vmul.f32 1.442695, %v2243_v30  ;;  %v2246_v36 = vmul.f32 %v2218_v31, %v4163_v14 }
 0x30d   : > { %v3405_v38 = vpop.eup %3404  ;;  %3426 = vlog2.f32 %v2203_v59  ;;  %v2206_v24 = vadd.f32 %v2190_v34, %v4136_v20  ;;  %v2188_v42 = vmul.f32 %v3515_v39, %v3403_v56 }
 0x30e   : > { %v3407_v45 = vpop.eup %3406  ;;  %3428 = vpow2.f32 %v2259_v35  ;;  %v2265_v37 = vmul.f32 1.442695, %v2246_v36  ;;  %v2224_v46 = vmul.f32 0.6931472, %v3405_v38 }
 0x30f   : > { %v3409_v43 = vpop.eup %3408  ;;  %v2214_v47 = vmul.f32 0.6931472, %v3407_v45  ;;  %3430 = vlog2.f32 %v2206_v24  ;;  %v2204_v6 = vadd.f32 %v2188_v42, %v4136_v20 }
 0x310   : > { %3432 = vpow2.f32 %v2265_v37  ;;  %v2249_v48 = vmul.f32 %v2224_v46, %v4163_v14  ;;  %v2191_v53 = vmul.f32 %v3516_v51, %v3409_v43 }
 0x311   : > { %v3411_v54 = vpop.eup %3410  ;;  %v2244_v57 = vmul.f32 %v2214_v47, %v4163_v14  ;;  %3434 = vlog2.f32 %v2204_v6 }
 0x312   : > { %v3413_v55 = vpop.eup %3412  ;;  %v2271_v61 = vmul.f32 1.442695, %v2249_v48  ;;  %v2220_v25 = vmul.f32 0.6931472, %v3411_v54  ;;  %v2207_v62 = vadd.f32 %v2191_v53, %v4136_v20 }
 0x313   : > { %v3415_v63 = vpop.eup %3414  ;;  %v2261_v44 = vmul.f32 1.442695, %v2244_v57  ;;  %v2226_v0 = vmul.f32 0.6931472, %v3413_v55 }
 0x314   : > { %v3417_v50 = vpop.eup %3416  ;;  %3436 = vpow2.f32 %v2271_v61  ;;  %v2247_v1 = vmul.f32 %v2220_v25, %v4163_v14  ;;  %v2193_v8 = vmul.f32 %v3517_v3, %v3415_v63 }
 0x315   : > { %v3419_v7 = vpop.eup %3418  ;;  %3438 = vpow2.f32 %v2261_v44  ;;  %v2250_v52 = vmul.f32 %v2226_v0, %v4163_v14  ;;  %v2192_v12 = vmul.f32 %v3518_v11, %v3417_v50 }
 0x316   : > { %v3421_v13 = vpop.eup %3420  ;;  %v2267_v23 = vmul.f32 1.442695, %v2247_v1  ;;  %3440 = vlog2.f32 %v2207_v62  ;;  %v2209_v10 = vadd.f32 %v2193_v8, %v4136_v20  ;;  %v2194_v40 = vmul.f32 %v3519_v4, %v3419_v7 }
 0x317   : > { %v3423_v5 = vpop.eup %3422  ;;  %v2273_v9 = vmul.f32 1.442695, %v2250_v52  ;;  %v2232_v15 = vmul.f32 0.6931472, %v3421_v13  ;;  %v2208_v16 = vadd.f32 %v2192_v12, %v4136_v20 }
 0x318   : > { %v3425_v28 = vpop.eup %3424  ;;  %v2293_v17 = vsub.f32 %v3423_v5, %v4197_v33  ;;  %3442 = vpow2.f32 %v2267_v23  ;;  %v2210_v58 = vadd.f32 %v2194_v40, %v4136_v20 }
 0x319   : > { %3444 = vpow2.f32 %v2273_v9  ;;  %v2253_v18 = vmul.f32 %v2232_v15, %v4163_v14  ;;  %v2222_v19 = vmul.f32 0.6931472, %v3425_v28 }
 0x31a   : > { %v3427_v60 = vpop.eup %3426  ;;  %2309 = vst [vmem:[%s3864_s26 + $0x58] sm:$0xff] %v2293_v17  ;;  %3446 = vlog2.f32 %v2209_v10 }
 0x31b   : > { %v3429_v21 = vpop.eup %3428  ;;  %v2279_v41 = vmul.f32 1.442695, %v2253_v18  ;;  %v2248_v22 = vmul.f32 %v2222_v19, %v4163_v14  ;;  %v2228_v49 = vmul.f32 0.6931472, %v3427_v60  ;;  %3448 = vlog2.f32 %v2208_v16 }
 0x31c   : > { %v3431_v2 = vpop.eup %3430  ;;  %v2291_v26 = vsub.f32 %v3429_v21, %v4197_v33  ;;  %3450 = vlog2.f32 %v2210_v58 }
 0x31d   : > { %v3433_v20 = vpop.eup %3432  ;;  %3452 = vpow2.f32 %v2279_v41  ;;  %v2269_v29 = vmul.f32 1.442695, %v2248_v22  ;;  %v2251_v27 = vmul.f32 %v2228_v49, %v4163_v14  ;;  %v2234_v30 = vmul.f32 0.6931472, %v3431_v2 }
 0x31e   : > { %v3435_v31 = vpop.eup %3434  ;;  %2307 = vst [vmem:[%s3864_s26 + $0x18] sm:$0xff] %v2291_v26  ;;  %v2294_v59 = vsub.f32 %v3433_v20, %v4197_v33 }
 0x31f   : > { %3454 = vpow2.f32 %v2269_v29  ;;  %v2275_v32 = vmul.f32 1.442695, %v2251_v27  ;;  %v2254_v34 = vmul.f32 %v2234_v30, %v4163_v14  ;;  %v2230_v56 = vmul.f32 0.6931472, %v3435_v31 }
 0x320   : > { %2310 = vst [vmem:[%s3864_s26 + $0x78] sm:$0xff] %v2294_v59 }
 0x321   : > { %v3437_v35 = vpop.eup %3436  ;;  %3456 = vpow2.f32 %v2275_v32  ;;  %v2281_v36 = vmul.f32 1.442695, %v2254_v34  ;;  %v2252_v38 = vmul.f32 %v2230_v56, %v4163_v14  ;;  %v2429_v32 = vld [vmem:[%s3864_s26] sm:$0xff] (%p4848_p9)  ;;  %v2431_v34 = vld [vmem:[%s3864_s26 + $0x8] sm:$0xff] (%p4848_p9)  ;;  %v2433_v56 = vld [vmem:[%s3864_s26 + $0x10] sm:$0xff] (%p4848_p9) }
 0x322   : > { %v3439_v24 = vpop.eup %3438  ;;  %v2297_v39 = vsub.f32 %v3437_v35, %v4197_v33  ;;  %2430 = vst [vmem:[%s4695_s8] sm:$0xff] (%p4848_p9), %v2429_v32  ;;  %2432 = vst [vmem:[%s4695_s8 + $0x8] sm:$0xff] (%p4848_p9), %v2431_v34 }
 0x323   : > { %v3441_v42 = vpop.eup %3440  ;;  %v2292_v45 = vsub.f32 %v3439_v24, %v4197_v33  ;;  %3458 = vpow2.f32 %v2281_v36  ;;  %v2277_v37 = vmul.f32 1.442695, %v2252_v38  ;;  %v2437_v36 = vld [vmem:[%s3864_s26 + $0x20] sm:$0xff] (%p4848_p9)  ;;  %v2439_v38 = vld [vmem:[%s3864_s26 + $0x28] sm:$0xff] (%p4848_p9)  ;;  %v2441_v24 = vld [vmem:[%s3864_s26 + $0x30] sm:$0xff] (%p4848_p9)  ;;  %2434 = vst [vmem:[%s4695_s8 + $0x10] sm:$0xff] (%p4848_p9), %v2433_v56 }
 0x324   : > { %2313 = vst [vmem:[%s3864_s26 + $0xd8] sm:$0xff] %v2297_v39  ;;  %v2236_v46 = vmul.f32 0.6931472, %v3441_v42  ;;  %v2445_v42 = vld [vmem:[%s3864_s26 + $0x40] sm:$0xff] (%p4848_p9)  ;;  %2438 = vst [vmem:[%s4695_s8 + $0x40] sm:$0xff] (%p4848_p9), %v2437_v36 }
 0x325   : > { %v3443_v43 = vpop.eup %3442  ;;  %2308 = vst [vmem:[%s3864_s26 + $0x38] sm:$0xff] %v2292_v45  ;;  %3460 = vpow2.f32 %v2277_v37  ;;  %v2435_v35 = vld [vmem:[%s3864_s26 + $0x18] sm:$0xff] (%p4848_p9)  ;;  %v2447_v45 = vld [vmem:[%s3864_s26 + $0x48] sm:$0xff] (%p4848_p9)  ;;  %v2449_v37 = vld [vmem:[%s3864_s26 + $0x50] sm:$0xff] (%p4848_p9) }
 0x326   : > { %v3445_v47 = vpop.eup %3444  ;;  %v2295_v6 = vsub.f32 %v3443_v43, %v4197_v33  ;;  %v2255_v48 = vmul.f32 %v2236_v46, %v4163_v14  ;;  %v2451_v46 = vld [vmem:[%s3864_s26 + $0x58] sm:$0xff] (%p4848_p9)  ;;  %2436 = vst [vmem:[%s4695_s8 + $0x18] sm:$0xff] (%p4848_p9), %v2435_v35  ;;  %2440 = vst [vmem:[%s4695_s8 + $0x48] sm:$0xff] (%p4848_p9), %v2439_v38  ;;  %v2453_v43 = vld [vmem:[%s3864_s26 + $0x60] sm:$0xff] (%p4848_p9) }
 0x327   : > { %v3447_v51 = vpop.eup %3446  ;;  %v2298_v53 = vsub.f32 %v3445_v47, %v4197_v33  ;;  %2442 = vst [vmem:[%s4695_s8 + $0x50] sm:$0xff] (%p4848_p9), %v2441_v24  ;;  %2446 = vst [vmem:[%s4695_s8 + $0x80] sm:$0xff] (%p4848_p9), %v2445_v42  ;;  %v2455_v47 = vld [vmem:[%s3864_s26 + $0x68] sm:$0xff] (%p4848_p9) }
 0x328   : > { %v3449_v54 = vpop.eup %3448  ;;  %2311 = vst [vmem:[%s3864_s26 + $0x98] sm:$0xff] %v2295_v6  ;;  %v2283_v57 = vmul.f32 1.442695, %v2255_v48  ;;  %v2240_v55 = vmul.f32 0.6931472, %v3447_v51  ;;  %2448 = vst [vmem:[%s4695_s8 + $0x88] sm:$0xff] (%p4848_p9), %v2447_v45 }
 0x329   : > { %v3451_v61 = vpop.eup %3450  ;;  %2314 = vst [vmem:[%s3864_s26 + $0xf8] sm:$0xff] %v2298_v53  ;;  %v2238_v25 = vmul.f32 0.6931472, %v3449_v54  ;;  %2450 = vst [vmem:[%s4695_s8 + $0x90] sm:$0xff] (%p4848_p9), %v2449_v37  ;;  %v2457_v6 = vld [vmem:[%s3864_s26 + $0x70] sm:$0xff] (%p4848_p9)  ;;  %v2459_v48 = vld [vmem:[%s3864_s26 + $0x78] sm:$0xff] (%p4848_p9) }
 0x32a   : > { %v3453_v62 = vpop.eup %3452  ;;  %3462 = vpow2.f32 %v2283_v57  ;;  %v2257_v63 = vmul.f32 %v2240_v55, %v4163_v14  ;;  %v2242_v44 = vmul.f32 0.6931472, %v3451_v61  ;;  %2452 = vst [vmem:[%s4695_s8 + $0x98] sm:$0xff] (%p4848_p9), %v2451_v46  ;;  %2454 = vst [vmem:[%s4695_s8 + $0xc0] sm:$0xff] (%p4848_p9), %v2453_v43  ;;  %v2461_v51 = vld [vmem:[%s3864_s26 + $0x80] sm:$0xff] (%p4848_p9)  ;;  %v2463_v53 = vld [vmem:[%s3864_s26 + $0x88] sm:$0xff] (%p4848_p9) }
 0x32b   : > { %v2301_v0 = vsub.f32 %v3453_v62, %v4197_v33  ;;  %v2256_v50 = vmul.f32 %v2238_v25, %v4163_v14  ;;  %2456 = vst [vmem:[%s4695_s8 + $0xc8] sm:$0xff] (%p4848_p9), %v2455_v47  ;;  %2458 = vst [vmem:[%s4695_s8 + $0xd0] sm:$0xff] (%p4848_p9), %v2457_v6  ;;  %v2465_v54 = vld [vmem:[%s3864_s26 + $0x90] sm:$0xff] (%p4848_p9)  ;;  %v2469_v55 = vld [vmem:[%s3864_s26 + $0xa0] sm:$0xff] (%p4848_p9) }
 0x32c   : > { %v3455_v1 = vpop.eup %3454  ;;  %v2287_v3 = vmul.f32 1.442695, %v2257_v63  ;;  %v2258_v8 = vmul.f32 %v2242_v44, %v4163_v14  ;;  %v2443_v39 = vld [vmem:[%s3864_s26 + $0x38] sm:$0xff] (%p4848_p9)  ;;  %2460 = vst [vmem:[%s4695_s8 + $0xd8] sm:$0xff] (%p4848_p9), %v2459_v48  ;;  %2462 = vst [vmem:[%s4695_s8 + $0x100] sm:$0xff] (%p4848_p9), %v2461_v51  ;;  %v2471_v61 = vld [vmem:[%s3864_s26 + $0xa8] sm:$0xff] (%p4848_p9) }
 0x32d   : > { %2317 = vst [vmem:[%s3864_s26 + $0x158] sm:$0xff] %v2301_v0  ;;  %v2296_v7 = vsub.f32 %v3455_v1, %v4197_v33  ;;  %v2285_v52 = vmul.f32 1.442695, %v2256_v50  ;;  %2444 = vst [vmem:[%s4695_s8 + $0x58] sm:$0xff] (%p4848_p9), %v2443_v39  ;;  %v2473_v25 = vld [vmem:[%s3864_s26 + $0xb0] sm:$0xff] (%p4848_p9)  ;;  %v2477_v63 = vld [vmem:[%s3864_s26 + $0xc0] sm:$0xff] (%p4848_p9) }
 0x32e   : > { %v3457_v11 = vpop.eup %3456  ;;  %3464 = vpow2.f32 %v2287_v3  ;;  %v2289_v12 = vmul.f32 1.442695, %v2258_v8  ;;  %2464 = vst [vmem:[%s4695_s8 + $0x108] sm:$0xff] (%p4848_p9), %v2463_v53  ;;  %2466 = vst [vmem:[%s4695_s8 + $0x110] sm:$0xff] (%p4848_p9), %v2465_v54  ;;  %v2479_v44 = vld [vmem:[%s3864_s26 + $0xc8] sm:$0xff] (%p4848_p9)  ;;  %v2481_v0 = vld [vmem:[%s3864_s26 + $0xd0] sm:$0xff] (%p4848_p9) }
 0x32f   : > { %2312 = vst [vmem:[%s3864_s26 + $0xb8] sm:$0xff] %v2296_v7  ;;  %v2299_v13 = vsub.f32 %v3457_v11, %v4197_v33  ;;  %3466 = vpow2.f32 %v2285_v52  ;;  %v2467_v57 = vld [vmem:[%s3864_s26 + $0x98] sm:$0xff] (%p4848_p9)  ;;  %2470 = vst [vmem:[%s4695_s8 + $0x140] sm:$0xff] (%p4848_p9), %v2469_v55  ;;  %v2485_v1 = vld [vmem:[%s3864_s26 + $0xe0] sm:$0xff] (%p4848_p9) }
 0x330   : > { %v3459_v23 = vpop.eup %3458  ;;  %3468 = vpow2.f32 %v2289_v12  ;;  %2468 = vst [vmem:[%s4695_s8 + $0x118] sm:$0xff] (%p4848_p9), %v2467_v57  ;;  %2472 = vst [vmem:[%s4695_s8 + $0x148] sm:$0xff] (%p4848_p9), %v2471_v61  ;;  %v2483_v50 = vld [vmem:[%s3864_s26 + $0xd8] sm:$0xff] (%p4848_p9)  ;;  %v2487_v3 = vld [vmem:[%s3864_s26 + $0xe8] sm:$0xff] (%p4848_p9) }
 0x331   : > { %2315 = vst [vmem:[%s3864_s26 + $0x118] sm:$0xff] %v2299_v13  ;;  %v2302_v10 = vsub.f32 %v3459_v23, %v4197_v33  ;;  %2474 = vst [vmem:[%s4695_s8 + $0x150] sm:$0xff] (%p4848_p9), %v2473_v25  ;;  %v2489_v8 = vld [vmem:[%s3864_s26 + $0xf0] sm:$0xff] (%p4848_p9)  ;;  %v2491_v7 = vld [vmem:[%s3864_s26 + $0xf8] sm:$0xff] (%p4848_p9) }
 0x332   : > { %v3461_v14 = vpop.eup %3460  ;;  %2478 = vst [vmem:[%s4695_s8 + $0x180] sm:$0xff] (%p4848_p9), %v2477_v63  ;;  %2480 = vst [vmem:[%s4695_s8 + $0x188] sm:$0xff] (%p4848_p9), %v2479_v44  ;;  %v2493_v52 = vld [vmem:[%s3864_s26 + $0x100] sm:$0xff] (%p4848_p9)  ;;  %v2495_v11 = vld [vmem:[%s3864_s26 + $0x108] sm:$0xff] (%p4848_p9) }
 0x333   : > { %2318 = vst [vmem:[%s3864_s26 + $0x178] sm:$0xff] %v2302_v10  ;;  %v2300_v4 = vsub.f32 %v3461_v14, %v4197_v33  ;;  %2482 = vst [vmem:[%s4695_s8 + $0x190] sm:$0xff] (%p4848_p9), %v2481_v0  ;;  %v2497_v12 = vld [vmem:[%s3864_s26 + $0x110] sm:$0xff] (%p4848_p9)  ;;  %v2501_v23 = vld [vmem:[%s3864_s26 + $0x120] sm:$0xff] (%p4848_p9) }
 0x334   : > { %2484 = vst [vmem:[%s4695_s8 + $0x198] sm:$0xff] (%p4848_p9), %v2483_v50  ;;  %2486 = vst [vmem:[%s4695_s8 + $0x1c0] sm:$0xff] (%p4848_p9), %v2485_v1  ;;  %v2503_v10 = vld [vmem:[%s3864_s26 + $0x128] sm:$0xff] (%p4848_p9)  ;;  %v2505_v14 = vld [vmem:[%s3864_s26 + $0x130] sm:$0xff] (%p4848_p9) }
 0x335   : > { %2316 = vst [vmem:[%s3864_s26 + $0x138] sm:$0xff] %v2300_v4  ;;  %2488 = vst [vmem:[%s4695_s8 + $0x1c8] sm:$0xff] (%p4848_p9), %v2487_v3 }
 0x336   : > { %v2475_v62 = vld [vmem:[%s3864_s26 + $0xb8] sm:$0xff] (%p4848_p9)  ;;  %2490 = vst [vmem:[%s4695_s8 + $0x1d0] sm:$0xff] (%p4848_p9), %v2489_v8  ;;  %2492 = vst [vmem:[%s4695_s8 + $0x1d8] sm:$0xff] (%p4848_p9), %v2491_v7 }
 0x337   : > { %v3463_v40 = vpop.eup %3462  ;;  %2476 = vst [vmem:[%s4695_s8 + $0x158] sm:$0xff] (%p4848_p9), %v2475_v62  ;;  %2494 = vst [vmem:[%s4695_s8 + $0x200] sm:$0xff] (%p4848_p9), %v2493_v52 }
 0x338   : > { %v2303_v5 = vsub.f32 %v3463_v40, %v4197_v33  ;;  %v2499_v13 = vld [vmem:[%s3864_s26 + $0x118] sm:$0xff] (%p4848_p9)  ;;  %2496 = vst [vmem:[%s4695_s8 + $0x208] sm:$0xff] (%p4848_p9), %v2495_v11  ;;  %2498 = vst [vmem:[%s4695_s8 + $0x210] sm:$0xff] (%p4848_p9), %v2497_v12  ;;  %v2509_v40 = vld [vmem:[%s3864_s26 + $0x140] sm:$0xff] (%p4848_p9) }
 0x339   : > { %2500 = vst [vmem:[%s4695_s8 + $0x218] sm:$0xff] (%p4848_p9), %v2499_v13  ;;  %2502 = vst [vmem:[%s4695_s8 + $0x240] sm:$0xff] (%p4848_p9), %v2501_v23 }
 0x33a   : > { %2319 = vst [vmem:[%s3864_s26 + $0x198] sm:$0xff] %v2303_v5  ;;  %2504 = vst [vmem:[%s4695_s8 + $0x248] sm:$0xff] (%p4848_p9), %v2503_v10  ;;  %v2511_v5 = vld [vmem:[%s3864_s26 + $0x148] sm:$0xff] (%p4848_p9) }
 0x33b   : > { %v3465_v9 = vpop.eup %3464  ;;  %2506 = vst [vmem:[%s4695_s8 + $0x250] sm:$0xff] (%p4848_p9), %v2505_v14  ;;  %2510 = vst [vmem:[%s4695_s8 + $0x280] sm:$0xff] (%p4848_p9), %v2509_v40 }
 0x33c   : > { %v3467_v15 = vpop.eup %3466  ;;  %v2305_v16 = vsub.f32 %v3465_v9, %v4197_v33  ;;  %v2507_v4 = vld [vmem:[%s3864_s26 + $0x138] sm:$0xff] (%p4848_p9)  ;;  %2512 = vst [vmem:[%s4695_s8 + $0x288] sm:$0xff] (%p4848_p9), %v2511_v5  ;;  %v2513_v9 = vld [vmem:[%s3864_s26 + $0x150] sm:$0xff] (%p4848_p9) }
 0x33d   : > { %v3469_v28 = vpop.eup %3468  ;;  %v2304_v17 = vsub.f32 %v3467_v15, %v4197_v33  ;;  %2508 = vst [vmem:[%s4695_s8 + $0x258] sm:$0xff] (%p4848_p9), %v2507_v4  ;;  %v2515_v15 = vld [vmem:[%s3864_s26 + $0x158] sm:$0xff] (%p4848_p9)  ;;  %2514 = vst [vmem:[%s4695_s8 + $0x290] sm:$0xff] (%p4848_p9), %v2513_v9 }
 0x33e   : > { %2321 = vst [vmem:[%s3864_s26 + $0x1d8] sm:$0xff] %v2305_v16  ;;  %v2306_v58 = vsub.f32 %v3469_v28, %v4197_v33  ;;  %v2517_v16 = vld [vmem:[%s3864_s26 + $0x160] sm:$0xff] (%p4848_p9)  ;;  %2516 = vst [vmem:[%s4695_s8 + $0x298] sm:$0xff] (%p4848_p9), %v2515_v15  ;;  %v2519_v28 = vld [vmem:[%s3864_s26 + $0x168] sm:$0xff] (%p4848_p9) }
 0x33f   : > { %2320 = vst [vmem:[%s3864_s26 + $0x1b8] sm:$0xff] %v2304_v17  ;;  %2518 = vst [vmem:[%s4695_s8 + $0x2c0] sm:$0xff] (%p4848_p9), %v2517_v16  ;;  %v2521_v17 = vld [vmem:[%s3864_s26 + $0x170] sm:$0xff] (%p4848_p9) }
 0x340   : > { %2322 = vst [vmem:[%s3864_s26 + $0x1f8] sm:$0xff] %v2306_v58  ;;  %v2344_v18 = vpop.permute.xlu1 %2343  ;;  %v2523_v58 = vld [vmem:[%s3864_s26 + $0x178] sm:$0xff] (%p4848_p9)  ;;  %2520 = vst [vmem:[%s4695_s8 + $0x2c8] sm:$0xff] (%p4848_p9), %v2519_v28 }
 0x341   : > { %2390 = vst.msk [vmem:[#allocation2 + $0x10] sm:$0xff] %vm2387_vm1, %v2344_v18  ;;  %2522 = vst [vmem:[%s4695_s8 + $0x2d0] sm:$0xff] (%p4848_p9), %v2521_v17  ;;  %v2525_v18 = vld [vmem:[%s3864_s26 + $0x180] sm:$0xff] (%p4848_p9) }
 0x342   : > { %2524 = vst [vmem:[%s4695_s8 + $0x2d8] sm:$0xff] (%p4848_p9), %v2523_v58  ;;  %2526 = vst [vmem:[%s4695_s8 + $0x300] sm:$0xff] (%p4848_p9), %v2525_v18 }
 0x344   : > { %v2340_v19 = vpop.permute.xlu1 %2339 }
 0x345   : > { %2388 = vst.msk [vmem:[#allocation2] sm:$0xff] %vm2387_vm1, %v2340_v19  ;;  %v2527_v19 = vld [vmem:[%s3864_s26 + $0x188] sm:$0xff] (%p4848_p9) }
 0x346   : > { %v2346_v60 = vpop.permute.xlu0 %2345  ;;  %2528 = vst [vmem:[%s4695_s8 + $0x308] sm:$0xff] (%p4848_p9), %v2527_v19 }
 0x347   : > { %2391 = vst.msk [vmem:[#allocation2 + $0x18] sm:$0xff] %vm2387_vm1, %v2346_v60  ;;  %v2529_v60 = vld [vmem:[%s3864_s26 + $0x190] sm:$0xff] (%p4848_p9) }
 0x348   : > { %2530 = vst [vmem:[%s4695_s8 + $0x310] sm:$0xff] (%p4848_p9), %v2529_v60 }
 0x34a   : > { %v2352_v21 = vpop.permute.xlu1 %2351 }
 0x34b   : > { %2394 = vst.msk [vmem:[#allocation2 + $0x30] sm:$0xff] %vm2387_vm1, %v2352_v21  ;;  %v2342_v41 = vpop.permute.xlu0 %2341  ;;  %v2531_v21 = vld [vmem:[%s3864_s26 + $0x198] sm:$0xff] (%p4848_p9) }
 0x34c   : > { %2389 = vst.msk [vmem:[#allocation2 + $0x8] sm:$0xff] %vm2387_vm1, %v2342_v41  ;;  %v2533_v41 = vld [vmem:[%s3864_s26 + $0x1a0] sm:$0xff] (%p4848_p9)  ;;  %2532 = vst [vmem:[%s4695_s8 + $0x318] sm:$0xff] (%p4848_p9), %v2531_v21 }
 0x34d   : > { %2534 = vst [vmem:[%s4695_s8 + $0x340] sm:$0xff] (%p4848_p9), %v2533_v41 }
 0x34e   : > { %v2348_v22 = vpop.permute.xlu1 %2347 }
 0x34f   : > { %2392 = vst.msk [vmem:[#allocation2 + $0x20] sm:$0xff] %vm2387_vm1, %v2348_v22  ;;  %v2354_v33 = vpop.permute.xlu0 %2353  ;;  %v2535_v22 = vld [vmem:[%s3864_s26 + $0x1a8] sm:$0xff] (%p4848_p9) }
 0x350   : > { %2395 = vst.msk [vmem:[#allocation2 + $0x38] sm:$0xff] %vm2387_vm1, %v2354_v33  ;;  %2536 = vst [vmem:[%s4695_s8 + $0x348] sm:$0xff] (%p4848_p9), %v2535_v22  ;;  %v2537_v33 = vld [vmem:[%s3864_s26 + $0x1b0] sm:$0xff] (%p4848_p9) }
 0x351   : > { %2538 = vst [vmem:[%s4695_s8 + $0x350] sm:$0xff] (%p4848_p9), %v2537_v33 }
 0x352   : > { %v2360_v49 = vpop.permute.xlu1 %2359 }
 0x353   : > { %2398 = vst.msk [vmem:[#allocation2 + $0x50] sm:$0xff] %vm2387_vm1, %v2360_v49  ;;  %v2350_v2 = vpop.permute.xlu0 %2349  ;;  %v2539_v49 = vld [vmem:[%s3864_s26 + $0x1b8] sm:$0xff] (%p4848_p9) }
 0x354   : > { %2393 = vst.msk [vmem:[#allocation2 + $0x28] sm:$0xff] %vm2387_vm1, %v2350_v2  ;;  %v2541_v2 = vld [vmem:[%s3864_s26 + $0x1c0] sm:$0xff] (%p4848_p9)  ;;  %2540 = vst [vmem:[%s4695_s8 + $0x358] sm:$0xff] (%p4848_p9), %v2539_v49 }
 0x355   : > { %2542 = vst [vmem:[%s4695_s8 + $0x380] sm:$0xff] (%p4848_p9), %v2541_v2 }
 0x357   : > { %v2356_v26 = vpop.permute.xlu1 %2355  ;;  %v2362_v20 = vpop.permute.xlu0 %2361 }
 0x358   : > { %2396 = vst.msk [vmem:[#allocation2 + $0x40] sm:$0xff] %vm2387_vm1, %v2356_v26  ;;  %2399 = vst.msk [vmem:[#allocation2 + $0x58] sm:$0xff] %vm2387_vm1, %v2362_v20  ;;  %v2543_v26 = vld [vmem:[%s3864_s26 + $0x1c8] sm:$0xff] (%p4848_p9)  ;;  %v2545_v20 = vld [vmem:[%s3864_s26 + $0x1d0] sm:$0xff] (%p4848_p9) }
 0x359   : > { %2544 = vst [vmem:[%s4695_s8 + $0x388] sm:$0xff] (%p4848_p9), %v2543_v26  ;;  %2546 = vst [vmem:[%s4695_s8 + $0x390] sm:$0xff] (%p4848_p9), %v2545_v20 }
 0x35b   : > { %v2358_v29 = vpop.permute.xlu0 %2357 }
 0x35c   : > { %v2364_v27 = vpop.permute.xlu1 %2363  ;;  %2397 = vst.msk [vmem:[#allocation2 + $0x48] sm:$0xff] %vm2387_vm1, %v2358_v29  ;;  %v2547_v29 = vld [vmem:[%s3864_s26 + $0x1d8] sm:$0xff] (%p4848_p9) }
 0x35d   : > { %2400 = vst.msk [vmem:[#allocation2 + $0x60] sm:$0xff] %vm2387_vm1, %v2364_v27  ;;  %2548 = vst [vmem:[%s4695_s8 + $0x398] sm:$0xff] (%p4848_p9), %v2547_v29  ;;  %v2549_v27 = vld [vmem:[%s3864_s26 + $0x1e0] sm:$0xff] (%p4848_p9) }
 0x35e   : > { %2550 = vst [vmem:[%s4695_s8 + $0x3c0] sm:$0xff] (%p4848_p9), %v2549_v27 }
 0x35f   : > { %v2366_v30 = vpop.permute.xlu0 %2365 }
 0x360   : > { %v2368_v31 = vpop.permute.xlu1 %2367  ;;  %2401 = vst.msk [vmem:[#allocation2 + $0x68] sm:$0xff] %vm2387_vm1, %v2366_v30  ;;  %2410 = sbr.rel (!%p4848_p9) target bundleno = 870 (0x366), region = 71  ;;  %v2551_v30 = vld [vmem:[%s3864_s26 + $0x1e8] sm:$0xff] (%p4848_p9) }
 0x361   : > { %2402 = vst.msk [vmem:[#allocation2 + $0x70] sm:$0xff] %vm2387_vm1, %v2368_v31  ;;  %v2553_v31 = vld [vmem:[%s3864_s26 + $0x1f0] sm:$0xff] (%p4848_p9)  ;;  %2552 = vst [vmem:[%s4695_s8 + $0x3c8] sm:$0xff] (%p4848_p9), %v2551_v30 }
 0x362   : > { %2554 = vst [vmem:[%s4695_s8 + $0x3d0] sm:$0xff] (%p4848_p9), %v2553_v31 }
 0x363   : > { %v2370_v59 = vpop.permute.xlu0 %2369 }
 0x364   : > { %2403 = vst.msk [vmem:[#allocation2 + $0x78] sm:$0xff] %vm2387_vm1, %v2370_v59  ;;  %v2555_v59 = vld [vmem:[%s3864_s26 + $0x1f8] sm:$0xff] (%p4848_p9) }
 0x365   : > { %2556 = vst [vmem:[%s4695_s8 + $0x3d8] sm:$0xff] %v2555_v59 }
 0x366 PF: > { %s15_s21 = sadd.s32 1, %s3593_s21   ;;  %s4849_s15 = smov %s3573_s16 }
 0x367   : > { %p12_p10 = scmp.ge.s32.totalorder %s15_s21, 6   ;;  %s4850_s16 = smov %s3700_s10 }
 0x368   : > { %s4851_s17 = smov %s3585_s19  ;;  %s4852_s18 = smov %s3589_s20 }
 0x369   : > { %s4853_s19 = smov %s4856_s23  ;;  %s4854_s20 = smov %s4860_s24 }
 0x36a   :  { %14 = sbr.rel (!%p12_p10) target bundleno = 4 (0x4), region = 126 }
 0x36f   :  { %2572 = vsyncpa [#allocation4], 1 }
 0x370   :  { %2574 = vsyncpa [#allocation4 + $0x1], 1 }

</bundles_post_ra>
